<compile_context>
chip_gen: v7x
topology: tpu7x:2x2x1
jax: 0.10.0
libtpu: 0.0.40
codegen_flags: <defaults>
</compile_context>

<pallas_src>
import functools
import math

import jax
import jax.numpy as jnp
from jax.experimental import pallas as pl
from jax.experimental.pallas import tpu as pltpu


def _round_up(x, m):
    return (x + m - 1) // m * m


# ---------------------------------------------------------------------------
# Fused ResidualStack kernel: one grid step == one residual layer.
# ---------------------------------------------------------------------------
def _res_stack_kernel(xf_ref, mask_ref, w1_ref, w2_ref, o_ref,
                      buf_ref, rbuf_ref, *, n_layers, shifts, lead, region):
    """One residual layer per grid step on a flattened, zero-padded NHWC slab.

    xf_ref  : (Mtot, C)     f32   zero-padded NHWC map flattened to rows
    mask_ref: (region, C)   f32   1.0 on valid interior rows, 0.0 on halo rows
    w1_ref  : (1, 9, C, R)  bf16  3x3 conv taps (this layer) in matmul form
    w2_ref  : (1, R, C)     bf16  1x1 conv (this layer) in matmul form
    o_ref   : (region, C)   f32   output rows (interior rows are the result)
    buf_ref : (Mtot, C)     f32   persistent working buffer (layer activations)
    rbuf_ref: (Mtot, C)     f32   relu(buf), computed once per layer
    """
    l = pl.program_id(0)

    @pl.when(l == 0)
    def _():
        buf_ref[...] = xf_ref[...]                  # halo / trailing rows = 0

    # ReLU once per layer over the whole slab (zero rows stay zero, so the
    # leading/trailing and halo rows keep acting as conv zero-padding).
    rbuf_ref[...] = jnp.maximum(buf_ref[...], 0.0)

    # --- res_block: relu -> conv3x3 (no bias) -> relu -> conv1x1 (no bias) ---
    acc = None
    for t, dlt in enumerate(shifts):
        tap = rbuf_ref[pl.ds(lead + dlt, region), :].astype(jnp.bfloat16)
        part = jnp.dot(tap, w1_ref[0, t], preferred_element_type=jnp.float32)
        acc = part if acc is None else acc + part   # f32 accumulate
    h = jnp.maximum(acc, 0.0).astype(jnp.bfloat16)  # (region, R)
    res = jnp.dot(h, w2_ref[0], preferred_element_type=jnp.float32)

    # --- layer output: relu(x + res_block(x)) --------------------------------
    out = jnp.maximum(buf_ref[pl.ds(lead, region), :] + res, 0.0)

    @pl.when(l == n_layers - 1)
    def _():
        o_ref[...] = out                            # halo rows discarded later

    @pl.when(l < n_layers - 1)
    def _():
        # Mask keeps halo/pad rows exactly zero so they remain valid conv
        # zero-padding for the next layer.
        buf_ref[pl.ds(lead, region), :] = out * mask_ref[...]


def residual_stack_forward(x_nhwc, w1_list, w2_list, *, inverse=False):
    """Forward of ResidualStack(in_dim, h_dim, res_h_dim, n_res_layers, inverse).

    x_nhwc : (B, H, W, C) float32 feature map (C == in_dim == h_dim).
    w1_list: per-layer 3x3 conv weights in native PyTorch layout:
               inverse=False -> Conv2d          (R, C, 3, 3)
               inverse=True  -> ConvTranspose2d (C, R, 3, 3)
    w2_list: per-layer 1x1 conv weights:
               inverse=False -> Conv2d          (C, R, 1, 1)
               inverse=True  -> ConvTranspose2d (R, C, 1, 1)
    """
    B, H, W, C = x_nhwc.shape
    L = len(w1_list)

    # ----- weights -> matmul form, stacked over layers, cast to bf16 --------
    w1_taps, w2_mats = [], []
    for w1, w2 in zip(w1_list, w2_list):
        if inverse:
            # ConvTranspose2d(k=3, s=1, p=1) == Conv2d with spatially flipped
            # kernel and swapped channel axes.
            w1s = jnp.transpose(w1[:, :, ::-1, ::-1], (2, 3, 0, 1))     # (3,3,C,R)
            w2m = w2.reshape(w2.shape[0], w2.shape[1])                  # (R, C)
        else:
            w1s = jnp.transpose(w1, (2, 3, 1, 0))                       # (3,3,C,R)
            w2m = w2.reshape(w2.shape[0], w2.shape[1]).T                # (R, C)
        w1_taps.append(w1s.reshape(9, C, -1))
        w2_mats.append(w2m)
    R = w1_taps[0].shape[-1]
    w1_stack = jnp.stack(w1_taps).astype(jnp.bfloat16)                  # (L,9,C,R)
    w2_stack = jnp.stack(w2_mats).astype(jnp.bfloat16)                  # (L,R,C)

    # ----- flatten the zero-padded NHWC map into a 2-D (rows, C) slab -------
    Hp, Wp = H + 2, W + 2
    n_img = B * Hp * Wp
    lead = _round_up(Wp + 1, 8)                 # room for the most-negative tap shift
    region = _round_up(n_img, 8)                # GEMM M padded to 8 sublanes
    m_tot = _round_up(lead + region + Wp + 1, 8)

    # flattened-row shift of each of the 9 conv taps (static ints)
    shifts = tuple((i - 1) * Wp + (j - 1) for i in range(3) for j in range(3))
    # OOB-free invariants (VMEM refs have no runtime bounds check).
    assert lead + min(shifts) >= 0, "tap shift underflows the leading zero rows"
    assert lead + region + max(shifts) <= m_tot, "tap shift overflows the slab"

    xp = jnp.pad(x_nhwc.astype(jnp.float32), ((0, 0), (1, 1), (1, 1), (0, 0)))
    xf = jnp.zeros((m_tot, C), jnp.float32)
    xf = jax.lax.dynamic_update_slice(xf, xp.reshape(n_img, C), (lead, 0))

    # Lane-dense validity mask: 1.0 on interior rows of each padded image.
    r = jnp.arange(region)
    loc = r % (Hp * Wp)
    hp, wp = loc // Wp, loc % Wp
    valid = (r < n_img) & (hp >= 1) & (hp <= H) & (wp >= 1) & (wp <= W)
    mask = jnp.broadcast_to(valid.astype(jnp.float32)[:, None], (region, C))

    kernel = functools.partial(_res_stack_kernel, n_layers=L, shifts=shifts,
                               lead=lead, region=region)

    out_flat = pl.pallas_call(
        kernel,
        grid=(L,),
        in_specs=[
            pl.BlockSpec((m_tot, C), lambda l: (0, 0)),          # constant -> 1 DMA
            pl.BlockSpec((region, C), lambda l: (0, 0)),         # constant -> 1 DMA
            pl.BlockSpec((1, 9, C, R), lambda l: (l, 0, 0, 0)),  # per-layer, pipelined
            pl.BlockSpec((1, R, C), lambda l: (l, 0, 0)),        # per-layer, pipelined
        ],
        out_specs=pl.BlockSpec((region, C), lambda l: (0, 0)),
        out_shape=jax.ShapeDtypeStruct((region, C), jnp.float32),
        scratch_shapes=[pltpu.VMEM((m_tot, C), jnp.float32),     # layer activations
                        pltpu.VMEM((m_tot, C), jnp.float32)],    # relu(activations)
        compiler_params=pltpu.CompilerParams(
            dimension_semantics=("arbitrary",)),
    )(xf, mask, w1_stack, w2_stack)

    out = out_flat[:n_img].reshape(B, Hp, Wp, C)[:, 1:1 + H, 1:1 + W, :]
    return out


# ---------------------------------------------------------------------------
# Plain-JAX reference (mirrors the kernel's bf16-input / f32-accumulate math)
# ---------------------------------------------------------------------------
def residual_stack_reference(x_nhwc, w1_list, w2_list, *, inverse=False):
    x = x_nhwc.astype(jnp.float32)
    for w1, w2 in zip(w1_list, w2_list):
        a = jnp.maximum(x, 0.0).astype(jnp.bfloat16).astype(jnp.float32)
        if inverse:
            wc = jnp.transpose(w1[:, :, ::-1, ::-1], (1, 0, 2, 3))      # (R,C,3,3)
            w2m = w2.reshape(w2.shape[0], w2.shape[1])                  # (R,C)
        else:
            wc = w1                                                     # (R,C,3,3)
            w2m = w2.reshape(w2.shape[0], w2.shape[1]).T                # (R,C)
        wc = wc.astype(jnp.bfloat16).astype(jnp.float32)
        w2m = w2m.astype(jnp.bfloat16).astype(jnp.float32)
        h = jax.lax.conv_general_dilated(
            a, wc, window_strides=(1, 1), padding=((1, 1), (1, 1)),
            dimension_numbers=("NHWC", "OIHW", "NHWC"),
            preferred_element_type=jnp.float32,
            precision=jax.lax.Precision.HIGHEST)
        h = jnp.maximum(h, 0.0).astype(jnp.bfloat16).astype(jnp.float32)
        res = jnp.einsum("bhwr,rc->bhwc", h, w2m,
                         precision=jax.lax.Precision.HIGHEST)
        x = jnp.maximum(x + res, 0.0)
    return x


# ---------------------------------------------------------------------------
if __name__ == "__main__":
    key = jax.random.PRNGKey(0)

    # Shapes implied by clip_pqvae_gan usage: ResidualStack(256, 256, 128, 3)
    # on a 5x5 latent map, batch 2.
    B, H, W = 2, 5, 5
    in_dim = h_dim = 256          # residual add requires in_dim == h_dim
    res_h_dim = 128
    n_res_layers = 3

    def uniform(k, shape, fan_in):
        b = 1.0 / math.sqrt(fan_in)
        return jax.random.uniform(k, shape, jnp.float32, -b, b)

    keys = jax.random.split(key, 1 + 4 * n_res_layers)
    x_nhwc = jax.random.normal(keys[0], (B, H, W, in_dim), jnp.float32)

    # Per-layer weights in native PyTorch layouts (both stack variants).
    w1_fwd, w2_fwd, w1_inv, w2_inv = [], [], [], []
    for l in range(n_res_layers):
        k1, k2, k3, k4 = keys[1 + 4 * l: 5 + 4 * l]
        # ResidualLayer: Conv2d(in,res_h,3,p=1,bias=False), Conv2d(res_h,h,1,bias=False)
        w1_fwd.append(uniform(k1, (res_h_dim, in_dim, 3, 3), in_dim * 9))
        w2_fwd.append(uniform(k2, (h_dim, res_h_dim, 1, 1), res_h_dim))
        # InverseResidualLayer: ConvT(in,res_h,3,p=1,bias=False), ConvT(res_h,h,1,bias=False)
        w1_inv.append(uniform(k3, (in_dim, res_h_dim, 3, 3), in_dim * 9))
        w2_inv.append(uniform(k4, (res_h_dim, h_dim, 1, 1), res_h_dim))

    fwd = jax.jit(functools.partial(residual_stack_forward, inverse=False))
    inv = jax.jit(functools.partial(residual_stack_forward, inverse=True))

    out_fwd = fwd(x_nhwc, w1_fwd, w2_fwd)       # ResidualStack(..., inverse=False)
    out_inv = inv(x_nhwc, w1_inv, w2_inv)       # ResidualStack(..., inverse=True)
    jax.block_until_ready((out_fwd, out_inv))

    ref_fwd = residual_stack_reference(x_nhwc, w1_fwd, w2_fwd, inverse=False)
    ref_inv = residual_stack_reference(x_nhwc, w1_inv, w2_inv, inverse=True)

    assert out_fwd.shape == (B, H, W, h_dim)
    assert out_inv.shape == (B, H, W, h_dim)
    assert bool(jnp.all(jnp.isfinite(out_fwd))) and bool(jnp.all(jnp.isfinite(out_inv)))
    assert bool(jnp.allclose(out_fwd, ref_fwd, atol=1e-2, rtol=1e-2))
    assert bool(jnp.allclose(out_inv, ref_inv, atol=1e-2, rtol=1e-2))
    print("KERNEL_OK")
</pallas_src>

<mosaic_0001>
module attributes {stable_mosaic.version = 11 : i64} {
  func.func @_res_stack_kernel(%arg0: i32, %arg1: memref<120x256xf32, #tpu.memory_space<vmem>>, %arg2: memref<104x256xf32, #tpu.memory_space<vmem>>, %arg3: memref<1x9x256x128xbf16, #tpu.memory_space<vmem>>, %arg4: memref<1x128x256xbf16, #tpu.memory_space<vmem>>, %arg5: memref<104x256xf32, #tpu.memory_space<vmem>>, %arg6: memref<120x256xf32, #tpu.memory_space<vmem>>, %arg7: memref<120x256xf32, #tpu.memory_space<vmem>>) attributes {dimension_semantics = [#tpu.dimension_semantics<arbitrary>], iteration_bounds = array<i64: 3>, scalar_prefetch = 0 : i64, scratch_operands = 2 : i64, tpu.core_type = #tpu.core_type<tc>, window_params = [{pipeline_mode = #tpu.pipeline_mode<synchronous>, transform_indices = @transform_0, window_bounds = array<i64: 120, 256>}, {pipeline_mode = #tpu.pipeline_mode<synchronous>, transform_indices = @transform_1, window_bounds = array<i64: 104, 256>}, {transform_indices = @transform_2, window_bounds = array<i64: 1, 9, 256, 128>}, {transform_indices = @transform_3, window_bounds = array<i64: 1, 128, 256>}, {pipeline_mode = #tpu.pipeline_mode<synchronous>, transform_indices = @transform_4, window_bounds = array<i64: 104, 256>}]} {
    %c0_i32 = arith.constant 0 : i32
    %0 = arith.cmpi eq, %arg0, %c0_i32 : i32
    %1 = arith.extui %0 : i1 to i32
    %c0_i32_0 = arith.constant 0 : i32
    %2 = arith.cmpi ne, %1, %c0_i32_0 : i32
    scf.if %2 {
      %c0_66 = arith.constant 0 : index
      %c0_67 = arith.constant 0 : index
      %76 = vector.load %arg1[%c0_66, %c0_67] : memref<120x256xf32, #tpu.memory_space<vmem>>, vector<120x256xf32>
      %c0_68 = arith.constant 0 : index
      %c0_69 = arith.constant 0 : index
      %77 = vector.load %arg6[%c0_68, %c0_69] : memref<120x256xf32, #tpu.memory_space<vmem>>, vector<120x256xf32>
      tpu.vector_store %arg6[%c0_68, %c0_69], %76 {strides = array<i32>} : memref<120x256xf32, #tpu.memory_space<vmem>>, vector<120x256xf32>,
    } else {
    }
    %c0 = arith.constant 0 : index
    %c0_1 = arith.constant 0 : index
    %3 = vector.load %arg6[%c0, %c0_1] : memref<120x256xf32, #tpu.memory_space<vmem>>, vector<120x256xf32>
    %cst = arith.constant 0.000000e+00 : f32
    %4 = vector.broadcast %cst : f32 to vector<120x256xf32>
    %5 = arith.maximumf %3, %4 : vector<120x256xf32>
    %c0_2 = arith.constant 0 : index
    %c0_3 = arith.constant 0 : index
    %6 = vector.load %arg7[%c0_2, %c0_3] : memref<120x256xf32, #tpu.memory_space<vmem>>, vector<120x256xf32>
    tpu.vector_store %arg7[%c0_2, %c0_3], %5 {strides = array<i32>} : memref<120x256xf32, #tpu.memory_space<vmem>>, vector<120x256xf32>,
    %c0_4 = arith.constant 0 : index
    %c0_5 = arith.constant 0 : index
    %7 = vector.load %arg7[%c0_4, %c0_5] : memref<120x256xf32, #tpu.memory_space<vmem>>, vector<104x256xf32>
    %8 = arith.truncf %7 : vector<104x256xf32> to vector<104x256xbf16>
    %c0_6 = arith.constant 0 : index
    %c0_7 = arith.constant 0 : index
    %c0_8 = arith.constant 0 : index
    %c0_9 = arith.constant 0 : index
    %9 = vector.load %arg3[%c0_6, %c0_7, %c0_8, %c0_9] : memref<1x9x256x128xbf16, #tpu.memory_space<vmem>>, vector<1x1x256x128xbf16>
    %10 = vector.shape_cast %9 : vector<1x1x256x128xbf16> to vector<256x128xbf16>
    %cst_10 = arith.constant dense<0.000000e+00> : vector<104x128xf32>
    %11 = tpu.matmul %8, %10, %cst_10 {dimension_numbers = #tpu.dot_dimension_numbers<[1], [0], [0], [1], [0, 0, 1, 1], [], []>} : vector<104x256xbf16>, vector<256x128xbf16>, vector<104x128xf32> -> vector<104x128xf32>
    %c1 = arith.constant 1 : index
    %c0_11 = arith.constant 0 : index
    %12 = vector.load %arg7[%c1, %c0_11] : memref<120x256xf32, #tpu.memory_space<vmem>>, vector<104x256xf32>
    %13 = arith.truncf %12 : vector<104x256xf32> to vector<104x256xbf16>
    %c0_12 = arith.constant 0 : index
    %c1_13 = arith.constant 1 : index
    %c0_14 = arith.constant 0 : index
    %c0_15 = arith.constant 0 : index
    %14 = vector.load %arg3[%c0_12, %c1_13, %c0_14, %c0_15] : memref<1x9x256x128xbf16, #tpu.memory_space<vmem>>, vector<1x1x256x128xbf16>
    %15 = vector.shape_cast %14 : vector<1x1x256x128xbf16> to vector<256x128xbf16>
    %cst_16 = arith.constant dense<0.000000e+00> : vector<104x128xf32>
    %16 = tpu.matmul %13, %15, %cst_16 {dimension_numbers = #tpu.dot_dimension_numbers<[1], [0], [0], [1], [0, 0, 1, 1], [], []>} : vector<104x256xbf16>, vector<256x128xbf16>, vector<104x128xf32> -> vector<104x128xf32>
    %17 = arith.addf %11, %16 : vector<104x128xf32>
    %c2 = arith.constant 2 : index
    %c0_17 = arith.constant 0 : index
    %18 = vector.load %arg7[%c2, %c0_17] : memref<120x256xf32, #tpu.memory_space<vmem>>, vector<104x256xf32>
    %19 = arith.truncf %18 : vector<104x256xf32> to vector<104x256xbf16>
    %c0_18 = arith.constant 0 : index
    %c2_19 = arith.constant 2 : index
    %c0_20 = arith.constant 0 : index
    %c0_21 = arith.constant 0 : index
    %20 = vector.load %arg3[%c0_18, %c2_19, %c0_20, %c0_21] : memref<1x9x256x128xbf16, #tpu.memory_space<vmem>>, vector<1x1x256x128xbf16>
    %21 = vector.shape_cast %20 : vector<1x1x256x128xbf16> to vector<256x128xbf16>
    %cst_22 = arith.constant dense<0.000000e+00> : vector<104x128xf32>
    %22 = tpu.matmul %19, %21, %cst_22 {dimension_numbers = #tpu.dot_dimension_numbers<[1], [0], [0], [1], [0, 0, 1, 1], [], []>} : vector<104x256xbf16>, vector<256x128xbf16>, vector<104x128xf32> -> vector<104x128xf32>
    %23 = arith.addf %17, %22 : vector<104x128xf32>
    %c7 = arith.constant 7 : index
    %c0_23 = arith.constant 0 : index
    %24 = vector.load %arg7[%c7, %c0_23] : memref<120x256xf32, #tpu.memory_space<vmem>>, vector<104x256xf32>
    %25 = arith.truncf %24 : vector<104x256xf32> to vector<104x256xbf16>
    %c0_24 = arith.constant 0 : index
    %c3 = arith.constant 3 : index
    %c0_25 = arith.constant 0 : index
    %c0_26 = arith.constant 0 : index
    %26 = vector.load %arg3[%c0_24, %c3, %c0_25, %c0_26] : memref<1x9x256x128xbf16, #tpu.memory_space<vmem>>, vector<1x1x256x128xbf16>
    %27 = vector.shape_cast %26 : vector<1x1x256x128xbf16> to vector<256x128xbf16>
    %cst_27 = arith.constant dense<0.000000e+00> : vector<104x128xf32>
    %28 = tpu.matmul %25, %27, %cst_27 {dimension_numbers = #tpu.dot_dimension_numbers<[1], [0], [0], [1], [0, 0, 1, 1], [], []>} : vector<104x256xbf16>, vector<256x128xbf16>, vector<104x128xf32> -> vector<104x128xf32>
    %29 = arith.addf %23, %28 : vector<104x128xf32>
    %c8 = arith.constant 8 : index
    %c0_28 = arith.constant 0 : index
    %30 = vector.load %arg7[%c8, %c0_28] : memref<120x256xf32, #tpu.memory_space<vmem>>, vector<104x256xf32>
    %31 = arith.truncf %30 : vector<104x256xf32> to vector<104x256xbf16>
    %c0_29 = arith.constant 0 : index
    %c4 = arith.constant 4 : index
    %c0_30 = arith.constant 0 : index
    %c0_31 = arith.constant 0 : index
    %32 = vector.load %arg3[%c0_29, %c4, %c0_30, %c0_31] : memref<1x9x256x128xbf16, #tpu.memory_space<vmem>>, vector<1x1x256x128xbf16>
    %33 = vector.shape_cast %32 : vector<1x1x256x128xbf16> to vector<256x128xbf16>
    %cst_32 = arith.constant dense<0.000000e+00> : vector<104x128xf32>
    %34 = tpu.matmul %31, %33, %cst_32 {dimension_numbers = #tpu.dot_dimension_numbers<[1], [0], [0], [1], [0, 0, 1, 1], [], []>} : vector<104x256xbf16>, vector<256x128xbf16>, vector<104x128xf32> -> vector<104x128xf32>
    %35 = arith.addf %29, %34 : vector<104x128xf32>
    %c9 = arith.constant 9 : index
    %c0_33 = arith.constant 0 : index
    %36 = vector.load %arg7[%c9, %c0_33] : memref<120x256xf32, #tpu.memory_space<vmem>>, vector<104x256xf32>
    %37 = arith.truncf %36 : vector<104x256xf32> to vector<104x256xbf16>
    %c0_34 = arith.constant 0 : index
    %c5 = arith.constant 5 : index
    %c0_35 = arith.constant 0 : index
    %c0_36 = arith.constant 0 : index
    %38 = vector.load %arg3[%c0_34, %c5, %c0_35, %c0_36] : memref<1x9x256x128xbf16, #tpu.memory_space<vmem>>, vector<1x1x256x128xbf16>
    %39 = vector.shape_cast %38 : vector<1x1x256x128xbf16> to vector<256x128xbf16>
    %cst_37 = arith.constant dense<0.000000e+00> : vector<104x128xf32>
    %40 = tpu.matmul %37, %39, %cst_37 {dimension_numbers = #tpu.dot_dimension_numbers<[1], [0], [0], [1], [0, 0, 1, 1], [], []>} : vector<104x256xbf16>, vector<256x128xbf16>, vector<104x128xf32> -> vector<104x128xf32>
    %41 = arith.addf %35, %40 : vector<104x128xf32>
    %c14 = arith.constant 14 : index
    %c0_38 = arith.constant 0 : index
    %42 = vector.load %arg7[%c14, %c0_38] : memref<120x256xf32, #tpu.memory_space<vmem>>, vector<104x256xf32>
    %43 = arith.truncf %42 : vector<104x256xf32> to vector<104x256xbf16>
    %c0_39 = arith.constant 0 : index
    %c6 = arith.constant 6 : index
    %c0_40 = arith.constant 0 : index
    %c0_41 = arith.constant 0 : index
    %44 = vector.load %arg3[%c0_39, %c6, %c0_40, %c0_41] : memref<1x9x256x128xbf16, #tpu.memory_space<vmem>>, vector<1x1x256x128xbf16>
    %45 = vector.shape_cast %44 : vector<1x1x256x128xbf16> to vector<256x128xbf16>
    %cst_42 = arith.constant dense<0.000000e+00> : vector<104x128xf32>
    %46 = tpu.matmul %43, %45, %cst_42 {dimension_numbers = #tpu.dot_dimension_numbers<[1], [0], [0], [1], [0, 0, 1, 1], [], []>} : vector<104x256xbf16>, vector<256x128xbf16>, vector<104x128xf32> -> vector<104x128xf32>
    %47 = arith.addf %41, %46 : vector<104x128xf32>
    %c15 = arith.constant 15 : index
    %c0_43 = arith.constant 0 : index
    %48 = vector.load %arg7[%c15, %c0_43] : memref<120x256xf32, #tpu.memory_space<vmem>>, vector<104x256xf32>
    %49 = arith.truncf %48 : vector<104x256xf32> to vector<104x256xbf16>
    %c0_44 = arith.constant 0 : index
    %c7_45 = arith.constant 7 : index
    %c0_46 = arith.constant 0 : index
    %c0_47 = arith.constant 0 : index
    %50 = vector.load %arg3[%c0_44, %c7_45, %c0_46, %c0_47] : memref<1x9x256x128xbf16, #tpu.memory_space<vmem>>, vector<1x1x256x128xbf16>
    %51 = vector.shape_cast %50 : vector<1x1x256x128xbf16> to vector<256x128xbf16>
    %cst_48 = arith.constant dense<0.000000e+00> : vector<104x128xf32>
    %52 = tpu.matmul %49, %51, %cst_48 {dimension_numbers = #tpu.dot_dimension_numbers<[1], [0], [0], [1], [0, 0, 1, 1], [], []>} : vector<104x256xbf16>, vector<256x128xbf16>, vector<104x128xf32> -> vector<104x128xf32>
    %53 = arith.addf %47, %52 : vector<104x128xf32>
    %c16 = arith.constant 16 : index
    %c0_49 = arith.constant 0 : index
    %54 = vector.load %arg7[%c16, %c0_49] : memref<120x256xf32, #tpu.memory_space<vmem>>, vector<104x256xf32>
    %55 = arith.truncf %54 : vector<104x256xf32> to vector<104x256xbf16>
    %c0_50 = arith.constant 0 : index
    %c8_51 = arith.constant 8 : index
    %c0_52 = arith.constant 0 : index
    %c0_53 = arith.constant 0 : index
    %56 = vector.load %arg3[%c0_50, %c8_51, %c0_52, %c0_53] : memref<1x9x256x128xbf16, #tpu.memory_space<vmem>>, vector<1x1x256x128xbf16>
    %57 = vector.shape_cast %56 : vector<1x1x256x128xbf16> to vector<256x128xbf16>
    %cst_54 = arith.constant dense<0.000000e+00> : vector<104x128xf32>
    %58 = tpu.matmul %55, %57, %cst_54 {dimension_numbers = #tpu.dot_dimension_numbers<[1], [0], [0], [1], [0, 0, 1, 1], [], []>} : vector<104x256xbf16>, vector<256x128xbf16>, vector<104x128xf32> -> vector<104x128xf32>
    %59 = arith.addf %53, %58 : vector<104x128xf32>
    %cst_55 = arith.constant 0.000000e+00 : f32
    %60 = vector.broadcast %cst_55 : f32 to vector<104x128xf32>
    %61 = arith.maximumf %59, %60 : vector<104x128xf32>
    %62 = arith.truncf %61 : vector<104x128xf32> to vector<104x128xbf16>
    %c0_56 = arith.constant 0 : index
    %c0_57 = arith.constant 0 : index
    %c0_58 = arith.constant 0 : index
    %63 = vector.load %arg4[%c0_56, %c0_57, %c0_58] : memref<1x128x256xbf16, #tpu.memory_space<vmem>>, vector<1x128x256xbf16>
    %64 = vector.shape_cast %63 : vector<1x128x256xbf16> to vector<128x256xbf16>
    %cst_59 = arith.constant dense<0.000000e+00> : vector<104x256xf32>
    %65 = tpu.matmul %62, %64, %cst_59 {dimension_numbers = #tpu.dot_dimension_numbers<[1], [0], [0], [1], [0, 0, 1, 1], [], []>} : vector<104x128xbf16>, vector<128x256xbf16>, vector<104x256xf32> -> vector<104x256xf32>
    %c8_60 = arith.constant 8 : index
    %c0_61 = arith.constant 0 : index
    %66 = vector.load %arg6[%c8_60, %c0_61] : memref<120x256xf32, #tpu.memory_space<vmem>>, vector<104x256xf32>
    %67 = arith.addf %66, %65 : vector<104x256xf32>
    %cst_62 = arith.constant 0.000000e+00 : f32
    %68 = vector.broadcast %cst_62 : f32 to vector<104x256xf32>
    %69 = arith.maximumf %67, %68 : vector<104x256xf32>
    %c2_i32 = arith.constant 2 : i32
    %70 = arith.cmpi eq, %arg0, %c2_i32 : i32
    %71 = arith.extui %70 : i1 to i32
    %c0_i32_63 = arith.constant 0 : i32
    %72 = arith.cmpi ne, %71, %c0_i32_63 : i32
    scf.if %72 {
      %c0_66 = arith.constant 0 : index
      %c0_67 = arith.constant 0 : index
      %76 = vector.load %arg5[%c0_66, %c0_67] : memref<104x256xf32, #tpu.memory_space<vmem>>, vector<104x256xf32>
      tpu.vector_store %arg5[%c0_66, %c0_67], %69 {strides = array<i32>} : memref<104x256xf32, #tpu.memory_space<vmem>>, vector<104x256xf32>,
    } else {
    }
    %c2_i32_64 = arith.constant 2 : i32
    %73 = arith.cmpi slt, %arg0, %c2_i32_64 : i32
    %74 = arith.extui %73 : i1 to i32
    %c0_i32_65 = arith.constant 0 : i32
    %75 = arith.cmpi ne, %74, %c0_i32_65 : i32
    scf.if %75 {
      %c0_66 = arith.constant 0 : index
      %c0_67 = arith.constant 0 : index
      %76 = vector.load %arg2[%c0_66, %c0_67] : memref<104x256xf32, #tpu.memory_space<vmem>>, vector<104x256xf32>
      %77 = arith.mulf %69, %76 : vector<104x256xf32>
      %c8_68 = arith.constant 8 : index
      %c0_69 = arith.constant 0 : index
      %78 = vector.load %arg6[%c8_68, %c0_69] : memref<120x256xf32, #tpu.memory_space<vmem>>, vector<104x256xf32>
      tpu.vector_store %arg6[%c8_68, %c0_69], %77 {strides = array<i32>} : memref<120x256xf32, #tpu.memory_space<vmem>>, vector<104x256xf32>,
    } else {
    }
    return
  }
  func.func @transform_0(%arg0: i32) -> (i32, i32) {
    %c0_i32 = arith.constant 0 : i32
    %c0_i32_0 = arith.constant 0 : i32
    %c0_i32_1 = arith.constant 0 : i32
    return %c0_i32, %c0_i32_0 : i32, i32
  }
  func.func @transform_1(%arg0: i32) -> (i32, i32) {
    %c0_i32 = arith.constant 0 : i32
    %c0_i32_0 = arith.constant 0 : i32
    %c0_i32_1 = arith.constant 0 : i32
    return %c0_i32, %c0_i32_0 : i32, i32
  }
  func.func @transform_2(%arg0: i32) -> (i32, i32, i32, i32) {
    %c0_i32 = arith.constant 0 : i32
    %c0_i32_0 = arith.constant 0 : i32
    %c0_i32_1 = arith.constant 0 : i32
    %c0_i32_2 = arith.constant 0 : i32
    return %arg0, %c0_i32, %c0_i32_0, %c0_i32_1 : i32, i32, i32, i32
  }
  func.func @transform_3(%arg0: i32) -> (i32, i32, i32) {
    %c0_i32 = arith.constant 0 : i32
    %c0_i32_0 = arith.constant 0 : i32
    %c0_i32_1 = arith.constant 0 : i32
    return %arg0, %c0_i32, %c0_i32_0 : i32, i32, i32
  }
  func.func @transform_4(%arg0: i32) -> (i32, i32) {
    %c0_i32 = arith.constant 0 : i32
    %c0_i32_0 = arith.constant 0 : i32
    %c0_i32_1 = arith.constant 0 : i32
    return %c0_i32, %c0_i32_0 : i32, i32
  }
}

</mosaic_0001>

<bundles_post_ra>
// kernel: residual_stack_forward.1
= control target key start
LH: loop header
LB: loop body
LE: loop exit
PB: predicated region body
PF: predicated region fallthrough
CT: control target
= control target key end

     0   :  { %s4708_s15 = smov 0   ;;  %s6201_s0 = inlined_call_operand.vmem [shape: f32[120,256], index: 0, kind: input, shape index: {}]   ;;  %s6202_s1 = inlined_call_operand.vmem [shape: f32[104,256], index: 1, kind: input, shape index: {}]   ;;  %s6203_s2 = inlined_call_operand.vmem [shape: bf16[3,9,256,128], index: 2, kind: input, shape index: {}]   ;;  %s6204_s3 = inlined_call_operand.vmem [shape: bf16[3,128,256], index: 3, kind: input, shape index: {}]   ;;  %s6205_s4 = inlined_call_operand.vmem [shape: f32[104,256], index: 4, kind: output, shape index: {}]  }
   0x1 LB: > { %s4714_s16 = sadd.s32 4294967295, %s4680_s15   ;;  %p3541_p0 = scmp.ge.s32.totalorder %s4680_s15, 1  ;;  %s4680_s15 = sphi %s4708_s15, %s14_s15  }
   0x2   : > { %p167_p1 = scmp.lt.s32.totalorder %s4680_s15, 4 }
   0x4   : > { %p168_p2 = pnand %p3541_p0, %p167_p1 }
   0x6   : > { %171 = sbr.rel (%p168_p2) target bundleno = 806 (0x326), region = 36 }
   0xd   : > { %p193_p3 = scmp.lt.s32.totalorder %s4714_s16, 2  ;;  %p3545_p4 = scmp.ne.s32.totalorder %s4714_s16, 0 }
   0xe   : > { %v208_v0 = vld [vmem:[%s6201_s0] sm:$0xff] (!%p3545_p4)  ;;  %v209_v1 = vld [vmem:[%s6201_s0 + $0x8] sm:$0xff] (!%p3545_p4)  ;;  %v210_v2 = vld [vmem:[%s6201_s0 + $0x10] sm:$0xff] (!%p3545_p4) }
   0xf   : > { %s194_s17 = scalar_select %p193_p3, %s4714_s16, 2 }
  0x10   : > { %207 = sbr.rel (%p3545_p4) target bundleno = 31 (0x1f), region = 40  ;;  %238 = vst [vmem:[#allocation2] sm:$0xff] (!%p3545_p4), %v208_v0  ;;  %239 = vst [vmem:[#allocation2 + $0x8] sm:$0xff] (!%p3545_p4), %v209_v1  ;;  %v211_v3 = vld [vmem:[%s6201_s0 + $0x18] sm:$0xff] (!%p3545_p4)  ;;  %v212_v4 = vld [vmem:[%s6201_s0 + $0x20] sm:$0xff] (!%p3545_p4) }
  0x11   : > { %s4489_s18 = smul.u32 1152, %s194_s17  ;;  %s3966_s19 = sshll.u32 %s194_s17, 7  ;;  %240 = vst [vmem:[#allocation2 + $0x10] sm:$0xff] (!%p3545_p4), %v210_v2  ;;  %v213_v5 = vld [vmem:[%s6201_s0 + $0x28] sm:$0xff] (!%p3545_p4)  ;;  %241 = vst [vmem:[#allocation2 + $0x18] sm:$0xff] (!%p3545_p4), %v211_v3  ;;  %v214_v6 = vld [vmem:[%s6201_s0 + $0x30] sm:$0xff] (!%p3545_p4) }
  0x12   : > { %s4723_s22 = scalar_lea.vmem %s6204_s3, %s3966_s19  ;;  %242 = vst [vmem:[#allocation2 + $0x20] sm:$0xff] (!%p3545_p4), %v212_v4  ;;  %243 = vst [vmem:[#allocation2 + $0x28] sm:$0xff] (!%p3545_p4), %v213_v5  ;;  %v215_v7 = vld [vmem:[%s6201_s0 + $0x38] sm:$0xff] (!%p3545_p4)  ;;  %v216_v8 = vld [vmem:[%s6201_s0 + $0x40] sm:$0xff] (!%p3545_p4) }
  0x13   : > { %s4728_s25 = scalar_lea.vmem %s6203_s2, %s4489_s18  ;;  %244 = vst [vmem:[#allocation2 + $0x30] sm:$0xff] (!%p3545_p4), %v214_v6  ;;  %245 = vst [vmem:[#allocation2 + $0x38] sm:$0xff] (!%p3545_p4), %v215_v7  ;;  %v217_v9 = vld [vmem:[%s6201_s0 + $0x48] sm:$0xff] (!%p3545_p4)  ;;  %v218_v10 = vld [vmem:[%s6201_s0 + $0x50] sm:$0xff] (!%p3545_p4) }
  0x14   : > { %246 = vst [vmem:[#allocation2 + $0x40] sm:$0xff] (!%p3545_p4), %v216_v8  ;;  %v219_v11 = vld [vmem:[%s6201_s0 + $0x58] sm:$0xff] (!%p3545_p4)  ;;  %247 = vst [vmem:[#allocation2 + $0x48] sm:$0xff] (!%p3545_p4), %v217_v9  ;;  %v220_v12 = vld [vmem:[%s6201_s0 + $0x60] sm:$0xff] (!%p3545_p4) }
  0x15   : > { %248 = vst [vmem:[#allocation2 + $0x50] sm:$0xff] (!%p3545_p4), %v218_v10  ;;  %249 = vst [vmem:[#allocation2 + $0x58] sm:$0xff] (!%p3545_p4), %v219_v11  ;;  %v221_v13 = vld [vmem:[%s6201_s0 + $0x68] sm:$0xff] (!%p3545_p4)  ;;  %v222_v14 = vld [vmem:[%s6201_s0 + $0x70] sm:$0xff] (!%p3545_p4) }
  0x16   : > { %250 = vst [vmem:[#allocation2 + $0x60] sm:$0xff] (!%p3545_p4), %v220_v12  ;;  %251 = vst [vmem:[#allocation2 + $0x68] sm:$0xff] (!%p3545_p4), %v221_v13  ;;  %v223_v15 = vld [vmem:[%s6201_s0 + $0x78] sm:$0xff] (!%p3545_p4)  ;;  %v224_v16 = vld [vmem:[%s6201_s0 + $0x80] sm:$0xff] (!%p3545_p4) }
  0x17   : > { %252 = vst [vmem:[#allocation2 + $0x70] sm:$0xff] %v222_v14  ;;  %v225_v17 = vld [vmem:[%s6201_s0 + $0x88] sm:$0xff]  ;;  %253 = vst [vmem:[#allocation2 + $0x78] sm:$0xff] %v223_v15  ;;  %v226_v18 = vld [vmem:[%s6201_s0 + $0x90] sm:$0xff] }
  0x18   : > { %254 = vst [vmem:[#allocation2 + $0x80] sm:$0xff] %v224_v16  ;;  %255 = vst [vmem:[#allocation2 + $0x88] sm:$0xff] %v225_v17  ;;  %v227_v19 = vld [vmem:[%s6201_s0 + $0x98] sm:$0xff]  ;;  %v228_v20 = vld [vmem:[%s6201_s0 + $0xa0] sm:$0xff] }
  0x19   : > { %256 = vst [vmem:[#allocation2 + $0x90] sm:$0xff] %v226_v18  ;;  %257 = vst [vmem:[#allocation2 + $0x98] sm:$0xff] %v227_v19  ;;  %v229_v21 = vld [vmem:[%s6201_s0 + $0xa8] sm:$0xff]  ;;  %v230_v22 = vld [vmem:[%s6201_s0 + $0xb0] sm:$0xff] }
  0x1a   : > { %258 = vst [vmem:[#allocation2 + $0xa0] sm:$0xff] %v228_v20  ;;  %v231_v23 = vld [vmem:[%s6201_s0 + $0xb8] sm:$0xff]  ;;  %259 = vst [vmem:[#allocation2 + $0xa8] sm:$0xff] %v229_v21  ;;  %v232_v24 = vld [vmem:[%s6201_s0 + $0xc0] sm:$0xff] }
  0x1b   : > { %260 = vst [vmem:[#allocation2 + $0xb0] sm:$0xff] %v230_v22  ;;  %261 = vst [vmem:[#allocation2 + $0xb8] sm:$0xff] %v231_v23  ;;  %v233_v25 = vld [vmem:[%s6201_s0 + $0xc8] sm:$0xff]  ;;  %v234_v26 = vld [vmem:[%s6201_s0 + $0xd0] sm:$0xff] }
  0x1c   : > { %262 = vst [vmem:[#allocation2 + $0xc0] sm:$0xff] %v232_v24  ;;  %263 = vst [vmem:[#allocation2 + $0xc8] sm:$0xff] %v233_v25  ;;  %v235_v27 = vld [vmem:[%s6201_s0 + $0xd8] sm:$0xff]  ;;  %v236_v28 = vld [vmem:[%s6201_s0 + $0xe0] sm:$0xff] }
  0x1d   : > { %264 = vst [vmem:[#allocation2 + $0xd0] sm:$0xff] %v234_v26  ;;  %v237_v29 = vld [vmem:[%s6201_s0 + $0xe8] sm:$0xff]  ;;  %265 = vst [vmem:[#allocation2 + $0xd8] sm:$0xff] %v235_v27 }
  0x1e   : > { %266 = vst [vmem:[#allocation2 + $0xe0] sm:$0xff] %v236_v28  ;;  %267 = vst [vmem:[#allocation2 + $0xe8] sm:$0xff] %v237_v29 }
  0x1f PF: > { %v4499_v30 = vld [vmem:[%s4728_s25 + $0xc0] sm:$0xff]   ;;  %v4503_v34 = vld [vmem:[%s4728_s25 + $0xc8] sm:$0xff]   ;;  %v4507_v38 = vld [vmem:[%s4728_s25 + $0xd0] sm:$0xff]   ;;  %vm471_vm0 = vsmask.f32 7424  ;;  %vm1019_vm2 = vcmask 1046528  }
  0x20   : > { %v4500_v31 = vld [vmem:[%s4728_s25 + $0x40] sm:$0xff]   ;;  %3967 = vmatprep.subr.bf16.mxu0 %v4499_v30  ;;  %v4504_v35 = vld [vmem:[%s4728_s25 + $0x48] sm:$0xff]   ;;  %v4508_v39 = vld [vmem:[%s4728_s25 + $0x50] sm:$0xff]   ;;  %vm1298_vm1 = vsmask.f32 4352  ;;  %vm2281_vm3 = vcmask 1044480  }
  0x21   : > { %v4501_v32 = vld [vmem:[%s4728_s25 + $0x80] sm:$0xff]   ;;  %4025 = vmatprep.subr.bf16.mxu1 %v4500_v31  ;;  %v4505_v36 = vld [vmem:[%s4728_s25 + $0x88] sm:$0xff]   ;;  %v4509_v40 = vld [vmem:[%s4728_s25 + $0x90] sm:$0xff]   ;;  %p3962_p5 = scmp.ne.s32.totalorder %s4714_s16, 2 }
  0x22   : > { %v4502_v33 = vld [vmem:[%s4728_s25] sm:$0xff]   ;;  %3968 = vmatpush3.bf16.msra.mxu0 %v4501_v32  ;;  %v4506_v37 = vld [vmem:[%s4728_s25 + $0x8] sm:$0xff]   ;;  %v4510_v41 = vld [vmem:[%s4728_s25 + $0x10] sm:$0xff]  }
  0x23   : > { %4026 = vmatpush3.bf16.msra.mxu1 %v4502_v33  ;;  %3969 = vmatprep.subr.bf16.mxu0 %v4503_v34  ;;  %v4511_v42 = vld [vmem:[%s4728_s25 + $0xd8] sm:$0xff]   ;;  %v4515_v46 = vld [vmem:[%s4728_s25 + $0xe0] sm:$0xff]   ;;  %v4519_v50 = vld [vmem:[%s4728_s25 + $0xe8] sm:$0xff]  }
  0x24   : > { %4027 = vmatprep.subr.bf16.mxu1 %v4504_v35  ;;  %v4512_v43 = vld [vmem:[%s4728_s25 + $0x58] sm:$0xff]   ;;  %v4516_v47 = vld [vmem:[%s4728_s25 + $0x60] sm:$0xff]   ;;  %v4520_v51 = vld [vmem:[%s4728_s25 + $0x68] sm:$0xff]  }
  0x25   : > { %v4513_v44 = vld [vmem:[%s4728_s25 + $0x98] sm:$0xff]   ;;  %v4517_v48 = vld [vmem:[%s4728_s25 + $0xa0] sm:$0xff]   ;;  %v4521_v52 = vld [vmem:[%s4728_s25 + $0xa8] sm:$0xff]  }
  0x26   : > { %3970 = vmatpush3.bf16.msra.mxu0 %v4505_v36  ;;  %v4514_v45 = vld [vmem:[%s4728_s25 + $0x18] sm:$0xff]   ;;  %v4518_v49 = vld [vmem:[%s4728_s25 + $0x20] sm:$0xff]   ;;  %v4522_v53 = vld [vmem:[%s4728_s25 + $0x28] sm:$0xff]  }
  0x27   : > { %4028 = vmatpush3.bf16.msra.mxu1 %v4506_v37  ;;  %3971 = vmatprep.subr.bf16.mxu0 %v4507_v38  ;;  %v4523_v54 = vld [vmem:[%s4728_s25 + $0xf0] sm:$0xff]   ;;  %v4527_v58 = vld [vmem:[%s4728_s25 + $0xf8] sm:$0xff]   ;;  %v269_v62 = vld [vmem:[#allocation2 + $0x8] sm:$0xff] }
  0x28   : > { %4029 = vmatprep.subr.bf16.mxu1 %v4508_v39  ;;  %v4524_v55 = vld [vmem:[%s4728_s25 + $0x70] sm:$0xff]   ;;  %v4528_v59 = vld [vmem:[%s4728_s25 + $0x78] sm:$0xff]   ;;  %v273_v0 = vld [vmem:[#allocation2 + $0x28] sm:$0xff]  ;;  %v299_v2 = vmax.f32 %v269_v62, 0.0 }
  0x29   : > { %v4525_v56 = vld [vmem:[%s4728_s25 + $0xb0] sm:$0xff]   ;;  %v4529_v60 = vld [vmem:[%s4728_s25 + $0xb8] sm:$0xff]   ;;  %v4855_v4 = vmax.f32 %v273_v0, 0.0  ;;  %v268_v5 = vld [vmem:[#allocation2] sm:$0xff] }
  0x2a   : > { %3972 = vmatpush3.bf16.msra.mxu0 %v4509_v40  ;;  %v4526_v57 = vld [vmem:[%s4728_s25 + $0x30] sm:$0xff]   ;;  %v4530_v61 = vld [vmem:[%s4728_s25 + $0x38] sm:$0xff]   ;;  %v272_v8 = vld [vmem:[#allocation2 + $0x20] sm:$0xff]  ;;  %v298_v10 = vmax.f32 %v268_v5, 0.0  ;;  %329 = vst [vmem:[#allocation3 + $0x8] sm:$0xff] %v299_v2 }
  0x2b   : > { %4030 = vmatpush3.bf16.msra.mxu1 %v4510_v41  ;;  %3973 = vmatprep.subr.bf16.mxu0 %v4511_v42  ;;  %v271_v63 = vld [vmem:[#allocation2 + $0x18] sm:$0xff]  ;;  %v270_v6 = vld [vmem:[#allocation2 + $0x10] sm:$0xff]  ;;  %v4531_v12 = vld [vmem:[%s4728_s25 + $0x140] sm:$0xff]   ;;  %333 = vst [vmem:[#allocation3 + $0x28] sm:$0xff] %v4855_v4  ;;  %v4865_v14 = vmax.f32 %v272_v8, 0.0 }
  0x2c   : > { %4031 = vmatprep.subr.bf16.mxu1 %v4512_v43  ;;  %v275_v1 = vld [vmem:[#allocation2 + $0x38] sm:$0xff]  ;;  %v4853_v3 = vmax.f32 %v271_v63, 0.0  ;;  %v274_v9 = vld [vmem:[#allocation2 + $0x30] sm:$0xff]  ;;  %v4859_v11 = vmax.f32 %v270_v6, 0.0  ;;  %328 = vst [vmem:[#allocation3] sm:$0xff] %v298_v10  ;;  %v277_v19 = vld [vmem:[#allocation2 + $0x48] sm:$0xff] }
  0x2d   : > { %v4857_v7 = vmax.f32 %v275_v1, 0.0  ;;  %v4867_v15 = vmax.f32 %v274_v9, 0.0  ;;  %332 = vst [vmem:[#allocation3 + $0x20] sm:$0xff] %v4865_v14  ;;  %v279_v20 = vld [vmem:[#allocation2 + $0x58] sm:$0xff]  ;;  %v4882_v22 = vmax.f32 %v277_v19, 0.0  ;;  %v276_v25 = vld [vmem:[#allocation2 + $0x40] sm:$0xff] }
  0x2e   : > { %3974 = vmatpush3.bf16.msra.mxu0 %v4513_v44  ;;  %331 = vst [vmem:[#allocation3 + $0x18] sm:$0xff] %v4853_v3  ;;  %v385_v13 = vpack.c.bf16 %v4853_v3, %v299_v2  ;;  %330 = vst [vmem:[#allocation3 + $0x10] sm:$0xff] %v4859_v11  ;;  %v384_v18 = vpack.c.bf16 %v4859_v11, %v298_v10  ;;  %v4884_v23 = vmax.f32 %v279_v20, 0.0  ;;  %v278_v26 = vld [vmem:[#allocation2 + $0x50] sm:$0xff]  ;;  %v4898_v29 = vmax.f32 %v276_v25, 0.0  ;;  %v281_v35 = vld [vmem:[#allocation2 + $0x68] sm:$0xff] }
  0x2f   : > { %4032 = vmatpush3.bf16.msra.mxu1 %v4514_v45  ;;  %3975 = vmatprep.subr.bf16.mxu0 %v4515_v46  ;;  %335 = vst [vmem:[#allocation3 + $0x38] sm:$0xff] %v4857_v7  ;;  %v4874_v17 = vpack.c.bf16 %v4857_v7, %v4855_v4  ;;  %334 = vst [vmem:[#allocation3 + $0x30] sm:$0xff] %v4867_v15  ;;  %v4888_v24 = vpack.c.bf16 %v4867_v15, %v4865_v14  ;;  %v4900_v30 = vmax.f32 %v278_v26, 0.0  ;;  %v283_v39 = vld [vmem:[#allocation2 + $0x78] sm:$0xff]  ;;  %v285_v62 = vld [vmem:[#allocation2 + $0x88] sm:$0xff] }
  0x30   : > { %4033 = vmatprep.subr.bf16.mxu1 %v4516_v47  ;;  %908 = vmatprep.mubr.bf16.mxu1 %v385_v13  ;;  %337 = vst [vmem:[#allocation3 + $0x48] sm:$0xff] %v4882_v22  ;;  %339 = vst [vmem:[#allocation3 + $0x58] sm:$0xff] %v4884_v23  ;;  %v4896_v28 = vpack.c.bf16 %v4884_v23, %v4882_v22  ;;  %v4911_v40 = vmax.f32 %v281_v35, 0.0  ;;  %v4917_v44 = vmax.f32 %v283_v39, 0.0  ;;  %v4533_v0 = vld [vmem:[%s4728_s25 + $0x148] sm:$0xff]   ;;  %v287_v5 = vld [vmem:[#allocation2 + $0x98] sm:$0xff] }
  0x31   : > { %v492_v27 = vshll.u32 %v4874_v17, 16  ;;  %v504_v31 = vshrl.u32 %v4874_v17, 16  ;;  %v431_v33 = vld [vmem:[#allocation3 + $0x8] sm:$0xfe]  ;;  %336 = vst [vmem:[#allocation3 + $0x40] sm:$0xff] %v4898_v29  ;;  %338 = vst [vmem:[#allocation3 + $0x50] sm:$0xff] %v4900_v30  ;;  %v4921_v47 = vpack.c.bf16 %v4900_v30, %v4898_v29 }
  0x32   : > { %3976 = vmatpush3.bf16.msra.mxu0 %v4517_v48  ;;  %v508_v34 = vshll.u32 %v4896_v28, 16  ;;  %v435_v37 = vpack.c.bf16 %v4853_v3, %v431_v33  ;;  %v480_v43 = vshll.u32 %v4888_v24, 16  ;;  %341 = vst [vmem:[#allocation3 + $0x68] sm:$0xff] %v4911_v40  ;;  %v280_v48 = vld [vmem:[#allocation2 + $0x60] sm:$0xff]  ;;  %343 = vst [vmem:[#allocation3 + $0x78] sm:$0xff] %v4917_v44  ;;  %v496_v1 = vshrl.u32 %v4888_v24, 16 }
  0x33   : > { %4034 = vmatpush3.bf16.msra.mxu1 %v4518_v49  ;;  %3977 = vmatprep.subr.bf16.mxu0 %v4519_v50  ;;  %v430_v38 = vld [vmem:[#allocation3] sm:$0xfe]  ;;  %v494_v41 = vrot.slane %v492_v27, 1  ;;  %v500_v2 = vshll.u32 %v4921_v47, 16  ;;  %v4948_v6 = vmax.f32 %v285_v62, 0.0  ;;  %v520_v10 = vshrl.u32 %v4896_v28, 16 }
  0x34   : > { %4035 = vmatprep.subr.bf16.mxu1 %v4520_v51  ;;  %v434_v42 = vpack.c.bf16 %v4859_v11, %v430_v38  ;;  %v485_v45 = vshrl.u32 %v435_v37, 16  ;;  %v487_v46 = vshll.u32 %v435_v37, 16  ;;  %v284_v13 = vld [vmem:[#allocation2 + $0x80] sm:$0xff]  ;;  %v291_v62 = vld [vmem:[#allocation2 + $0xb8] sm:$0xff] }
  0x35   : > { %345 = vst [vmem:[#allocation3 + $0x88] sm:$0xff] %v4948_v6  ;;  %v4958_v25 = vmax.f32 %v284_v13, 0.0  ;;  %v4539_v33 = vld [vmem:[%s4728_s25 + $0x1c0] sm:$0xff]  }
  0x36   : > { %3978 = vmatpush3.bf16.msra.mxu0 %v4521_v52  ;;  %v473_v50 = vshrl.u32 %v434_v42, 16  ;;  %v475_v51 = vshll.u32 %v434_v42, 16  ;;  %v506_v52 = vor.u32 %v504_v31, %v494_v41  ;;  %v4540_v39 = vld [vmem:[%s4728_s25 + $0x180] sm:$0xff]   ;;  %v4534_v42 = vld [vmem:[%s4728_s25 + $0x108] sm:$0xff]  }
  0x37   : > { %4036 = vmatpush3.bf16.msra.mxu1 %v4522_v53  ;;  %3979 = vmatprep.subr.bf16.mxu0 %v4523_v54  ;;  %v510_v53 = vrot.slane %v508_v34, 1  ;;  %v282_v54 = vld [vmem:[#allocation2 + $0x70] sm:$0xff]  ;;  %344 = vst [vmem:[#allocation3 + $0x80] sm:$0xff] %v4958_v25  ;;  %v292_v21 = vld [vmem:[#allocation2 + $0xc0] sm:$0xff] }
  0x38   : > { %4037 = vmatprep.subr.bf16.mxu1 %v4524_v55  ;;  %v489_v55 = vrot.slane %v487_v46, 1 }
  0x39   : > { %v511_v9 = vsel %vm471_vm0, %v506_v52, %v510_v53 }
  0x3a   : > { %3980 = vmatpush3.bf16.msra.mxu0 %v4525_v56  ;;  %v4934_v56 = vpack.c.bf16 %v4917_v44, %v4911_v40  ;;  %v490_v63 = vor.u32 %v489_v55, %v485_v45  ;;  %v4535_v45 = vld [vmem:[%s4728_s25 + $0x150] sm:$0xff]   ;;  %v4546_v55 = vld [vmem:[%s4728_s25 + $0x168] sm:$0xff]  }
  0x3b   : > { %4038 = vmatpush3.bf16.msra.mxu1 %v4526_v57  ;;  %3981 = vmatprep.subr.bf16.mxu0 %v4527_v58  ;;  %v4937_v57 = vmax.f32 %v280_v48, 0.0  ;;  %v477_v58 = vrot.slane %v475_v51, 1  ;;  %v522_v51 = vor.u32 %v520_v10, %v510_v53  ;;  %v4550_v48 = vld [vmem:[%s4728_s25 + $0x198] sm:$0xff]  }
  0x3c   : > { %4039 = vmatprep.subr.bf16.mxu1 %v4528_v59  ;;  %v482_v59 = vrot.slane %v480_v43, 1  ;;  %v495_v19 = vsel %vm471_vm0, %v490_v63, %v494_v41  ;;  %v6215_v20 = vshll.u32 %v4934_v56, 16  ;;  %v502_v41 = vrot.slane %v500_v2, 1  ;;  %v4537_v63 = vld [vmem:[%s4728_s25 + $0x158] sm:$0xff]  }
  0x3d   : > { %340 = vst [vmem:[#allocation3 + $0x60] sm:$0xff] %v4937_v57  ;;  %v478_v8 = vor.u32 %v477_v58, %v473_v50  ;;  %724 = vmatprep.mubr.bf16.mxu0 %v495_v19  ;;  %v4536_v58 = vld [vmem:[%s4728_s25 + $0x110] sm:$0xff]   ;;  %v536_v53 = vshrl.u32 %v4934_v56, 16  ;;  %v5002_v19 = vld [vmem:[#allocation2 + $0xa0] sm:$0xff] }
  0x3e   : > { %3982 = vmatpush3.bf16.msra.mxu0 %v4529_v60  ;;  %v4532_v60 = vld [vmem:[%s4728_s25 + $0x100] sm:$0xff]   ;;  %v498_v37 = vor.u32 %v496_v1, %v482_v59  ;;  %v526_v52 = vrot.slane %v6215_v20, 1 }
  0x3f   : > { %4040 = vmatpush3.bf16.msra.mxu1 %v4530_v61  ;;  %4083 = vmatprep.subr.bf16.mxu0 %v4531_v12  ;;  %v4942_v61 = vmax.f32 %v282_v54, 0.0  ;;  %v4953_v12 = vmax.f32 %v287_v5, 0.0  ;;  %v483_v35 = vsel %vm471_vm0, %v478_v8, %v482_v59  ;;  %v4543_v54 = vld [vmem:[%s4728_s25 + $0x1c8] sm:$0xff]   ;;  %v512_v59 = vshrl.u32 %v4921_v47, 16 }
  0x40   : > { %4141 = vmatprep.subr.bf16.mxu1 %v4539_v33  ;;  %v321_v5 = vmax.f32 %v291_v62, 0.0  ;;  %v4544_v8 = vld [vmem:[%s4728_s25 + $0x188] sm:$0xff]   ;;  %v5004_v33 = vld [vmem:[#allocation2 + $0xb0] sm:$0xff] }
  0x41   : > { %342 = vst [vmem:[#allocation3 + $0x70] sm:$0xff] %v4942_v61  ;;  %347 = vst [vmem:[#allocation3 + $0x98] sm:$0xff] %v4953_v12  ;;  %725 = vmatmul.mubr.bf16.vlgmr.msra.gmra.mrb[0].mxu0 %v483_v35  ;;  %v4967_v38 = vpack.c.bf16 %v4942_v61, %v4937_v57  ;;  %v4977_v46 = vpack.c.bf16 %v4953_v12, %v4948_v6  ;;  %v527_v35 = vsel %vm471_vm0, %v522_v51, %v526_v52 }
  0x42   : > { %909 = vmatmul.mubr.bf16.vlgmr.msra.gmra.mrb[0].mxu1 %v384_v18  ;;  %v286_v18 = vld [vmem:[#allocation2 + $0x90] sm:$0xff]  ;;  %4084 = vmatpush3.bf16.msra.mxu0 %v4532_v60  ;;  %v289_v60 = vld [vmem:[#allocation2 + $0xa8] sm:$0xff]  ;;  %351 = vst [vmem:[#allocation3 + $0xb8] sm:$0xff] %v321_v5  ;;  %v514_v51 = vor.u32 %v512_v59, %v502_v41 }
  0x43   : > { %916 = vmatprep.mubr.bf16.mxu1 %v4874_v17  ;;  %v316_v26 = vmax.f32 %v286_v18, 0.0  ;;  %732 = vmatprep.mubr.bf16.mxu0 %v511_v9  ;;  %v503_v9 = vsel %vm471_vm0, %v498_v37, %v502_v41  ;;  %v6213_v13 = vshll.u32 %v4967_v38, 16  ;;  %v6208_v18 = vshll.u32 %v4977_v46, 16  ;;  %v4549_v41 = vld [vmem:[%s4728_s25 + $0x1d8] sm:$0xff]  }
  0x44   : > { %4085 = vmatprep.subr.bf16.mxu0 %v4533_v0  ;;  %4142 = vmatpush3.bf16.msra.mxu1 %v4540_v39  ;;  %v4996_v0 = vmax.f32 %v289_v60, 0.0  ;;  %v318_v39 = vmax.f32 %v5002_v19, 0.0  ;;  %v320_v37 = vmax.f32 %v5004_v33, 0.0  ;;  %v4538_v60 = vld [vmem:[%s4728_s25 + $0x118] sm:$0xff]   ;;  %v6214_v33 = vshrl.u32 %v4967_v38, 16 }
  0x45   : > { %346 = vst [vmem:[#allocation3 + $0x90] sm:$0xff] %v316_v26  ;;  %4143 = vmatprep.subr.bf16.mxu1 %v4543_v54  ;;  %v4545_v54 = vld [vmem:[%s4728_s25 + $0x1d0] sm:$0xff]   ;;  %v542_v19 = vrot.slane %v6208_v18, 1  ;;  %v6212_v36 = vshrl.u32 %v4977_v46, 16 }
  0x46   : > { %4086 = vmatpush3.bf16.msra.mxu0 %v4534_v42  ;;  %349 = vst [vmem:[#allocation3 + $0xa8] sm:$0xff] %v4996_v0  ;;  %v5011_v42 = vpack.c.bf16 %v316_v26, %v4958_v25  ;;  %348 = vst [vmem:[#allocation3 + $0xa0] sm:$0xff] %v318_v39  ;;  %v518_v26 = vrot.slane %v6213_v13, 1  ;;  %v5022_v62 = vpack.c.bf16 %v321_v5, %v4996_v0  ;;  %v295_v5 = vld [vmem:[#allocation2 + $0xd8] sm:$0xff] }
  0x47   : > { %4087 = vmatprep.subr.bf16.mxu0 %v4535_v45  ;;  %350 = vst [vmem:[#allocation3 + $0xb0] sm:$0xff] %v320_v37  ;;  %v4542_v45 = vld [vmem:[%s4728_s25 + $0x120] sm:$0xff]   ;;  %v325_v50 = vmax.f32 %v295_v5, 0.0  ;;  %v4553_v5 = vld [vmem:[%s4728_s25 + $0x130] sm:$0xff]  }
  0x48   : > { %4144 = vmatpush3.bf16.msra.mxu1 %v4544_v8  ;;  %v4547_v8 = vld [vmem:[%s4728_s25 + $0x190] sm:$0xff]   ;;  %v519_v49 = vsel %vm471_vm0, %v514_v51, %v518_v26  ;;  %v6206_v32 = vshll.u32 %v5022_v62, 16  ;;  %v4548_v51 = vld [vmem:[%s4728_s25 + $0x128] sm:$0xff]  }
  0x49   : > { %733 = vmatmul.mubr.bf16.gmra.mrb[4].mxu0 %v503_v9  ;;  %v538_v9 = vor.u32 %v536_v53, %v526_v52  ;;  %4145 = vmatprep.subr.bf16.mxu1 %v4545_v54  ;;  %v294_v54 = vld [vmem:[#allocation2 + $0xd0] sm:$0xff]  ;;  %355 = vst [vmem:[#allocation3 + $0xd8] sm:$0xff] %v325_v50 }
  0x4a   : > { %917 = vmatmul.mubr.bf16.gmra.mrb[4].mxu1 %v4888_v24  ;;  %740 = vmatprep.mubr.bf16.mxu0 %v527_v35  ;;  %v6207_v35 = vshll.u32 %v5011_v42, 16 }
  0x4b   : > { %924 = vmatprep.mubr.bf16.mxu1 %v4896_v28  ;;  %4088 = vmatpush3.bf16.msra.mxu0 %v4536_v58  ;;  %v4541_v58 = vld [vmem:[%s4728_s25 + $0x160] sm:$0xff]   ;;  %v543_v16 = vsel %vm471_vm0, %v538_v9, %v542_v19  ;;  %v530_v9 = vor.u32 %v6214_v33, %v518_v26  ;;  %v4555_v26 = vld [vmem:[%s4728_s25 + $0x1e8] sm:$0xff]  }
  0x4c   : > { %4089 = vmatprep.subr.bf16.mxu0 %v4537_v63  ;;  %v293_v63 = vld [vmem:[#allocation2 + $0xc8] sm:$0xff]  ;;  %4146 = vmatpush3.bf16.msra.mxu1 %v4547_v8  ;;  %v5045_v8 = vmax.f32 %v292_v21, 0.0  ;;  %v534_v50 = vrot.slane %v6207_v35, 1  ;;  %v5054_v21 = vpack.c.bf16 %v320_v37, %v318_v39  ;;  %v6211_v39 = vshrl.u32 %v5011_v42, 16  ;;  %v4560_v35 = vld [vmem:[%s4728_s25 + $0x1b0] sm:$0xff]  }
  0x4d   : > { %v5037_v52 = vmax.f32 %v293_v63, 0.0  ;;  %4147 = vmatprep.subr.bf16.mxu1 %v4549_v41  ;;  %v324_v63 = vmax.f32 %v294_v54, 0.0  ;;  %v4556_v37 = vld [vmem:[%s4728_s25 + $0x1a8] sm:$0xff]  }
  0x4e   : > { %352 = vst [vmem:[#allocation3 + $0xc0] sm:$0xff] %v5045_v8 }
  0x4f   : > { %4090 = vmatpush3.bf16.msra.mxu0 %v4538_v60  ;;  %353 = vst [vmem:[#allocation3 + $0xc8] sm:$0xff] %v5037_v52  ;;  %354 = vst [vmem:[#allocation3 + $0xd0] sm:$0xff] %v324_v63  ;;  %v4552_v60 = vld [vmem:[%s4728_s25 + $0x1e0] sm:$0xff]   ;;  %v6210_v63 = vshrl.u32 %v5022_v62, 16 }
  0x50   : > { %4091 = vmatprep.subr.bf16.mxu0 %v4541_v58  ;;  %4148 = vmatpush3.bf16.msra.mxu1 %v4550_v48  ;;  %v4551_v58 = vld [vmem:[%s4728_s25 + $0x170] sm:$0xff]   ;;  %v558_v48 = vrot.slane %v6206_v32, 1  ;;  %v433_v41 = vld [vmem:[#allocation3 + $0xd8] sm:$0x1] }
  0x51   : > { %741 = vmatmul.mubr.bf16.gmra.mrb[8].mxu0 %v519_v49  ;;  %v554_v49 = vor.u32 %v6212_v36, %v542_v19  ;;  %4149 = vmatprep.subr.bf16.mxu1 %v4552_v60  ;;  %v6209_v19 = vshll.u32 %v5054_v21, 16  ;;  %v5072_v54 = vpack.c.bf16 %v433_v41, %v5037_v52  ;;  %v4557_v60 = vld [vmem:[%s4728_s25 + $0x178] sm:$0xff]   ;;  %v4559_v32 = vld [vmem:[%s4728_s25 + $0x1f0] sm:$0xff]  }
  0x52   : > { %925 = vmatmul.mubr.bf16.gmra.mrb[8].mxu1 %v4921_v47  ;;  %748 = vmatprep.mubr.bf16.mxu0 %v543_v16  ;;  %v4554_v16 = vld [vmem:[%s4728_s25 + $0x1a0] sm:$0xff]  }
  0x53   : > { %932 = vmatprep.mubr.bf16.mxu1 %v4934_v56  ;;  %4092 = vmatpush3.bf16.msra.mxu0 %v4542_v45  ;;  %v535_v45 = vsel %vm471_vm0, %v530_v9, %v534_v50  ;;  %v397_v9 = vpack.c.bf16 %v5037_v52, %v5037_v52  ;;  %v550_v41 = vrot.slane %v6209_v19, 1 }
  0x54   : > { %4093 = vmatprep.subr.bf16.mxu0 %v4546_v55  ;;  %4150 = vmatpush3.bf16.msra.mxu1 %v4554_v16  ;;  %v559_v55 = vsel %vm471_vm0, %v554_v49, %v558_v48  ;;  %v546_v49 = vor.u32 %v6211_v39, %v534_v50  ;;  %v1257_v39 = vld [vmem:[#allocation3] sm:$0x80]  ;;  %v965_v50 = vld [vmem:[#allocation3 + $0x8] sm:$0xfc] }
  0x55   : > { %4151 = vmatprep.subr.bf16.mxu1 %v4555_v26  ;;  %v4558_v26 = vld [vmem:[%s4728_s25 + $0x138] sm:$0xff]  }
  0x56   : > { %v432_v16 = vld [vmem:[#allocation3 + $0xd0] sm:$0x1]  ;;  %v551_v19 = vsel %vm471_vm0, %v546_v49, %v550_v41  ;;  %v1327_v49 = vrot.slane %v520_v10, 3 }
  0x57   : > { %4094 = vmatpush3.bf16.msra.mxu0 %v4548_v51  ;;  %v572_v51 = vshll.u32 %v5072_v54, 16 }
  0x58   : > { %4095 = vmatprep.subr.bf16.mxu0 %v4551_v58  ;;  %4152 = vmatpush3.bf16.msra.mxu1 %v4556_v37  ;;  %v5086_v58 = vpack.c.bf16 %v432_v16, %v5045_v8  ;;  %v4561_v37 = vld [vmem:[%s4728_s25 + $0x1f8] sm:$0xff]   ;;  %v1307_v16 = vrot.slane %v496_v1, 3  ;;  %v1320_v1 = vrot.slane %v492_v27, 4 }
  0x59   : > { %749 = vmatmul.mubr.bf16.gmra.mrb[12].mxu0 %v535_v45  ;;  %v570_v45 = vor.u32 %v6210_v63, %v558_v48  ;;  %v574_v18 = vrot.slane %v572_v51, 1  ;;  %4153 = vmatprep.subr.bf16.mxu1 %v4559_v32  ;;  %v4562_v48 = vld [vmem:[%s4728_s25 + $0x1b8] sm:$0xff]   ;;  %v4563_v51 = vld [vmem:[%s4728_s25 + $0x240] sm:$0xff]  }
  0x5a   : > { %933 = vmatmul.mubr.bf16.gmra.mrb[12].mxu1 %v4967_v38  ;;  %756 = vmatprep.mubr.bf16.mxu0 %v559_v55  ;;  %v1308_v55 = vrot.slane %v480_v43, 4  ;;  %v564_v63 = vshll.u32 %v5086_v58, 16  ;;  %v1258_v43 = vld [vmem:[#allocation3 + $0x8] sm:$0x80] }
  0x5b   : > { %940 = vmatprep.mubr.bf16.mxu1 %v4977_v46  ;;  %4096 = vmatpush3.bf16.msra.mxu0 %v4553_v5  ;;  %v560_v5 = vshrl.u32 %v5054_v21, 16  ;;  %v575_v32 = vsel %vm471_vm0, %v570_v45, %v574_v18 }
  0x5c   : > { %4097 = vmatprep.subr.bf16.mxu0 %v4557_v60  ;;  %4154 = vmatpush3.bf16.msra.mxu1 %v4560_v35  ;;  %v1319_v60 = vrot.slane %v504_v31, 3  ;;  %v396_v35 = vpack.c.bf16 %v5045_v8, %v5045_v8  ;;  %v1261_v31 = vpack.c.bf16 %v4859_v11, %v1257_v39  ;;  %v1309_v20 = vor.u32 %v1308_v55, %v1307_v16 }
  0x5d   : > { %4155 = vmatprep.subr.bf16.mxu1 %v4561_v37  ;;  %v562_v27 = vor.u32 %v560_v5, %v550_v41  ;;  %v1335_v55 = vrot.slane %v536_v53, 3  ;;  %v6241_v16 = vshll.u32 %v4934_v56, 16 }
  0x5e   : > { %v1300_v36 = vshrl.u32 %v1261_v31, 16  ;;  %v1303_v13 = vshll.u32 %v1261_v31, 16  ;;  %v1321_v33 = vor.u32 %v1320_v1, %v1319_v60  ;;  %v4571_v60 = vld [vmem:[%s4728_s25 + $0x2c0] sm:$0xff]  }
  0x5f   : > { %4098 = vmatpush3.bf16.msra.mxu0 %v4558_v26  ;;  %v1328_v26 = vrot.slane %v508_v34, 4  ;;  %v1336_v1 = vrot.slane %v6241_v16, 4  ;;  %v4564_v16 = vld [vmem:[%s4728_s25 + $0x200] sm:$0xff]  }
  0x60   : > { %4199 = vmatprep.subr.bf16.mxu0 %v4563_v51  ;;  %4156 = vmatpush3.bf16.msra.mxu1 %v4562_v48  ;;  %v566_v51 = vrot.slane %v564_v63, 1  ;;  %v1302_v34 = vrot.slane %v1300_v36, 3  ;;  %v1324_v36 = vrot.slane %v500_v2, 4  ;;  %v964_v2 = vld [vmem:[#allocation3] sm:$0xfc] }
  0x61   : > { %757 = vmatmul.mubr.bf16.gmra.mrb[16].mxu0 %v551_v19  ;;  %v1305_v19 = vrot.slane %v1303_v13, 4  ;;  %v1329_v48 = vor.u32 %v1328_v26, %v1327_v49  ;;  %4257 = vmatprep.subr.bf16.mxu1 %v4571_v60  ;;  %v4575_v26 = vld [vmem:[%s4728_s25 + $0x2c8] sm:$0xff]  }
  0x62   : > { %941 = vmatmul.mubr.bf16.gmra.mrb[16].mxu1 %v5011_v42  ;;  %764 = vmatprep.mubr.bf16.mxu0 %v575_v32 }
  0x63   : > { %948 = vmatprep.mubr.bf16.mxu1 %v5022_v62  ;;  %v1306_v63 = vor.u32 %v1305_v19, %v1302_v34  ;;  %v6244_v19 = vshll.u32 %v4967_v38, 16 }
  0x65   : > { %v1310_v13 = vsel %vm1298_vm1, %v1306_v63, %v1309_v20  ;;  %v4579_v63 = vld [vmem:[%s4728_s25 + $0x290] sm:$0xff]  }
  0x6a   : > { %949 = vmatmul.mubr.bf16.gmra.mrb[20].mxu1 %v5054_v21 }
  0x6b   : > { %956 = vmatprep.mubr.bf16.mxu1 %v397_v9  ;;  %v1262_v9 = vpack.c.bf16 %v4853_v3, %v1258_v43  ;;  %v579_v43 = vshrl.u32 %v5072_v54, 16  ;;  %v1323_v54 = vrot.slane %v512_v59, 3  ;;  %v576_v59 = vshrl.u32 %v5086_v58, 16 }
  0x6c   : > { %v1337_v58 = vor.u32 %v1336_v1, %v1335_v55  ;;  %v4584_v1 = vld [vmem:[%s4728_s25 + $0x2e0] sm:$0xff]  }
  0x6d   : > { %v1312_v45 = vshrl.u32 %v1262_v9, 16  ;;  %v1315_v37 = vshll.u32 %v1262_v9, 16  ;;  %v567_v9 = vsel %vm471_vm0, %v562_v27, %v566_v51  ;;  %v581_v32 = vor.u32 %v579_v43, %v574_v18  ;;  %v4572_v18 = vld [vmem:[%s4728_s25 + $0x280] sm:$0xff]   ;;  %v4576_v27 = vld [vmem:[%s4728_s25 + $0x288] sm:$0xff]  }
  0x6e   : > { %765 = vmatmul.mubr.bf16.gmra.mrb[20].mxu0 %v567_v9  ;;  %v1325_v53 = vor.u32 %v1324_v36, %v1323_v54  ;;  %v6242_v43 = vrot.slane %v4874_v17, 1  ;;  %v1338_v54 = vsel %vm1298_vm1, %v1329_v48, %v1337_v58  ;;  %v4581_v36 = vld [vmem:[%s4728_s25 + $0x2d8] sm:$0xff]   ;;  %v4586_v17 = vld [vmem:[%s4728_s25 + $0x2a0] sm:$0xff]  }
  0x6f   : > { %v1314_v39 = vrot.slane %v1312_v45, 3  ;;  %v1317_v10 = vrot.slane %v1315_v37, 4  ;;  %772 = vmatprep.mubr.bf16.mxu0 %v581_v32  ;;  %v578_v45 = vor.u32 %v576_v59, %v566_v51  ;;  %v968_v37 = vpack.c.bf16 %v4859_v11, %v964_v2  ;;  %v1260_v59 = vld [vmem:[#allocation3 + $0xd8] sm:$0x7f] }
  0x70   : > { %v1326_v9 = vsel %vm1298_vm1, %v1309_v20, %v1325_v53  ;;  %v6245_v51 = vshrl.u32 %v4977_v46, 16  ;;  %v1021_v20 = vrot.slane %v4888_v24, 1  ;;  %v6247_v2 = vmov %v6242_v43 }
  0x71   : > { %v1318_v41 = vor.u32 %v1317_v10, %v1314_v39  ;;  %v6243_v10 = vshrl.u32 %v4967_v38, 16  ;;  %v1020_v60 = vrot.slane %v968_v37, 1  ;;  %v6249_v37 = vshll.u32 %v5011_v42, 16 }
  0x72   : > { %957 = vmatmul.mubr.bf16.gmra.mrb[24].mxu1 %v396_v35  ;;  %v969_v35 = vpack.c.bf16 %v4853_v3, %v965_v50  ;;  %v1330_v50 = vsel %vm1298_vm1, %v1321_v33, %v1329_v48  ;;  %v1343_v32 = vrot.slane %v6245_v51, 3  ;;  %v4582_v48 = vld [vmem:[%s4728_s25 + $0x298] sm:$0xff]   ;;  %v1032_v51 = vrot.slane %v4934_v56, 1 }
  0x73   : > { %v1322_v31 = vsel %vm1298_vm1, %v1318_v41, %v1321_v33  ;;  %v4577_v33 = vld [vmem:[%s4728_s25 + $0x2d0] sm:$0xff]   ;;  %v1331_v34 = vrot.slane %v6243_v10, 3  ;;  %v1332_v41 = vrot.slane %v6244_v19, 4  ;;  %v6250_v19 = vshrl.u32 %v5022_v62, 16 }
  0x74   : > { %1515 = vmatprep.mubr.bf16.mxu1 %v1322_v31  ;;  %v1023_v49 = vrot.slane %v969_v35, 1  ;;  %v6246_v35 = vshll.u32 %v4977_v46, 16  ;;  %v4567_v10 = vld [vmem:[%s4728_s25 + $0x250] sm:$0xff]  }
  0x75   : > { %v1333_v55 = vor.u32 %v1332_v41, %v1331_v34  ;;  %v1351_v41 = vrot.slane %v6250_v19, 3  ;;  %v1831_v19 = vld [vmem:[#allocation3 + $0x18] sm:$0xfe] }
  0x76   : > { %v1025_v39 = vsel %vm1019_vm2, %v1023_v49, %v6242_v43  ;;  %773 = vmatmul.mubr.bf16.gmra.mrb[24].mxu0 %v578_v45  ;;  %v1344_v31 = vrot.slane %v6246_v35, 4  ;;  %v1026_v49 = vrot.slane %v4921_v47, 1  ;;  %v4566_v45 = vld [vmem:[%s4728_s25 + $0x208] sm:$0xff]   ;;  %v1340_v43 = vrot.slane %v6249_v37, 4  ;;  %v4573_v37 = vld [vmem:[%s4728_s25 + $0x260] sm:$0xff]  }
  0x77   : > { %1188 = vmatprep.mubr.bf16.mxu0 %v1025_v39  ;;  %v1264_v39 = vpack.c.bf16 %v1260_v59, %v5037_v52  ;;  %v4591_v59 = vld [vmem:[%s4728_s25 + $0x2f0] sm:$0xff]  }
  0x78   : > { %v1027_v56 = vsel %vm1019_vm2, %v1021_v20, %v1026_v49 }
  0x79   : > { %v1365_v35 = vshrl.u32 %v1264_v39, 16 }
  0x7a   : > { %1516 = vmatmul.mubr.bf16.vlgmr.msra.gmra.mrb[28].mxu1 %v1310_v13  ;;  %v1028_v13 = vrot.slane %v4896_v28, 1  ;;  %v4565_v28 = vld [vmem:[%s4728_s25 + $0x248] sm:$0xff]  }
  0x7b   : > { %1523 = vmatprep.mubr.bf16.mxu1 %v1330_v50  ;;  %4258 = vmatpush3.bf16.msra.mxu1 %v4572_v18  ;;  %v1345_v18 = vor.u32 %v1344_v31, %v1343_v32  ;;  %v1022_v50 = vsel %vm1019_vm2, %v1020_v60, %v1021_v20  ;;  %v4587_v32 = vld [vmem:[%s4728_s25 + $0x2e8] sm:$0xff]   ;;  %v4592_v20 = vld [vmem:[%s4728_s25 + $0x2b0] sm:$0xff]  }
  0x7c   : > { %4259 = vmatprep.subr.bf16.mxu1 %v4575_v26  ;;  %v1029_v24 = vsel %vm1019_vm2, %v6247_v2, %v1028_v13  ;;  %v6248_v26 = vshrl.u32 %v5011_v42, 16  ;;  %v4588_v31 = vld [vmem:[%s4728_s25 + $0x2a8] sm:$0xff]  }
  0x7d   : > { %v1346_v34 = vsel %vm1298_vm1, %v1337_v58, %v1345_v18 }
  0x7e   : > { %1189 = vmatmul.mubr.bf16.vlgmr.msra.gmra.mrb[28].mxu0 %v1022_v50  ;;  %v1033_v50 = vsel %vm1019_vm2, %v1028_v13, %v1032_v51  ;;  %v4593_v13 = vld [vmem:[%s4728_s25 + $0x2f8] sm:$0xff]  }
  0x7f   : > { %4260 = vmatpush3.bf16.msra.mxu1 %v4576_v27  ;;  %v1339_v27 = vrot.slane %v6248_v26, 3  ;;  %4200 = vmatpush3.bf16.msra.mxu0 %v4564_v16  ;;  %v1347_v16 = vrot.slane %v560_v5, 3  ;;  %v1030_v5 = vrot.slane %v4967_v38, 1 }
  0x80   : > { %4261 = vmatprep.subr.bf16.mxu1 %v4577_v33  ;;  %v1334_v33 = vsel %vm1298_vm1, %v1325_v53, %v1333_v55  ;;  %1196 = vmatprep.mubr.bf16.mxu0 %v1029_v24 }
  0x81   : > { %4201 = vmatprep.subr.bf16.mxu0 %v4565_v28  ;;  %v1341_v58 = vor.u32 %v1340_v43, %v1339_v27  ;;  %v1367_v28 = vrot.slane %v1365_v35, 3  ;;  %v1031_v38 = vsel %vm1019_vm2, %v1026_v49, %v1030_v5  ;;  %v1034_v49 = vrot.slane %v5011_v42, 1 }
  0x82   : > { %1524 = vmatmul.mubr.bf16.gmra.mrb[32].mxu1 %v1326_v9  ;;  %v6251_v9 = vshll.u32 %v5022_v62, 16 }
  0x83   : > { %1531 = vmatprep.mubr.bf16.mxu1 %v1338_v54  ;;  %4262 = vmatpush3.bf16.msra.mxu1 %v4579_v63  ;;  %v1259_v63 = vld [vmem:[#allocation3 + $0xd0] sm:$0x7f]  ;;  %v4568_v54 = vld [vmem:[%s4728_s25 + $0x210] sm:$0xff]   ;;  %v1342_v24 = vsel %vm1298_vm1, %v1333_v55, %v1341_v58  ;;  %v1036_v55 = vrot.slane %v4977_v46, 1  ;;  %v5207_v46 = vld [vmem:[#allocation3 + $0x28] sm:$0xff] }
  0x84   : > { %4263 = vmatprep.subr.bf16.mxu1 %v4581_v36  ;;  %v1352_v53 = vrot.slane %v6251_v9, 4  ;;  %v4569_v36 = vld [vmem:[%s4728_s25 + $0x258] sm:$0xff]   ;;  %4202 = vmatpush3.bf16.msra.mxu0 %v4566_v45  ;;  %v1263_v26 = vpack.c.bf16 %v1259_v63, %v5045_v8  ;;  %v4578_v9 = vld [vmem:[%s4728_s25 + $0x268] sm:$0xff]   ;;  %v1859_v47 = vpack.c.bf16 %v5207_v46, %v1831_v19 }
  0x85   : > { %4203 = vmatprep.subr.bf16.mxu0 %v4567_v10  ;;  %v4574_v10 = vld [vmem:[%s4728_s25 + $0x220] sm:$0xff]  }
  0x86   : > { %v1353_v60 = vor.u32 %v1352_v53, %v1351_v41  ;;  %1197 = vmatmul.mubr.bf16.gmra.mrb[32].mxu0 %v1027_v56  ;;  %v1037_v41 = vsel %vm1019_vm2, %v1032_v51, %v1036_v55  ;;  %v5216_v51 = vld [vmem:[#allocation3 + $0x38] sm:$0xff]  ;;  %v1920_v42 = vshll.u32 %v1859_v47, 16 }
  0x87   : > { %4264 = vmatpush3.bf16.msra.mxu1 %v4582_v48  ;;  %v1368_v48 = vshll.u32 %v1264_v39, 16  ;;  %1204 = vmatprep.mubr.bf16.mxu0 %v1033_v50  ;;  %v1356_v39 = vshrl.u32 %v1263_v26, 16  ;;  %6253 = vst [vmem:[#allocation4_spill] sm:$0xff] %v5216_v51  ;;  %v5226_v50 = vld [vmem:[#allocation3 + $0x20] sm:$0xff] }
  0x88   : > { %4265 = vmatprep.subr.bf16.mxu1 %v4584_v1  ;;  %v6252_v1 = vshll.u32 %v5054_v21, 16  ;;  %v1354_v27 = vsel %vm1298_vm1, %v1345_v18, %v1353_v60  ;;  %4204 = vmatpush3.bf16.msra.mxu0 %v4568_v54  ;;  %v1359_v18 = vshll.u32 %v1263_v26, 16  ;;  %v4580_v54 = vld [vmem:[%s4728_s25 + $0x228] sm:$0xff]  }
  0x89   : > { %v1370_v45 = vrot.slane %v1368_v48, 4  ;;  %4205 = vmatprep.subr.bf16.mxu0 %v4569_v36  ;;  %v4583_v36 = vld [vmem:[%s4728_s25 + $0x270] sm:$0xff]   ;;  %v967_v48 = vld [vmem:[#allocation3 + $0xd8] sm:$0x3] }
  0x8a   : > { %1532 = vmatmul.mubr.bf16.gmra.mrb[36].mxu1 %v1334_v33  ;;  %v1348_v2 = vrot.slane %v6252_v1, 4  ;;  %v4570_v33 = vld [vmem:[%s4728_s25 + $0x218] sm:$0xff]   ;;  %v1361_v63 = vrot.slane %v1359_v18, 4 }
  0x8b   : > { %1539 = vmatprep.mubr.bf16.mxu1 %v1346_v34  ;;  %4266 = vmatpush3.bf16.msra.mxu1 %v4586_v17  ;;  %v4594_v17 = vld [vmem:[%s4728_s25 + $0x2b8] sm:$0xff]   ;;  %v1371_v34 = vor.u32 %v1370_v45, %v1367_v28  ;;  %v5233_v28 = vld [vmem:[#allocation3 + $0x30] sm:$0xff]  ;;  %v5237_v45 = vld [vmem:[#allocation3 + $0x40] sm:$0xff] }
  0x8c   : > { %4267 = vmatprep.subr.bf16.mxu1 %v4587_v32  ;;  %v1349_v43 = vor.u32 %v1348_v2, %v1347_v16  ;;  %4206 = vmatpush3.bf16.msra.mxu0 %v4570_v33  ;;  %v1358_v32 = vrot.slane %v1356_v39, 3  ;;  %v1035_v16 = vsel %vm1019_vm2, %v1030_v5, %v1034_v49  ;;  %v971_v2 = vpack.c.bf16 %v967_v48, %v5037_v52  ;;  %v966_v5 = vld [vmem:[#allocation3 + $0xd0] sm:$0x3]  ;;  %v5267_v48 = vld [vmem:[#allocation3 + $0x78] sm:$0xff] }
  0x8d   : > { %4207 = vmatprep.subr.bf16.mxu0 %v4573_v37  ;;  %v1372_v35 = vsel %vm1298_vm1, %v1353_v60, %v1371_v34  ;;  %6255 = vst [vmem:[#allocation6_spill] sm:$0xff] %v5233_v28  ;;  %6256 = vst [vmem:[#allocation7_spill] sm:$0xff] %v5237_v45  ;;  %v1922_v33 = vrot.slane %v1920_v42, 1  ;;  %v5241_v37 = vld [vmem:[#allocation3 + $0x58] sm:$0xff]  ;;  %v4603_v52 = vld [vmem:[%s4728_s25 + $0x3c0] sm:$0xff]   ;;  %v1038_v39 = vrot.slane %v5054_v21, 1 }
  0x8e   : > { %v1350_v53 = vsel %vm1298_vm1, %v1341_v58, %v1349_v43  ;;  %1205 = vmatmul.mubr.bf16.gmra.mrb[36].mxu0 %v1031_v38  ;;  %v1040_v58 = vrot.slane %v5022_v62, 1  ;;  %v1362_v60 = vor.u32 %v1361_v63, %v1358_v32  ;;  %v4585_v62 = vld [vmem:[%s4728_s25 + $0x230] sm:$0xff]   ;;  %6257 = vst [vmem:[#allocation8_spill] sm:$0xff] %v5241_v37  ;;  %v1044_v18 = vrot.slane %v971_v2, 1  ;;  %v5260_v63 = vld [vmem:[#allocation3 + $0x50] sm:$0xff]  ;;  %6261 = vst [vmem:[#allocation12_spill] sm:$0xff] %v5267_v48 }
  0x8f   : > { %4268 = vmatpush3.bf16.msra.mxu1 %v4588_v31  ;;  %1212 = vmatprep.mubr.bf16.mxu0 %v1037_v41  ;;  %v5218_v31 = vld [vmem:[#allocation3 + $0x48] sm:$0xff]  ;;  %6259 = vst [vmem:[#allocation10_spill] sm:$0xff] %v5260_v63 }
  0x90   : > { %4269 = vmatprep.subr.bf16.mxu1 %v4591_v59  ;;  %4208 = vmatpush3.bf16.msra.mxu0 %v4574_v10  ;;  %6254 = vst [vmem:[#allocation5_spill] sm:$0xff] %v5218_v31  ;;  %v5224_v56 = vpack.c.bf16 %v5218_v31, %v5216_v51  ;;  %v1830_v59 = vld [vmem:[#allocation3 + $0x10] sm:$0xfe]  ;;  %v1041_v1 = vsel %vm1019_vm2, %v1036_v55, %v1040_v58 }
  0x91   : > { %4209 = vmatprep.subr.bf16.mxu0 %v4578_v9  ;;  %v1363_v26 = vsel %vm1298_vm1, %v1349_v43, %v1362_v60  ;;  %v5245_v43 = vld [vmem:[#allocation3 + $0x68] sm:$0xff]  ;;  %v5250_v10 = vpack.c.bf16 %v5237_v45, %v5233_v28  ;;  %v1039_v9 = vsel %vm1019_vm2, %v1034_v49, %v1038_v39  ;;  %v6271_v31 = vpack.c.bf16 %v4865_v14, %v4859_v11  ;;  %v5431_v14 = vld [vmem:[#allocation3 + $0xd8] sm:$0xff] }
  0x92   : > { %1540 = vmatmul.mubr.bf16.gmra.mrb[40].mxu1 %v1342_v24  ;;  %v4589_v24 = vld [vmem:[%s4728_s25 + $0x278] sm:$0xff]   ;;  %v6220_v55 = vshll.u32 %v5224_v56, 16  ;;  %6258 = vst [vmem:[#allocation9_spill] sm:$0xff] %v5245_v43  ;;  %v5256_v21 = vpack.c.bf16 %v5245_v43, %v5241_v37  ;;  %v5402_v37 = vld [vmem:[#allocation3 + $0xb0] sm:$0xff]  ;;  %v6270_v28 = vrot.slane %v5224_v56, 3  ;;  %v6273_v11 = vpack.c.bf16 %v4882_v22, %v4857_v7 }
  0x93   : > { %1547 = vmatprep.mubr.bf16.mxu1 %v1354_v27  ;;  %4270 = vmatpush3.bf16.msra.mxu1 %v4592_v20  ;;  %v4590_v20 = vld [vmem:[%s4728_s25 + $0x238] sm:$0xff]   ;;  %v1918_v27 = vshrl.u32 %v1859_v47, 16  ;;  %v6221_v47 = vshrl.u32 %v5224_v56, 16  ;;  %6269 = vst [vmem:[#allocation15_spill] sm:$0xff] %v5402_v37 }
  0x94   : > { %4271 = vmatprep.subr.bf16.mxu1 %v4593_v13  ;;  %4210 = vmatpush3.bf16.msra.mxu0 %v4580_v54  ;;  %v1858_v13 = vpack.c.bf16 %v5226_v50, %v1830_v59  ;;  %v1927_v41 = vrot.slane %v6220_v55, 1  ;;  %v5262_v54 = vld [vmem:[#allocation3 + $0x60] sm:$0xff]  ;;  %v5275_v59 = vld [vmem:[#allocation3 + $0x88] sm:$0xff] }
  0x95   : > { %4211 = vmatprep.subr.bf16.mxu0 %v4583_v36  ;;  %v1923_v38 = vor.u32 %v1922_v33, %v1918_v27  ;;  %6260 = vst [vmem:[#allocation11_spill] sm:$0xff] %v5262_v54  ;;  %v5273_v42 = vpack.c.bf16 %v5262_v54, %v5260_v63  ;;  %v5293_v33 = vld [vmem:[#allocation3 + $0x80] sm:$0xff]  ;;  %v4597_v63 = vld [vmem:[%s4728_s25 + $0x348] sm:$0xff]  }
  0x96   : > { %1213 = vmatmul.mubr.bf16.gmra.mrb[40].mxu0 %v1035_v16  ;;  %v1908_v19 = vshll.u32 %v1858_v13, 16  ;;  %v1906_v32 = vshrl.u32 %v1858_v13, 16  ;;  %v1939_v2 = vor.u32 %v6221_v47, %v1927_v41  ;;  %v6224_v13 = vshrl.u32 %v5256_v21, 16  ;;  %v5348_v47 = vld [vmem:[#allocation3 + $0x90] sm:$0xff] }
  0x97   : > { %4272 = vmatpush3.bf16.msra.mxu1 %v4594_v17  ;;  %1220 = vmatprep.mubr.bf16.mxu0 %v1041_v1  ;;  %v4595_v17 = vld [vmem:[%s4728_s25 + $0x340] sm:$0xff]   ;;  %v1928_v49 = vsel %vm471_vm0, %v1923_v38, %v1927_v41  ;;  %v5281_v1 = vpack.c.bf16 %v5275_v59, %v5267_v48  ;;  %v5299_v38 = vld [vmem:[#allocation3 + $0xa8] sm:$0xff] }
  0x98   : > { %4212 = vmatpush3.bf16.msra.mxu0 %v4585_v62  ;;  %4373 = vmatprep.subr.bf16.mxu1 %v4603_v52  ;;  %v1910_v36 = vrot.slane %v1908_v19, 1  ;;  %v5297_v19 = vld [vmem:[#allocation3 + $0x98] sm:$0xff]  ;;  %v4604_v41 = vld [vmem:[%s4728_s25 + $0x380] sm:$0xff]   ;;  %v4625_v48 = vld [vmem:[%s4728_s25 + $0x3f8] sm:$0xff]  }
  0x99   : > { %4213 = vmatprep.subr.bf16.mxu0 %v4589_v24 }
  0x9a   : > { %1548 = vmatmul.mubr.bf16.gmra.mrb[44].mxu1 %v1350_v53  ;;  %v970_v53 = vpack.c.bf16 %v966_v5, %v5045_v8  ;;  %v6216_v8 = vshll.u32 %v5256_v21, 16  ;;  %v1911_v16 = vor.u32 %v1910_v36, %v1906_v32  ;;  %v5291_v5 = vld [vmem:[#allocation3 + $0x70] sm:$0xff]  ;;  %v6223_v32 = vshll.u32 %v5281_v1, 16 }
  0x9b   : > { %1555 = vmatprep.mubr.bf16.mxu1 %v1372_v35  ;;  %v6218_v35 = vshll.u32 %v5250_v10, 16  ;;  %6262 = vst [vmem:[#allocation13_spill] sm:$0xff] %v5291_v5 }
  0x9c   : > { %4214 = vmatpush3.bf16.msra.mxu0 %v4590_v20  ;;  %v1943_v24 = vrot.slane %v6216_v8, 1  ;;  %v297_v20 = vld [vmem:[#allocation2 + $0xe8] sm:$0xff]  ;;  %v2288_v8 = vrot.slane %v5273_v42, 3 }
  0x9d   : > { %4315 = vmatprep.subr.bf16.mxu0 %v4595_v17  ;;  %v1915_v62 = vrot.slane %v6218_v35, 1  ;;  %v5295_v52 = vmax.f32 %v297_v20, 0.0  ;;  %v296_v17 = vld [vmem:[#allocation2 + $0xe0] sm:$0xff]  ;;  %v6225_v20 = vrot.slane %v5224_v56, 3 }
  0x9e   : > { %1221 = vmatmul.mubr.bf16.gmra.mrb[44].mxu0 %v1039_v9  ;;  %v326_v9 = vmax.f32 %v296_v17, 0.0  ;;  %v6222_v17 = vrot.slane %v5250_v10, 3 }
  0x9f   : > { %6263 = vst [vmem:[#allocation14_spill] sm:$0xff] %v5295_v52  ;;  %357 = vst [vmem:[#allocation3 + $0xe8] sm:$0xff] %v5295_v52 }
  0xa0   : > { %356 = vst [vmem:[#allocation3 + $0xe0] sm:$0xff] %v326_v9  ;;  %v5330_v9 = vpack.c.bf16 %v5299_v38, %v5297_v19  ;;  %v5336_v36 = vsel %vm2281_vm3, %v6222_v17, %v2288_v8  ;;  %v5350_v17 = vld [vmem:[#allocation3 + $0xb8] sm:$0xff] }
  0xa2   : > { %1556 = vmatmul.mubr.bf16.gmra.mrb[48].mxu1 %v1363_v26  ;;  %v6217_v26 = vshll.u32 %v5273_v42, 16  ;;  %v6268_v52 = vshll.u32 %v5330_v9, 16 }
  0xa3   : > { %1563 = vmatprep.mubr.bf16.mxu1 %v1371_v34  ;;  %v1045_v34 = vsel %vm1019_vm2, %v1040_v58, %v1044_v18  ;;  %v1042_v58 = vrot.slane %v970_v53, 1  ;;  %v1916_v53 = vsel %vm471_vm0, %v1911_v16, %v1915_v62  ;;  %v2290_v16 = vrot.slane %v5256_v21, 3 }
  0xa4   : > { %1228 = vmatprep.mubr.bf16.mxu0 %v1045_v34  ;;  %v5317_v34 = vpack.c.bf16 %v5293_v33, %v5291_v5  ;;  %v6279_v5 = vpack.c.bf16 %v4898_v29, %v4867_v15  ;;  %v4605_v15 = vld [vmem:[%s4728_s25 + $0x360] sm:$0xff]  }
  0xa5   : > { %v1043_v27 = vsel %vm1019_vm2, %v1038_v39, %v1042_v58  ;;  %v4607_v39 = vld [vmem:[%s4728_s25 + $0x3c8] sm:$0xff]  }
  0xa6   : > { %1229 = vmatmul.mubr.bf16.gmra.mrb[48].mxu0 %v1043_v27  ;;  %v6227_v35 = vrot.slane %v5317_v34, 3 }
  0xa7   : > { %1236 = vmatprep.mubr.bf16.mxu0 %v1044_v18  ;;  %v1935_v18 = vrot.slane %v6217_v26, 1  ;;  %v4609_v26 = vld [vmem:[%s4728_s25 + $0x3d0] sm:$0xff]  }
  0xaa   : > { %1564 = vmatmul.mubr.bf16.gmra.mrb[52].mxu1 %v1362_v60  ;;  %v6219_v60 = vshrl.u32 %v5250_v10, 16 }
  0xab   : > { %2157 = vmatprep.mubr.bf16.mxu1 %v1928_v49  ;;  %v1944_v49 = vsel %vm471_vm0, %v1939_v2, %v1943_v24  ;;  %v5322_v2 = vsel %vm2281_vm3, %v6225_v20, %v2290_v16  ;;  %v4611_v20 = vld [vmem:[%s4728_s25 + $0x390] sm:$0xff]  }
  0xac   : > { %v1931_v27 = vor.u32 %v6219_v60, %v1915_v62  ;;  %v1959_v62 = vrot.slane %v6223_v32, 1 }
  0xae   : > { %v1936_v32 = vsel %vm471_vm0, %v1931_v27, %v1935_v18  ;;  %1237 = vmatmul.mubr.bf16.gmra.mrb[52].mxu0 %v1042_v58  ;;  %v6264_v27 = vpack.c.bf16 %v4855_v4, %v4853_v3  ;;  %v5369_v58 = vld [vmem:[#allocation3 + $0xa0] sm:$0xff]  ;;  %v6265_v3 = vshrl.u32 %v5273_v42, 16 }
  0xb0   : > { %1761 = vmatprep.mubr.bf16.mxu0 %v6264_v27  ;;  %v1947_v4 = vor.u32 %v6265_v3, %v1935_v18  ;;  %v1975_v18 = vrot.slane %v6268_v52, 1  ;;  %v4616_v3 = vld [vmem:[%s4728_s25 + $0x3e0] sm:$0xff]   ;;  %v4598_v52 = vld [vmem:[%s4728_s25 + $0x308] sm:$0xff]  }
  0xb2   : > { %2158 = vmatmul.mubr.bf16.vlgmr.msra.gmra.mrb[56].mxu1 %v1916_v53  ;;  %v4608_v53 = vld [vmem:[%s4728_s25 + $0x388] sm:$0xff]  }
  0xb3   : > { %2165 = vmatprep.mubr.bf16.mxu1 %v1944_v49  ;;  %4374 = vmatpush3.bf16.msra.mxu1 %v4604_v41  ;;  %v1955_v49 = vor.u32 %v6224_v13, %v1943_v24  ;;  %v6226_v24 = vrot.slane %v5281_v1, 3  ;;  %v4613_v41 = vld [vmem:[%s4728_s25 + $0x3d8] sm:$0xff]   ;;  %v2226_v13 = vld [vmem:[#allocation3 + $0x10] sm:$0xc0] }
  0xb4   : > { %4375 = vmatprep.subr.bf16.mxu1 %v4607_v39  ;;  %v5385_v39 = vld [vmem:[#allocation3 + $0xc8] sm:$0xff]  ;;  %v2230_v45 = vpack.c.bf16 %v5226_v50, %v2226_v13  ;;  %v4618_v13 = vld [vmem:[%s4728_s25 + $0x3a0] sm:$0xff]  }
  0xb5   : > { %v1960_v60 = vsel %vm471_vm0, %v1955_v49, %v1959_v62  ;;  %v5363_v55 = vsel %vm2281_vm3, %v2290_v16, %v6226_v24  ;;  %v5379_v16 = vsel %vm2281_vm3, %v2288_v8, %v6227_v35  ;;  %v5389_v24 = vpack.c.bf16 %v5385_v39, %v5350_v17  ;;  %v4596_v8 = vld [vmem:[%s4728_s25 + $0x300] sm:$0xff]  }
  0xb6   : > { %v6267_v35 = vshrl.u32 %v5281_v1, 16  ;;  %1762 = vmatmul.mubr.bf16.vlgmr.msra.gmra.mrb[56].mxu0 %v6271_v31  ;;  %v1857_v31 = vld [vmem:[#allocation3 + $0xe8] sm:$0x1] }
  0xb7   : > { %4376 = vmatpush3.bf16.msra.mxu1 %v4608_v53  ;;  %v2227_v53 = vld [vmem:[#allocation3 + $0x18] sm:$0xc0]  ;;  %4316 = vmatpush3.bf16.msra.mxu0 %v4596_v8  ;;  %v6274_v8 = vshrl.u32 %v5317_v34, 16 }
  0xb8   : > { %4377 = vmatprep.subr.bf16.mxu1 %v4609_v26  ;;  %v5373_v26 = vpack.c.bf16 %v5369_v58, %v5348_v47  ;;  %v2231_v49 = vpack.c.bf16 %v5207_v46, %v2227_v53  ;;  %v4614_v53 = vld [vmem:[%s4728_s25 + $0x398] sm:$0xff]   ;;  %1769 = vmatprep.mubr.bf16.mxu0 %v6273_v11 }
  0xb9   : > { %4317 = vmatprep.subr.bf16.mxu0 %v4597_v63 }
  0xba   : > { %2166 = vmatmul.mubr.bf16.gmra.mrb[60].mxu1 %v1936_v32  ;;  %v6266_v32 = vshll.u32 %v5317_v34, 16  ;;  %v6275_v22 = vshll.u32 %v5373_v26, 16 }
  0xbb   : > { %2173 = vmatprep.mubr.bf16.mxu1 %v1960_v60  ;;  %4378 = vmatpush3.bf16.msra.mxu1 %v4611_v20  ;;  %v1971_v60 = vor.u32 %v6267_v35, %v1959_v62  ;;  %v2282_v62 = vrot.slane %v2230_v45, 3  ;;  %v6236_v45 = vshrl.u32 %v5330_v9, 16  ;;  %v4620_v20 = vld [vmem:[%s4728_s25 + $0x3a8] sm:$0xff]  }
  0xbc   : > { %v1951_v27 = vrot.slane %v6266_v32, 1  ;;  %4379 = vmatprep.subr.bf16.mxu1 %v4613_v41  ;;  %v2285_v32 = vrot.slane %v2231_v49, 3  ;;  %v1967_v11 = vrot.slane %v6275_v22, 1  ;;  %4318 = vmatpush3.bf16.msra.mxu0 %v4598_v52  ;;  %v5459_v22 = vld [vmem:[#allocation3 + $0xd0] sm:$0xff] }
  0xbd   : > { %v1987_v54 = vor.u32 %v6236_v45, %v1975_v18  ;;  %v6277_v45 = vrot.slane %v5281_v1, 3 }
  0xbe   : > { %v5407_v35 = vsel %vm2281_vm3, %v2285_v32, %v6270_v28  ;;  %v1952_v41 = vsel %vm471_vm0, %v1947_v4, %v1951_v27  ;;  %v1976_v28 = vsel %vm471_vm0, %v1971_v60, %v1975_v18  ;;  %v4619_v32 = vld [vmem:[%s4728_s25 + $0x3e8] sm:$0xff]   ;;  %v6272_v4 = vrot.slane %v5250_v10, 3  ;;  %v4599_v60 = vld [vmem:[%s4728_s25 + $0x350] sm:$0xff]   ;;  %1770 = vmatmul.mubr.bf16.gmra.mrb[60].mxu0 %v6279_v5  ;;  %v2229_v5 = vld [vmem:[#allocation3 + $0xe8] sm:$0x3f] }
  0xbf   : > { %4380 = vmatpush3.bf16.msra.mxu1 %v4614_v53  ;;  %v1963_v7 = vor.u32 %v6274_v8, %v1951_v27  ;;  %v6276_v53 = vshll.u32 %v5389_v24, 16  ;;  %v2298_v27 = vrot.slane %v5330_v9, 3  ;;  %4319 = vmatprep.subr.bf16.mxu0 %v4599_v60  ;;  %v1856_v18 = vld [vmem:[#allocation3 + $0xe0] sm:$0x1]  ;;  %v6278_v60 = vrot.slane %v5317_v34, 3 }
  0xc0   : > { %4381 = vmatprep.subr.bf16.mxu1 %v4616_v3  ;;  %v5424_v49 = vsel %vm2281_vm3, %v2282_v62, %v6272_v4  ;;  %v5434_v3 = vld [vmem:[#allocation3 + $0xc0] sm:$0xff] }
  0xc1   : > { %v5438_v62 = vpack.c.bf16 %v5434_v3, %v5402_v37  ;;  %v4600_v4 = vld [vmem:[%s4728_s25 + $0x310] sm:$0xff]   ;;  %v1991_v63 = vrot.slane %v6276_v53, 1  ;;  %v5452_v37 = vpack.c.bf16 %v1857_v31, %v5431_v14  ;;  %v2296_v53 = vrot.slane %v5373_v26, 3 }
  0xc2   : > { %2174 = vmatmul.mubr.bf16.gmra.mrb[64].mxu1 %v1952_v41  ;;  %v4601_v41 = vld [vmem:[%s4728_s25 + $0x358] sm:$0xff]   ;;  %v1968_v52 = vsel %vm471_vm0, %v1963_v7, %v1967_v11  ;;  %v4624_v8 = vld [vmem:[%s4728_s25 + $0x3b0] sm:$0xff]   ;;  %v2302_v7 = vrot.slane %v5389_v24, 3  ;;  %v6280_v31 = vpack.c.bf16 %v4911_v40, %v4884_v23  ;;  %4320 = vmatpush3.bf16.msra.mxu0 %v4600_v4  ;;  %v5498_v4 = vpack.c.bf16 %v1856_v18, %v5459_v22 }
  0xc3   : > { %2181 = vmatprep.mubr.bf16.mxu1 %v1976_v28  ;;  %4382 = vmatpush3.bf16.msra.mxu1 %v4618_v13  ;;  %v4623_v28 = vld [vmem:[%s4728_s25 + $0x3f0] sm:$0xff]   ;;  %v5472_v13 = vsel %vm2281_vm3, %v6278_v60, %v2296_v53  ;;  %v1992_v43 = vsel %vm471_vm0, %v1987_v54, %v1991_v63  ;;  %v4602_v60 = vld [vmem:[%s4728_s25 + $0x318] sm:$0xff]   ;;  %v6284_v23 = vshll.u32 %v5438_v62, 16  ;;  %v2854_v18 = vpack.c.bf16 %v5297_v19, %v5275_v59 }
  0xc4   : > { %4383 = vmatprep.subr.bf16.mxu1 %v4619_v32  ;;  %v5464_v32 = vsel %vm2281_vm3, %v6277_v45, %v2298_v27  ;;  %v2005_v45 = vshll.u32 %v5452_v37, 16  ;;  %1777 = vmatprep.mubr.bf16.mxu0 %v6280_v31  ;;  %v5488_v29 = vsel %vm2281_vm3, %v2298_v27, %v2302_v7  ;;  %v4606_v27 = vld [vmem:[%s4728_s25 + $0x320] sm:$0xff]   ;;  %v6327_v19 = vpack.c.bf16 %v5350_v17, %v5299_v38 }
  0xc5   : > { %4321 = vmatprep.subr.bf16.mxu0 %v4601_v41  ;;  %6281 = vst [vmem:[#allocation16_spill] sm:$0xff] %v5488_v29  ;;  %v1983_v40 = vrot.slane %v6284_v23, 1  ;;  %v4626_v41 = vld [vmem:[%s4728_s25 + $0x3b8] sm:$0xff]   ;;  %v4610_v23 = vld [vmem:[%s4728_s25 + $0x368] sm:$0xff]  }
  0xc6   : > { %4322 = vmatpush3.bf16.msra.mxu0 %v4602_v60  ;;  %v1997_v60 = vshll.u32 %v5498_v4, 16 }
  0xc7   : > { %4384 = vmatpush3.bf16.msra.mxu1 %v4620_v20  ;;  %v2300_v20 = vrot.slane %v5438_v62, 3  ;;  %4323 = vmatprep.subr.bf16.mxu0 %v4605_v15  ;;  %v6286_v15 = vpack.c.bf16 %v4937_v57, %v4900_v30  ;;  %v2519_v30 = vld [vmem:[#allocation3 + $0x10] sm:$0x80] }
  0xc8   : > { %4385 = vmatprep.subr.bf16.mxu1 %v4623_v28  ;;  %v6283_v28 = vshrl.u32 %v5373_v26, 16 }
  0xc9   : > { %v5491_v54 = vsel %vm2281_vm3, %v2296_v53, %v2300_v20  ;;  %v6285_v53 = vshrl.u32 %v5389_v24, 16  ;;  %1778 = vmatmul.mubr.bf16.gmra.mrb[64].mxu0 %v6286_v15 }
  0xca   : > { %2182 = vmatmul.mubr.bf16.gmra.mrb[68].mxu1 %v1968_v52  ;;  %6282 = vst [vmem:[#allocation17_spill] sm:$0xff] %v5491_v54  ;;  %v1979_v51 = vor.u32 %v6283_v28, %v1967_v11  ;;  %v2228_v52 = vld [vmem:[#allocation3 + $0xe0] sm:$0x3f]  ;;  %v2007_v54 = vrot.slane %v2005_v45, 1  ;;  %v2520_v28 = vld [vmem:[#allocation3 + $0x18] sm:$0x80]  ;;  %4324 = vmatpush3.bf16.msra.mxu0 %v4606_v27 }
  0xcb   : > { %2189 = vmatprep.mubr.bf16.mxu1 %v1992_v43  ;;  %4386 = vmatpush3.bf16.msra.mxu1 %v4624_v8  ;;  %v2003_v31 = vor.u32 %v6285_v53, %v1991_v63  ;;  %v2233_v43 = vpack.c.bf16 %v2229_v5, %v5431_v14  ;;  %v2232_v11 = vpack.c.bf16 %v2228_v52, %v5459_v22  ;;  %v4612_v45 = vld [vmem:[%s4728_s25 + $0x328] sm:$0xff]   ;;  %v1993_v5 = vshrl.u32 %v5438_v62, 16 }
  0xcc   : > { %4387 = vmatprep.subr.bf16.mxu1 %v4625_v48  ;;  %v2853_v8 = vpack.c.bf16 %v5348_v47, %v5293_v33  ;;  %v1984_v48 = vsel %vm471_vm0, %v1979_v51, %v1983_v40  ;;  %v6287_v52 = vpack.c.bf16 %v4948_v6, %v4917_v44  ;;  %4325 = vmatprep.subr.bf16.mxu0 %v4610_v23  ;;  %v4621_v44 = vld [vmem:[%s4728_s25 + $0x378] sm:$0xff]  }
  0xcd   : > { %v5511_v29 = vrot.slane %v2233_v43, 3  ;;  %v5513_v63 = vrot.slane %v2232_v11, 3  ;;  %v2008_v53 = vsel %vm471_vm0, %v2003_v31, %v2007_v54  ;;  %v4615_v43 = vld [vmem:[%s4728_s25 + $0x370] sm:$0xff]   ;;  %v2524_v11 = vpack.c.bf16 %v5207_v46, %v2520_v28 }
  0xce   : > { %1785 = vmatprep.mubr.bf16.mxu0 %v6287_v52  ;;  %v1995_v57 = vor.u32 %v1993_v5, %v1983_v40  ;;  %v1999_v31 = vrot.slane %v1997_v60, 1  ;;  %v2012_v28 = vshrl.u32 %v5452_v37, 16  ;;  %4326 = vmatpush3.bf16.msra.mxu0 %v4612_v45  ;;  %v2523_v23 = vpack.c.bf16 %v5226_v50, %v2519_v30 }
  0xcf   : > { %4388 = vmatpush3.bf16.msra.mxu1 %v4626_v41  ;;  %v5529_v51 = vsel %vm2281_vm3, %v2302_v7, %v5511_v29  ;;  %v5533_v41 = vsel %vm2281_vm3, %v2300_v20, %v5513_v63  ;;  %v4617_v7 = vld [vmem:[%s4728_s25 + $0x330] sm:$0xff]   ;;  %v2573_v15 = vshrl.u32 %v2524_v11, 16  ;;  %v2576_v20 = vshll.u32 %v2524_v11, 16  ;;  %4327 = vmatprep.subr.bf16.mxu0 %v4615_v43 }
  0xd0   : > { %v2000_v6 = vsel %vm471_vm0, %v1995_v57, %v1999_v31  ;;  %v2014_v27 = vor.u32 %v2012_v28, %v2007_v54  ;;  %v6289_v37 = vshrl.u32 %v5224_v56, 16  ;;  %v6291_v43 = vpack.c.bf16 %v4996_v0, %v4953_v12  ;;  %v4622_v54 = vld [vmem:[%s4728_s25 + $0x338] sm:$0xff]   ;;  %v4670_v57 = vld [vmem:[#allocation3 + $0x90] sm:$0xff] }
  0xd1   : > { %v2575_v40 = vrot.slane %v2573_v15, 3  ;;  %v2578_v60 = vrot.slane %v2576_v20, 4  ;;  %v2009_v11 = vshrl.u32 %v5498_v4, 16  ;;  %v2564_v30 = vshll.u32 %v2523_v23, 16  ;;  %v4671_v20 = vld [vmem:[#allocation3 + $0xb8] sm:$0xff] }
  0xd2   : > { %2190 = vmatmul.mubr.bf16.gmra.mrb[72].mxu1 %v1984_v48  ;;  %v6288_v48 = vpack.c.bf16 %v4958_v25, %v4942_v61  ;;  %v2580_v52 = vrot.slane %v6289_v37, 3  ;;  %4328 = vmatpush3.bf16.msra.mxu0 %v4617_v7  ;;  %v4627_v61 = vld [vmem:[%s4728_s25 + $0x440] sm:$0xff]   ;;  %v2561_v25 = vshrl.u32 %v2523_v23, 16  ;;  %v1594_v28 = vpack.c.bf16 %v5369_v58, %v4670_v57 }
  0xd3   : > { %2197 = vmatprep.mubr.bf16.mxu1 %v2008_v53  ;;  %v6290_v53 = vshll.u32 %v5224_v56, 16  ;;  %4329 = vmatprep.subr.bf16.mxu0 %v4621_v44  ;;  %v2579_v15 = vor.u32 %v2578_v60, %v2575_v40  ;;  %v2011_v12 = vor.u32 %v2009_v11, %v1999_v31  ;;  %v6292_v0 = vshrl.u32 %v5250_v10, 16 }
  0xd4   : > { %1786 = vmatmul.mubr.bf16.gmra.mrb[68].mxu0 %v6288_v48  ;;  %v1597_v48 = vpack.c.bf16 %v5385_v39, %v4671_v20  ;;  %v2563_v44 = vrot.slane %v2561_v25, 3  ;;  %v2566_v4 = vrot.slane %v2564_v30, 4  ;;  %v6294_v40 = vshrl.u32 %v5256_v21, 16 }
  0xd5   : > { %v2581_v45 = vrot.slane %v6290_v53, 4  ;;  %1793 = vmatprep.mubr.bf16.mxu0 %v6291_v43  ;;  %v2568_v7 = vrot.slane %v6292_v0, 3  ;;  %v6295_v37 = vshll.u32 %v5256_v21, 16  ;;  %v6297_v21 = vshll.u32 %v5273_v42, 16 }
  0xd6   : > { %4330 = vmatpush3.bf16.msra.mxu0 %v4622_v54  ;;  %v2588_v60 = vrot.slane %v6294_v40, 3  ;;  %v2567_v31 = vor.u32 %v2566_v4, %v2563_v44  ;;  %v6299_v20 = vshll.u32 %v5281_v1, 16  ;;  %v1598_v0 = vpack.c.bf16 %v5459_v22, %v5459_v22 }
  0xd7   : > { %v2582_v56 = vor.u32 %v2581_v45, %v2580_v52  ;;  %4431 = vmatprep.subr.bf16.mxu0 %v4627_v61  ;;  %v2589_v52 = vrot.slane %v6295_v37, 4  ;;  %v4672_v45 = vld [vmem:[#allocation3 + $0xb0] sm:$0xff]  ;;  %v6296_v61 = vshrl.u32 %v5273_v42, 16  ;;  %v2585_v30 = vrot.slane %v6297_v21, 4 }
  0xd8   : > { %v1596_v43 = vpack.c.bf16 %v5434_v3, %v4672_v45  ;;  %v6301_v4 = vshll.u32 %v5317_v34, 16  ;;  %v6303_v40 = vshll.u32 %v5330_v9, 16 }
  0xd9   : > { %v2583_v23 = vsel %vm1298_vm1, %v2579_v15, %v2582_v56  ;;  %v2590_v54 = vor.u32 %v2589_v52, %v2588_v60  ;;  %v2584_v25 = vrot.slane %v6296_v61, 3 }
  0xda   : > { %2198 = vmatmul.mubr.bf16.gmra.mrb[76].mxu1 %v2000_v6  ;;  %v6293_v6 = vshll.u32 %v5250_v10, 16  ;;  %v1599_v10 = vpack.c.bf16 %v5431_v14, %v5431_v14  ;;  %v2605_v60 = vrot.slane %v6303_v40, 4  ;;  %v4636_v40 = vld [vmem:[%s4728_s25 + $0x420] sm:$0xff]  }
  0xdb   : > { %2205 = vmatprep.mubr.bf16.mxu1 %v2014_v27  ;;  %v2591_v57 = vsel %vm1298_vm1, %v2582_v56, %v2590_v54  ;;  %v6300_v56 = vshrl.u32 %v5317_v34, 16  ;;  %v2522_v34 = vld [vmem:[#allocation3 + $0xe8] sm:$0x7f] }
  0xdc   : > { %v2569_v27 = vrot.slane %v6293_v6, 4  ;;  %1794 = vmatmul.mubr.bf16.gmra.mrb[72].mxu0 %v1594_v28  ;;  %v6298_v28 = vshrl.u32 %v5281_v1, 16  ;;  %v2593_v6 = vrot.slane %v6301_v4, 4 }
  0xdd   : > { %1801 = vmatprep.mubr.bf16.mxu0 %v1597_v48  ;;  %v2597_v48 = vrot.slane %v6299_v20, 4  ;;  %v2592_v44 = vrot.slane %v6300_v56, 3 }
  0xde   : > { %v2570_v53 = vor.u32 %v2569_v27, %v2568_v7  ;;  %v2596_v15 = vrot.slane %v6298_v28, 3  ;;  %v6302_v27 = vshrl.u32 %v5330_v9, 16 }
  0xdf   : > { %v2594_v37 = vor.u32 %v2593_v6, %v2592_v44 }
  0xe0   : > { %v2571_v11 = vsel %vm1298_vm1, %v2567_v31, %v2570_v53  ;;  %v2598_v42 = vor.u32 %v2597_v48, %v2596_v15  ;;  %v4628_v31 = vld [vmem:[%s4728_s25 + $0x400] sm:$0xff]   ;;  %v2521_v48 = vld [vmem:[#allocation3 + $0xe0] sm:$0x7f] }
  0xe1   : > { %v2525_v56 = vpack.c.bf16 %v2521_v48, %v5459_v22 }
  0xe2   : > { %2206 = vmatmul.mubr.bf16.gmra.mrb[80].mxu1 %v2011_v12  ;;  %v2586_v12 = vor.u32 %v2585_v30, %v2584_v25  ;;  %v2599_v1 = vsel %vm1298_vm1, %v2590_v54, %v2598_v42  ;;  %v6307_v25 = vshll.u32 %v5389_v24, 16  ;;  %v2526_v30 = vpack.c.bf16 %v2522_v34, %v5431_v14  ;;  %v4638_v34 = vld [vmem:[%s4728_s25 + $0x428] sm:$0xff]  }
  0xe3   : > { %2776 = vmatprep.mubr.bf16.mxu1 %v2583_v23  ;;  %v2604_v23 = vrot.slane %v6302_v27, 3  ;;  %v2617_v27 = vshrl.u32 %v2525_v56, 16 }
  0xe4   : > { %1802 = vmatmul.mubr.bf16.gmra.mrb[76].mxu0 %v1596_v43  ;;  %v2587_v7 = vsel %vm1298_vm1, %v2570_v53, %v2586_v12  ;;  %v4629_v53 = vld [vmem:[%s4728_s25 + $0x448] sm:$0xff]   ;;  %v2595_v45 = vsel %vm1298_vm1, %v2586_v12, %v2594_v37  ;;  %v6304_v43 = vshrl.u32 %v5373_v26, 16  ;;  %v2613_v21 = vrot.slane %v6307_v25, 4  ;;  %v4633_v12 = vld [vmem:[%s4728_s25 + $0x458] sm:$0xff]  }
  0xe5   : > { %1809 = vmatprep.mubr.bf16.mxu0 %v1599_v10  ;;  %v2606_v52 = vor.u32 %v2605_v60, %v2604_v23  ;;  %v6305_v10 = vshll.u32 %v5373_v26, 16  ;;  %v4631_v26 = vld [vmem:[%s4728_s25 + $0x450] sm:$0xff]   ;;  %v2626_v15 = vshrl.u32 %v2526_v30, 16  ;;  %v2629_v20 = vshll.u32 %v2526_v30, 16  ;;  %v4637_v60 = vld [vmem:[%s4728_s25 + $0x468] sm:$0xff]  }
  0xe6   : > { %v2600_v54 = vrot.slane %v6304_v43, 3  ;;  %v2620_v23 = vshll.u32 %v2525_v56, 16  ;;  %v4640_v43 = vld [vmem:[%s4728_s25 + $0x430] sm:$0xff]  }
  0xe7   : > { %v2601_v9 = vrot.slane %v6305_v10, 4  ;;  %v2628_v4 = vrot.slane %v2626_v15, 3  ;;  %v2631_v6 = vrot.slane %v2629_v20, 4 }
  0xea   : > { %2777 = vmatmul.mubr.bf16.vlgmr.msra.gmra.mrb[84].mxu1 %v2571_v11  ;;  %v6306_v11 = vshrl.u32 %v5389_v24, 16  ;;  %v4632_v24 = vld [vmem:[%s4728_s25 + $0x410] sm:$0xff]  }
  0xeb   : > { %2784 = vmatprep.mubr.bf16.mxu1 %v2591_v57  ;;  %v4630_v57 = vld [vmem:[%s4728_s25 + $0x408] sm:$0xff]  }
  0xec   : > { %1810 = vmatmul.mubr.bf16.gmra.mrb[80].mxu0 %v1598_v0  ;;  %v2612_v61 = vrot.slane %v6306_v11, 3 }
  0xed   : > { %2450 = vmatprep.mubr.bf16.mxu0 %v5407_v35  ;;  %v2607_v35 = vsel %vm1298_vm1, %v2598_v42, %v2606_v52  ;;  %v6308_v42 = vshll.u32 %v5438_v62, 16 }
  0xee   : > { %v2614_v28 = vor.u32 %v2613_v21, %v2612_v61  ;;  %v6310_v21 = vld [vmem:[#allocation17_spill] sm:$0xff] }
  0xf0   : > { %v2615_v44 = vsel %vm1298_vm1, %v2606_v52, %v2614_v28  ;;  %v2622_v52 = vrot.slane %v2620_v23, 4 }
  0xf2   : > { %2785 = vmatmul.mubr.bf16.gmra.mrb[88].mxu1 %v2587_v7  ;;  %v2609_v7 = vrot.slane %v6308_v42, 4 }
  0xf3   : > { %2792 = vmatprep.mubr.bf16.mxu1 %v2599_v1  ;;  %v4634_v1 = vld [vmem:[%s4728_s25 + $0x418] sm:$0xff]  }
  0xf4   : > { %2451 = vmatmul.mubr.bf16.vlgmr.msra.gmra.mrb[84].mxu0 %v5424_v49  ;;  %v2602_v49 = vor.u32 %v2601_v9, %v2600_v54  ;;  %v4641_v54 = vld [vmem:[%s4728_s25 + $0x478] sm:$0xff]  }
  0xf5   : > { %4432 = vmatpush3.bf16.msra.mxu0 %v4628_v31  ;;  %2458 = vmatprep.mubr.bf16.mxu0 %v5322_v2  ;;  %v2608_v2 = vrot.slane %v1993_v5, 3  ;;  %v4635_v5 = vld [vmem:[%s4728_s25 + $0x460] sm:$0xff]  }
  0xf6   : > { %4433 = vmatprep.subr.bf16.mxu0 %v4629_v53  ;;  %v2603_v0 = vsel %vm1298_vm1, %v2594_v37, %v2602_v49  ;;  %v4639_v53 = vld [vmem:[%s4728_s25 + $0x470] sm:$0xff]  }
  0xf7   : > { %v2610_v62 = vor.u32 %v2609_v7, %v2608_v2 }
  0xf9   : > { %4434 = vmatpush3.bf16.msra.mxu0 %v4630_v57  ;;  %v2611_v37 = vsel %vm1298_vm1, %v2602_v49, %v2610_v62 }
  0xfa   : > { %2793 = vmatmul.mubr.bf16.gmra.mrb[92].mxu1 %v2595_v45  ;;  %4435 = vmatprep.subr.bf16.mxu0 %v4631_v26 }
  0xfb   : > { %2800 = vmatprep.mubr.bf16.mxu1 %v2607_v35 }
  0xfc   : > { %2459 = vmatmul.mubr.bf16.gmra.mrb[88].mxu0 %v5336_v36  ;;  %v2632_v36 = vor.u32 %v2631_v6, %v2628_v4 }
  0xfd   : > { %2466 = vmatprep.mubr.bf16.mxu0 %v5363_v55  ;;  %4436 = vmatpush3.bf16.msra.mxu0 %v4632_v24  ;;  %v2619_v55 = vrot.slane %v2617_v27, 3 }
  0xfe   : > { %4437 = vmatprep.subr.bf16.mxu0 %v4633_v12  ;;  %v2633_v31 = vsel %vm1298_vm1, %v2614_v28, %v2632_v36 }
  0xff   : > { %v2623_v45 = vor.u32 %v2622_v52, %v2619_v55 }
 0x101   : > { %4438 = vmatpush3.bf16.msra.mxu0 %v4634_v1  ;;  %v2624_v10 = vsel %vm1298_vm1, %v2610_v62, %v2623_v45 }
 0x102   : > { %2801 = vmatmul.mubr.bf16.gmra.mrb[96].mxu1 %v2603_v0  ;;  %4439 = vmatprep.subr.bf16.mxu0 %v4635_v5 }
 0x103   : > { %2808 = vmatprep.mubr.bf16.mxu1 %v2615_v44 }
 0x104   : > { %2467 = vmatmul.mubr.bf16.gmra.mrb[92].mxu0 %v5379_v16  ;;  %v6309_v16 = vld [vmem:[#allocation16_spill] sm:$0xff] }
 0x105   : > { %2474 = vmatprep.mubr.bf16.mxu0 %v5464_v32  ;;  %4440 = vmatpush3.bf16.msra.mxu0 %v4636_v40  ;;  %v4642_v32 = vld [vmem:[%s4728_s25 + $0x438] sm:$0xff]  }
 0x106   : > { %4441 = vmatprep.subr.bf16.mxu0 %v4637_v60 }
 0x109   : > { %4442 = vmatpush3.bf16.msra.mxu0 %v4638_v34 }
 0x10a   : > { %2809 = vmatmul.mubr.bf16.gmra.mrb[100].mxu1 %v2611_v37  ;;  %4443 = vmatprep.subr.bf16.mxu0 %v4639_v53 }
 0x10b   : > { %2816 = vmatprep.mubr.bf16.mxu1 %v2633_v31  ;;  %v6313_v31 = vld [vmem:[#allocation6_spill] sm:$0xff] }
 0x10c   : > { %2475 = vmatmul.mubr.bf16.gmra.mrb[96].mxu0 %v5472_v13  ;;  %v6314_v34 = vpack.c.bf16 %v6313_v31, %v5226_v50 }
 0x10d   : > { %2482 = vmatprep.mubr.bf16.mxu0 %v6309_v16  ;;  %4444 = vmatpush3.bf16.msra.mxu0 %v4640_v43  ;;  %v6316_v43 = vld [vmem:[#allocation5_spill] sm:$0xff] }
 0x10e   : > { %4445 = vmatprep.subr.bf16.mxu0 %v4641_v54 }
 0x111   : > { %4446 = vmatpush3.bf16.msra.mxu0 %v4642_v32 }
 0x112   : > { %2817 = vmatmul.mubr.bf16.gmra.mrb[104].mxu1 %v2624_v10 }
 0x113   : > { %2824 = vmatprep.mubr.bf16.mxu1 %v2632_v36 }
 0x114   : > { %2483 = vmatmul.mubr.bf16.gmra.mrb[100].mxu0 %v6310_v21  ;;  %v3983_v20 = vpop.f32.mrb[0].mxu0 }
 0x115   : > { %v4041_v9 = vpop.f32.mrb[0].mxu1  ;;  %2490 = vmatprep.mubr.bf16.mxu0 %v5529_v51  ;;  %v3984_v48 = vpop.f32.mrb[1].mxu0 }
 0x116   : > { %v4042_v35 = vpop.f32.mrb[1].mxu1  ;;  %v3985_v24 = vadd.f32 %v3984_v48, %v3983_v20  ;;  %v3986_v12 = vpop.f32.mrb[2].mxu0  ;;  %v6321_v20 = vld [vmem:[#allocation12_spill] sm:$0xff]  ;;  %v6322_v48 = vld [vmem:[#allocation9_spill] sm:$0xff] }
 0x117   : > { %v4043_v11 = vadd.f32 %v4042_v35, %v4041_v9  ;;  %v4044_v61 = vpop.f32.mrb[2].mxu1  ;;  %v3987_v2 = vpop.f32.mrb[3].mxu0 }
 0x118   : > { %v4045_v25 = vpop.f32.mrb[3].mxu1  ;;  %v3988_v51 = vadd.f32 %v3987_v2, %v3986_v12 }
 0x119   : > { %v4046_v30 = vadd.f32 %v4045_v25, %v4044_v61  ;;  %v5643_v7 = vadd.f32 %v4043_v11, %v3985_v24  ;;  %v6323_v24 = vpack.c.bf16 %v6321_v20, %v6322_v48  ;;  %v6329_v48 = vld [vmem:[#allocation14_spill] sm:$0xff] }
 0x11a   : > { %2825 = vmatmul.mubr.bf16.gmra.mrb[108].mxu1 %v2623_v45  ;;  %v6315_v45 = vld [vmem:[#allocation8_spill] sm:$0xff] }
 0x11b   : > { %v5646_v6 = vadd.f32 %v4046_v30, %v3988_v51  ;;  %v6317_v54 = vpack.c.bf16 %v6315_v45, %v6316_v43 }
 0x11c   : > { %2491 = vmatmul.mubr.bf16.gmra.mrb[104].mxu0 %v5533_v41  ;;  %v6311_v41 = vld [vmem:[#allocation4_spill] sm:$0xff]  ;;  %v3989_v5 = vpop.f32.mrb[4].mxu0 }
 0x11d   : > { %v4047_v13 = vpop.f32.mrb[4].mxu1  ;;  %2498 = vmatprep.mubr.bf16.mxu0 %v5511_v29  ;;  %v6312_v29 = vpack.c.bf16 %v6311_v41, %v5207_v46  ;;  %v3990_v62 = vpop.f32.mrb[5].mxu0 }
 0x11e   : > { %v4048_v57 = vpop.f32.mrb[5].mxu1  ;;  %v3991_v27 = vadd.f32 %v3990_v62, %v3989_v5  ;;  %v3992_v23 = vpop.f32.mrb[6].mxu0 }
 0x11f   : > { %v4049_v26 = vadd.f32 %v4048_v57, %v4047_v13  ;;  %v4050_v49 = vpop.f32.mrb[6].mxu1  ;;  %v3993_v40 = vpop.f32.mrb[7].mxu0  ;;  %v6318_v57 = vld [vmem:[#allocation10_spill] sm:$0xff] }
 0x120   : > { %v4051_v28 = vpop.f32.mrb[7].mxu1  ;;  %v3994_v55 = vadd.f32 %v3993_v40, %v3992_v23 }
 0x121   : > { %v4052_v15 = vadd.f32 %v4051_v28, %v4050_v49  ;;  %v5651_v37 = vadd.f32 %v4049_v26, %v3991_v27  ;;  %v6319_v26 = vld [vmem:[#allocation7_spill] sm:$0xff]  ;;  %v6324_v27 = vld [vmem:[#allocation13_spill] sm:$0xff] }
 0x122   : > { %v6320_v49 = vpack.c.bf16 %v6318_v57, %v6319_v26 }
 0x123   : > { %v5656_v46 = vadd.f32 %v4052_v15, %v3994_v55 }
 0x124   : > { %2499 = vmatmul.mubr.bf16.gmra.mrb[108].mxu0 %v5513_v63  ;;  %v3995_v16 = vpop.f32.mrb[8].mxu0 }
 0x125   : > { %v4053_v0 = vpop.f32.mrb[8].mxu1  ;;  %3022 = vmatprep.mubr.bf16.mxu0 %v6312_v29  ;;  %v3996_v32 = vpop.f32.mrb[9].mxu0 }
 0x126   : > { %v4054_v42 = vpop.f32.mrb[9].mxu1  ;;  %v3997_v9 = vadd.f32 %v3996_v32, %v3995_v16  ;;  %v3998_v35 = vpop.f32.mrb[10].mxu0 }
 0x127   : > { %v4055_v56 = vadd.f32 %v4054_v42, %v4053_v0  ;;  %v4056_v44 = vpop.f32.mrb[10].mxu1  ;;  %v3999_v61 = vpop.f32.mrb[11].mxu0 }
 0x128   : > { %v4057_v4 = vpop.f32.mrb[11].mxu1  ;;  %v4000_v30 = vadd.f32 %v3999_v61, %v3998_v35  ;;  %v6328_v35 = vld [vmem:[#allocation15_spill] sm:$0xff] }
 0x129   : > { %v4058_v1 = vadd.f32 %v4057_v4, %v4056_v44  ;;  %v5661_v21 = vadd.f32 %v4055_v56, %v3997_v9 }
 0x12b   : > { %v5666_v15 = vadd.f32 %v4058_v1, %v4000_v30  ;;  %v6325_v1 = vld [vmem:[#allocation11_spill] sm:$0xff]  ;;  %v2858_v30 = vpack.c.bf16 %v5431_v14, %v5385_v39  ;;  %v2857_v39 = vpack.c.bf16 %v5459_v22, %v5434_v3  ;;  %v4673_v22 = vld [vmem:[#allocation3 + $0xe0] sm:$0xff] }
 0x12c   : > { %3023 = vmatmul.mubr.bf16.vlgmr.msra.gmra.mrb[112].mxu0 %v6314_v34  ;;  %v4001_v0 = vpop.f32.mrb[12].mxu0  ;;  %v6326_v23 = vpack.c.bf16 %v6324_v27, %v6325_v1  ;;  %v2859_v27 = vpack.c.bf16 %v4673_v22, %v4673_v22  ;;  %v4655_v22 = vld [vmem:[%s4723_s22 + $0x40] ss:$8 sps:$4 sm:$0xff]  }
 0x12d   : > { %v4059_v36 = vpop.f32.mrb[12].mxu1  ;;  %3030 = vmatprep.mubr.bf16.mxu0 %v6317_v54  ;;  %v4002_v2 = vpop.f32.mrb[13].mxu0 }
 0x12e   : > { %v4060_v60 = vpop.f32.mrb[13].mxu1  ;;  %v4003_v42 = vadd.f32 %v4002_v2, %v4001_v0  ;;  %v4004_v51 = vpop.f32.mrb[14].mxu0 }
 0x12f   : > { %v4061_v52 = vadd.f32 %v4060_v60, %v4059_v36  ;;  %v4062_v63 = vpop.f32.mrb[14].mxu1  ;;  %v4005_v44 = vpop.f32.mrb[15].mxu0 }
 0x130   : > { %v4063_v53 = vpop.f32.mrb[15].mxu1  ;;  %v4006_v29 = vadd.f32 %v4005_v44, %v4004_v51 }
 0x131   : > { %v4064_v10 = vadd.f32 %v4063_v53, %v4062_v63  ;;  %v5671_v41 = vadd.f32 %v4061_v52, %v4003_v42 }
 0x133   : > { %v5676_v40 = vadd.f32 %v4064_v10, %v4006_v29  ;;  %v4643_v29 = vld [vmem:[%s4723_s22] ss:$8 sps:$4 sm:$0xff]  }
 0x134   : > { %3031 = vmatmul.mubr.bf16.gmra.mrb[116].mxu0 %v6320_v49  ;;  %v4007_v55 = vpop.f32.mrb[16].mxu0 }
 0x135   : > { %v4065_v11 = vpop.f32.mrb[16].mxu1  ;;  %3038 = vmatprep.mubr.bf16.mxu0 %v6323_v24  ;;  %v4008_v63 = vpop.f32.mrb[17].mxu0  ;;  %v2860_v24 = vpack.c.bf16 %v6329_v48, %v6329_v48 }
 0x136   : > { %v4066_v25 = vpop.f32.mrb[17].mxu1  ;;  %v4009_v31 = vadd.f32 %v4008_v63, %v4007_v55  ;;  %v4010_v52 = vpop.f32.mrb[18].mxu0 }
 0x137   : > { %v4067_v50 = vadd.f32 %v4066_v25, %v4065_v11  ;;  %v4068_v13 = vpop.f32.mrb[18].mxu1  ;;  %v4011_v53 = vpop.f32.mrb[19].mxu0  ;;  %v2855_v11 = vpack.c.bf16 %v6328_v35, %v5369_v58 }
 0x138   : > { %v4069_v28 = vpop.f32.mrb[19].mxu1  ;;  %v4012_v54 = vadd.f32 %v4011_v53, %v4010_v52 }
 0x139   : > { %v4070_v12 = vadd.f32 %v4069_v28, %v4068_v13  ;;  %v5681_v43 = vadd.f32 %v4067_v50, %v4009_v31 }
 0x13b   : > { %v5686_v59 = vadd.f32 %v4070_v12, %v4012_v54 }
 0x13c   : > { %3039 = vmatmul.mubr.bf16.gmra.mrb[120].mxu0 %v6326_v23 }
 0x13d   : > { %v4071_v56 = vpop.f32.mrb[20].mxu1  ;;  %3046 = vmatprep.mubr.bf16.mxu0 %v2854_v18 }
 0x13e   : > { %v4072_v4 = vpop.f32.mrb[21].mxu1 }
 0x13f   : > { %v4073_v5 = vadd.f32 %v4072_v4, %v4071_v56  ;;  %v4074_v62 = vpop.f32.mrb[22].mxu1 }
 0x140   : > { %v4075_v36 = vpop.f32.mrb[23].mxu1 }
 0x141   : > { %v4076_v60 = vadd.f32 %v4075_v36, %v4074_v62  ;;  %v4013_v18 = vpop.f32.mrb[20].mxu0 }
 0x142   : > { %v4014_v9 = vpop.f32.mrb[21].mxu0 }
 0x143   : > { %v4015_v61 = vadd.f32 %v4014_v9, %v4013_v18  ;;  %v4016_v25 = vpop.f32.mrb[22].mxu0 }
 0x144   : > { %3047 = vmatmul.mubr.bf16.gmra.mrb[124].mxu0 %v2853_v8  ;;  %v4017_v47 = vpop.f32.mrb[23].mxu0 }
 0x145   : > { %v4077_v34 = vpop.f32.mrb[24].mxu1  ;;  %3054 = vmatprep.mubr.bf16.mxu0 %v6327_v19  ;;  %v5695_v8 = vadd.f32 %v4073_v5, %v4015_v61  ;;  %v4018_v13 = vadd.f32 %v4017_v47, %v4016_v25  ;;  %v4645_v5 = vld [vmem:[%s4723_s22 + $0x4] ss:$8 sps:$4 sm:$0xff]  }
 0x146   : > { %v4078_v45 = vpop.f32.mrb[25].mxu1  ;;  %3207 = vmatprep.subr.bf16.mxu1 %v4645_v5 }
 0x147   : > { %v4079_v16 = vadd.f32 %v4078_v45, %v4077_v34  ;;  %v4080_v32 = vpop.f32.mrb[26].mxu1  ;;  %v5697_v17 = vadd.f32 %v4076_v60, %v4018_v13  ;;  %3208 = vmatpush1.bf16.msra.mxu1 %v4643_v29  ;;  %v4651_v13 = vld [vmem:[%s4723_s22 + $0x24] ss:$8 sps:$4 sm:$0xff]  }
 0x148   : > { %v4081_v10 = vpop.f32.mrb[27].mxu1  ;;  %v4646_v32 = vld [vmem:[%s4723_s22 + $0x10] ss:$8 sps:$4 sm:$0xff]  }
 0x149   : > { %v4019_v58 = vpop.f32.mrb[24].mxu0  ;;  %v4648_v10 = vld [vmem:[%s4723_s22 + $0x14] ss:$8 sps:$4 sm:$0xff]  }
 0x14a   : > { %v4020_v28 = vpop.f32.mrb[25].mxu0  ;;  %3209 = vmatprep.subr.bf16.mxu1 %v4648_v10 }
 0x14b   : > { %v4021_v14 = vadd.f32 %v4020_v28, %v4019_v58  ;;  %v4022_v20 = vpop.f32.mrb[26].mxu0  ;;  %3210 = vmatpush1.bf16.msra.mxu1 %v4646_v32 }
 0x14c   : > { %3055 = vmatmul.mubr.bf16.gmra.mrb[128].mxu0 %v2855_v11  ;;  %v4023_v0 = vpop.f32.mrb[27].mxu0  ;;  %3211 = vmatprep.subr.bf16.mxu1 %v4651_v13 }
 0x14d   : > { %v4157_v50 = vpop.f32.mrb[28].mxu1  ;;  %3062 = vmatprep.mubr.bf16.mxu0 %v2858_v30  ;;  %v5703_v42 = vadd.f32 %v4079_v16, %v4021_v14 }
 0x14e   : > { %v4158_v33 = vpop.f32.mrb[29].mxu1 }
 0x14f   : > { %v4159_v57 = vadd.f32 %v4158_v33, %v4157_v50  ;;  %v4160_v26 = vpop.f32.mrb[30].mxu1  ;;  %v4649_v33 = vld [vmem:[%s4723_s22 + $0x20] ss:$8 sps:$4 sm:$0xff]  }
 0x150   : > { %v4161_v38 = vpop.f32.mrb[31].mxu1  ;;  %3212 = vmatpush1.bf16.msra.mxu1 %v4649_v33 }
 0x151   : > { %v4162_v49 = vadd.f32 %v4161_v38, %v4160_v26  ;;  %v4099_v62 = vpop.f32.mrb[28].mxu0 }
 0x152   : > { %v4100_v3 = vpop.f32.mrb[29].mxu0 }
 0x153   : > { %v4101_v1 = vadd.f32 %v4100_v3, %v4099_v62  ;;  %v4102_v23 = vpop.f32.mrb[30].mxu0 }
 0x154   : > { %3063 = vmatmul.mubr.bf16.gmra.mrb[132].mxu0 %v2857_v39  ;;  %v4103_v60 = vpop.f32.mrb[31].mxu0 }
 0x155   : > { %v4163_v12 = vpop.f32.mrb[32].mxu1  ;;  %3070 = vmatprep.mubr.bf16.mxu0 %v2860_v24  ;;  %v1244_v63 = vadd.f32 %v4101_v1, %v5643_v7  ;;  %v4104_v31 = vadd.f32 %v4103_v60, %v4102_v23 }
 0x156   : > { %v4164_v2 = vpop.f32.mrb[33].mxu1 }
 0x157   : > { %v4165_v51 = vadd.f32 %v4164_v2, %v4163_v12  ;;  %v4166_v56 = vpop.f32.mrb[34].mxu1  ;;  %v1245_v45 = vadd.f32 %v4104_v31, %v5646_v6  ;;  %v5709_v54 = vadd.f32 %v4159_v57, %v1244_v63 }
 0x158   : > { %v4167_v44 = vpop.f32.mrb[35].mxu1 }
 0x159   : > { %v4168_v4 = vadd.f32 %v4167_v44, %v4166_v56  ;;  %v5713_v19 = vadd.f32 %v4162_v49, %v1245_v45  ;;  %v4105_v18 = vpop.f32.mrb[32].mxu0  ;;  %v4654_v56 = vld [vmem:[%s4723_s22 + $0x34] ss:$8 sps:$4 sm:$0xff]  }
 0x15a   : > { %v4106_v9 = vpop.f32.mrb[33].mxu0  ;;  %3213 = vmatprep.subr.bf16.mxu1 %v4654_v56 }
 0x15b   : > { %v4107_v7 = vadd.f32 %v4106_v9, %v4105_v18  ;;  %v4108_v35 = vpop.f32.mrb[34].mxu0  ;;  %v4658_v18 = vld [vmem:[%s4723_s22 + $0x50] ss:$8 sps:$4 sm:$0xff]   ;;  %v4660_v9 = vld [vmem:[%s4723_s22 + $0x54] ss:$8 sps:$4 sm:$0xff]  }
 0x15c   : > { %3071 = vmatmul.mubr.bf16.gmra.mrb[136].mxu0 %v2859_v27  ;;  %v4109_v61 = vpop.f32.mrb[35].mxu0  ;;  %v4657_v27 = vld [vmem:[%s4723_s22 + $0x44] ss:$8 sps:$4 sm:$0xff]  }
 0x15d   : > { %v4169_v36 = vpop.f32.mrb[36].mxu1  ;;  %v1246_v6 = vadd.f32 %v4107_v7, %v5651_v37  ;;  %v4110_v30 = vadd.f32 %v4109_v61, %v4108_v35 }
 0x15e   : > { %v4170_v55 = vpop.f32.mrb[37].mxu1 }
 0x15f   : > { %v4171_v52 = vadd.f32 %v4170_v55, %v4169_v36  ;;  %v4172_v34 = vpop.f32.mrb[38].mxu1  ;;  %v1247_v26 = vadd.f32 %v4110_v30, %v5656_v46  ;;  %v5719_v38 = vadd.f32 %v4165_v51, %v1246_v6  ;;  %v4652_v51 = vld [vmem:[%s4723_s22 + $0x30] ss:$8 sps:$4 sm:$0xff]  }
 0x160   : > { %v4173_v53 = vpop.f32.mrb[39].mxu1  ;;  %3214 = vmatpush1.bf16.msra.mxu1 %v4652_v51 }
 0x161   : > { %v4174_v16 = vadd.f32 %v4173_v53, %v4172_v34  ;;  %v5721_v58 = vadd.f32 %v4168_v4, %v1247_v26  ;;  %v4111_v28 = vpop.f32.mrb[36].mxu0  ;;  %3215 = vmatprep.subr.bf16.mxu1 %v4657_v27  ;;  %v4663_v26 = vld [vmem:[%s4723_s22 + $0x64] ss:$8 sps:$4 sm:$0xff]  }
 0x162   : > { %v4112_v39 = vpop.f32.mrb[37].mxu0 }
 0x163   : > { %v4113_v37 = vadd.f32 %v4112_v39, %v4111_v28  ;;  %v4114_v14 = vpop.f32.mrb[38].mxu0 }
 0x164   : > { %v4115_v48 = vpop.f32.mrb[39].mxu0  ;;  %3216 = vmatpush1.bf16.msra.mxu1 %v4655_v22 }
 0x165   : > { %v4175_v11 = vpop.f32.mrb[40].mxu1  ;;  %v1248_v46 = vadd.f32 %v4113_v37, %v5661_v21  ;;  %v4116_v12 = vadd.f32 %v4115_v48, %v4114_v14  ;;  %3217 = vmatprep.subr.bf16.mxu1 %v4660_v9 }
 0x166   : > { %v4176_v25 = vpop.f32.mrb[41].mxu1 }
 0x167   : > { %v4177_v50 = vadd.f32 %v4176_v25, %v4175_v11  ;;  %v4178_v47 = vpop.f32.mrb[42].mxu1  ;;  %v1249_v4 = vadd.f32 %v4116_v12, %v5666_v15  ;;  %v5727_v29 = vadd.f32 %v4171_v52, %v1248_v46 }
 0x168   : > { %v4179_v57 = vpop.f32.mrb[43].mxu1  ;;  %3218 = vmatpush1.bf16.msra.mxu1 %v4658_v18 }
 0x169   : > { %v4180_v49 = vadd.f32 %v4179_v57, %v4178_v47  ;;  %v5729_v62 = vadd.f32 %v4174_v16, %v1249_v4  ;;  %v4117_v3 = vpop.f32.mrb[40].mxu0  ;;  %v4661_v57 = vld [vmem:[%s4723_s22 + $0x60] ss:$8 sps:$4 sm:$0xff]   ;;  %3219 = vmatprep.subr.bf16.mxu1 %v4663_v26  ;;  %v4664_v4 = vld [vmem:[%s4723_s22 + $0x70] ss:$8 sps:$4 sm:$0xff]  }
 0x16a   : > { %v4118_v1 = vpop.f32.mrb[41].mxu0 }
 0x16b   : > { %v4119_v21 = vadd.f32 %v4118_v1, %v4117_v3  ;;  %v4120_v23 = vpop.f32.mrb[42].mxu0 }
 0x16c   : > { %v4121_v60 = vpop.f32.mrb[43].mxu0  ;;  %3220 = vmatpush1.bf16.msra.mxu1 %v4661_v57 }
 0x16d   : > { %v4181_v20 = vpop.f32.mrb[44].mxu1  ;;  %v1250_v15 = vadd.f32 %v4119_v21, %v5671_v41  ;;  %v4122_v63 = vadd.f32 %v4121_v60, %v4120_v23 }
 0x16e   : > { %v4182_v24 = vpop.f32.mrb[45].mxu1 }
 0x16f   : > { %v4183_v0 = vadd.f32 %v4182_v24, %v4181_v20  ;;  %v4184_v2 = vpop.f32.mrb[46].mxu1  ;;  %v1251_v53 = vadd.f32 %v4122_v63, %v5676_v40  ;;  %v5735_v45 = vadd.f32 %v4177_v50, %v1250_v15 }
 0x170   : > { %v4185_v44 = vpop.f32.mrb[47].mxu1 }
 0x171   : > { %v4186_v5 = vadd.f32 %v4185_v44, %v4184_v2  ;;  %v5737_v32 = vadd.f32 %v4180_v49, %v1251_v53  ;;  %v4123_v10 = vpop.f32.mrb[44].mxu0  ;;  %v4666_v44 = vld [vmem:[%s4723_s22 + $0x74] ss:$8 sps:$4 sm:$0xff]  }
 0x172   : > { %v4124_v7 = vpop.f32.mrb[45].mxu0  ;;  %3221 = vmatprep.subr.bf16.mxu1 %v4666_v44 }
 0x173   : > { %v4125_v35 = vadd.f32 %v4124_v7, %v4123_v10  ;;  %v4126_v11 = vpop.f32.mrb[46].mxu0  ;;  %3222 = vmatpush1.bf16.msra.mxu1 %v4664_v4 }
 0x174   : > { %v4127_v61 = vpop.f32.mrb[47].mxu0 }
 0x175   : > { %v4187_v36 = vpop.f32.mrb[48].mxu1  ;;  %v1252_v40 = vadd.f32 %v4125_v35, %v5681_v43  ;;  %v4128_v6 = vadd.f32 %v4127_v61, %v4126_v11 }
 0x176   : > { %v4188_v55 = vpop.f32.mrb[49].mxu1 }
 0x177   : > { %v4189_v31 = vadd.f32 %v4188_v55, %v4187_v36  ;;  %v4190_v52 = vpop.f32.mrb[50].mxu1  ;;  %v1253_v33 = vadd.f32 %v4128_v6, %v5686_v59  ;;  %v5743_v13 = vadd.f32 %v4183_v0, %v1252_v40  ;;  %v4682_v36 = vmov 0  }
 0x178   : > { %v4191_v34 = vpop.f32.mrb[51].mxu1  ;;  %3239 = vmatprep.mubr.bf16.mxu1 %v4682_v36 }
 0x179   : > { %v4192_v16 = vadd.f32 %v4191_v34, %v4190_v52  ;;  %v5747_v49 = vadd.f32 %v4186_v5, %v1253_v33  ;;  %v4129_v28 = vpop.f32.mrb[48].mxu0 }
 0x17a   : > { %v4130_v39 = vpop.f32.mrb[49].mxu0 }
 0x17b   : > { %v4131_v37 = vadd.f32 %v4130_v39, %v4129_v28  ;;  %v4132_v43 = vpop.f32.mrb[50].mxu0 }
 0x17c   : > { %v4133_v20 = vpop.f32.mrb[51].mxu0 }
 0x17d   : > { %v4193_v41 = vpop.f32.mrb[52].mxu1  ;;  %v1254_v24 = vadd.f32 %v4131_v37, %v5695_v8  ;;  %v4134_v59 = vadd.f32 %v4133_v20, %v4132_v43 }
 0x17e   : > { %v4194_v25 = vpop.f32.mrb[53].mxu1 }
 0x17f   : > { %v4195_v30 = vadd.f32 %v4194_v25, %v4193_v41  ;;  %v4196_v50 = vpop.f32.mrb[54].mxu1  ;;  %v1255_v2 = vadd.f32 %v4134_v59, %v5697_v17  ;;  %v5751_v51 = vadd.f32 %v4189_v31, %v1254_v24 }
 0x180   : > { %v4197_v47 = vpop.f32.mrb[55].mxu1 }
 0x181   : > { %v5755_v5 = vadd.f32 %v4192_v16, %v1255_v2  ;;  %v4135_v3 = vpop.f32.mrb[52].mxu0 }
 0x182   : > { %v4136_v22 = vpop.f32.mrb[53].mxu0 }
 0x183   : > { %v4137_v27 = vadd.f32 %v4136_v22, %v4135_v3  ;;  %v4138_v1 = vpop.f32.mrb[54].mxu0 }
 0x184   : > { %v4139_v21 = vpop.f32.mrb[55].mxu0 }
 0x185   : > { %v4273_v14 = vpop.f32.mrb[56].mxu1  ;;  %v1256_v17 = vadd.f32 %v4137_v27, %v5703_v42 }
 0x186   : > { %v4274_v48 = vpop.f32.mrb[57].mxu1 }
 0x187   : > { %v4275_v46 = vadd.f32 %v4274_v48, %v4273_v14  ;;  %v4276_v12 = vpop.f32.mrb[58].mxu1  ;;  %v5759_v63 = vadd.f32 %v4195_v30, %v1256_v17 }
 0x188   : > { %v4277_v0 = vpop.f32.mrb[59].mxu1 }
 0x189   : > { %v4278_v56 = vadd.f32 %v4277_v0, %v4276_v12  ;;  %v4215_v52 = vpop.f32.mrb[56].mxu0 }
 0x18a   : > { %v4216_v34 = vpop.f32.mrb[57].mxu0 }
 0x18b   : > { %v4217_v53 = vadd.f32 %v4216_v34, %v4215_v52  ;;  %v4218_v16 = vpop.f32.mrb[58].mxu0 }
 0x18c   : > { %v4219_v18 = vpop.f32.mrb[59].mxu0 }
 0x18d   : > { %v4279_v8 = vpop.f32.mrb[60].mxu1  ;;  %v1817_v7 = vadd.f32 %v4217_v53, %v5709_v54  ;;  %v4220_v35 = vadd.f32 %v4219_v18, %v4218_v16 }
 0x18e   : > { %v4280_v23 = vpop.f32.mrb[61].mxu1 }
 0x18f   : > { %v4281_v60 = vadd.f32 %v4280_v23, %v4279_v8  ;;  %v4282_v55 = vpop.f32.mrb[62].mxu1  ;;  %v1818_v42 = vadd.f32 %v4220_v35, %v5713_v19  ;;  %v5763_v25 = vadd.f32 %v4275_v46, %v1817_v7 }
 0x190   : > { %v4283_v15 = vpop.f32.mrb[63].mxu1 }
 0x191   : > { %v4284_v31 = vadd.f32 %v4283_v15, %v4282_v55  ;;  %v5765_v6 = vadd.f32 %v4278_v56, %v1818_v42  ;;  %v4221_v30 = vpop.f32.mrb[60].mxu0 }
 0x192   : > { %v4222_v50 = vpop.f32.mrb[61].mxu0 }
 0x193   : > { %v4223_v47 = vadd.f32 %v4222_v50, %v4221_v30  ;;  %v4224_v33 = vpop.f32.mrb[62].mxu0 }
 0x194   : > { %v4225_v26 = vpop.f32.mrb[63].mxu0 }
 0x195   : > { %v4285_v10 = vpop.f32.mrb[64].mxu1  ;;  %v1819_v54 = vadd.f32 %v4223_v47, %v5719_v38  ;;  %v4226_v39 = vadd.f32 %v4225_v26, %v4224_v33 }
 0x196   : > { %v4286_v9 = vpop.f32.mrb[65].mxu1 }
 0x197   : > { %v4287_v11 = vadd.f32 %v4286_v9, %v4285_v10  ;;  %v4288_v41 = vpop.f32.mrb[66].mxu1  ;;  %v1820_v19 = vadd.f32 %v4226_v39, %v5721_v58  ;;  %v5769_v20 = vadd.f32 %v4281_v60, %v1819_v54 }
 0x198   : > { %v4289_v61 = vpop.f32.mrb[67].mxu1 }
 0x199   : > { %v4290_v40 = vadd.f32 %v4289_v61, %v4288_v41  ;;  %v5771_v24 = vadd.f32 %v4284_v31, %v1820_v19 }
 0x19c   : > { %v4227_v59 = vpop.f32.mrb[64].mxu0 }
 0x19d   : > { %v4291_v57 = vpop.f32.mrb[68].mxu1  ;;  %v4228_v46 = vpop.f32.mrb[65].mxu0 }
 0x19e   : > { %v4292_v28 = vpop.f32.mrb[69].mxu1  ;;  %v4229_v12 = vadd.f32 %v4228_v46, %v4227_v59  ;;  %v4230_v0 = vpop.f32.mrb[66].mxu0 }
 0x19f   : > { %v4293_v37 = vadd.f32 %v4292_v28, %v4291_v57  ;;  %v4294_v43 = vpop.f32.mrb[70].mxu1  ;;  %v4231_v56 = vpop.f32.mrb[67].mxu0 }
 0x1a0   : > { %v4295_v14 = vpop.f32.mrb[71].mxu1  ;;  %v1821_v38 = vadd.f32 %v4229_v12, %v5727_v29  ;;  %v4232_v4 = vadd.f32 %v4231_v56, %v4230_v0 }
 0x1a1   : > { %v4296_v48 = vadd.f32 %v4295_v14, %v4294_v43 }
 0x1a2   : > { %v1822_v58 = vadd.f32 %v4232_v4, %v5729_v62  ;;  %v5775_v1 = vadd.f32 %v4287_v11, %v1821_v38 }
 0x1a4   : > { %v5777_v21 = vadd.f32 %v4290_v40, %v1822_v58 }
 0x1a5   : > { %v4297_v2 = vpop.f32.mrb[72].mxu1 }
 0x1a6   : > { %v4298_v44 = vpop.f32.mrb[73].mxu1 }
 0x1a7   : > { %v4299_v3 = vadd.f32 %v4298_v44, %v4297_v2  ;;  %v4300_v22 = vpop.f32.mrb[74].mxu1  ;;  %v4233_v23 = vpop.f32.mrb[68].mxu0 }
 0x1a8   : > { %v4301_v27 = vpop.f32.mrb[75].mxu1  ;;  %v4234_v17 = vpop.f32.mrb[69].mxu0 }
 0x1a9   : > { %v4302_v8 = vadd.f32 %v4301_v27, %v4300_v22  ;;  %v4235_v60 = vadd.f32 %v4234_v17, %v4233_v23  ;;  %v4236_v55 = vpop.f32.mrb[70].mxu0 }
 0x1aa   : > { %v4237_v31 = vpop.f32.mrb[71].mxu0 }
 0x1ab   : > { %v1823_v29 = vadd.f32 %v4235_v60, %v5735_v45  ;;  %v4238_v34 = vadd.f32 %v4237_v31, %v4236_v55 }
 0x1ad   : > { %v4303_v15 = vpop.f32.mrb[76].mxu1  ;;  %v1824_v62 = vadd.f32 %v4238_v34, %v5737_v32  ;;  %v5781_v18 = vadd.f32 %v4293_v37, %v1823_v29 }
 0x1ae   : > { %v4304_v52 = vpop.f32.mrb[77].mxu1 }
 0x1af   : > { %v4305_v53 = vadd.f32 %v4304_v52, %v4303_v15  ;;  %v4306_v16 = vpop.f32.mrb[78].mxu1  ;;  %v5783_v7 = vadd.f32 %v4296_v48, %v1824_v62  ;;  %v4239_v35 = vpop.f32.mrb[72].mxu0 }
 0x1b0   : > { %v4307_v10 = vpop.f32.mrb[79].mxu1  ;;  %v4240_v11 = vpop.f32.mrb[73].mxu0 }
 0x1b1   : > { %v4308_v9 = vadd.f32 %v4307_v10, %v4306_v16  ;;  %v4241_v41 = vadd.f32 %v4240_v11, %v4239_v35  ;;  %v4242_v61 = vpop.f32.mrb[74].mxu0 }
 0x1b2   : > { %v4243_v40 = vpop.f32.mrb[75].mxu0 }
 0x1b3   : > { %v1825_v45 = vadd.f32 %v4241_v41, %v5743_v13  ;;  %v4244_v50 = vadd.f32 %v4243_v40, %v4242_v61 }
 0x1b5   : > { %v4309_v42 = vpop.f32.mrb[80].mxu1  ;;  %v1826_v32 = vadd.f32 %v4244_v50, %v5747_v49  ;;  %v5787_v26 = vadd.f32 %v4299_v3, %v1825_v45 }
 0x1b6   : > { %v4310_v30 = vpop.f32.mrb[81].mxu1 }
 0x1b7   : > { %v4311_v47 = vadd.f32 %v4310_v30, %v4309_v42  ;;  %v4312_v33 = vpop.f32.mrb[82].mxu1  ;;  %v5789_v28 = vadd.f32 %v4302_v8, %v1826_v32  ;;  %v4245_v54 = vpop.f32.mrb[76].mxu0 }
 0x1b8   : > { %v4313_v57 = vpop.f32.mrb[83].mxu1  ;;  %v4246_v39 = vpop.f32.mrb[77].mxu0 }
 0x1b9   : > { %v4247_v37 = vadd.f32 %v4246_v39, %v4245_v54  ;;  %v4248_v43 = vpop.f32.mrb[78].mxu0 }
 0x1ba   : > { %v4249_v19 = vpop.f32.mrb[79].mxu0 }
 0x1bb   : > { %v1827_v59 = vadd.f32 %v4247_v37, %v5751_v51  ;;  %v4250_v13 = vadd.f32 %v4249_v19, %v4248_v43 }
 0x1bd   : > { %v4389_v14 = vpop.f32.mrb[84].mxu1  ;;  %v1828_v2 = vadd.f32 %v4250_v13, %v5755_v5  ;;  %v5793_v49 = vadd.f32 %v4305_v53, %v1827_v59 }
 0x1be   : > { %v4390_v48 = vpop.f32.mrb[85].mxu1 }
 0x1bf   : > { %v4391_v46 = vadd.f32 %v4390_v48, %v4389_v14  ;;  %v4392_v12 = vpop.f32.mrb[86].mxu1  ;;  %v5795_v44 = vadd.f32 %v4308_v9, %v1828_v2  ;;  %v4251_v38 = vpop.f32.mrb[80].mxu0 }
 0x1c0   : > { %v4393_v0 = vpop.f32.mrb[87].mxu1  ;;  %v4252_v4 = vpop.f32.mrb[81].mxu0 }
 0x1c1   : > { %v4394_v56 = vadd.f32 %v4393_v0, %v4392_v12  ;;  %v4253_v3 = vadd.f32 %v4252_v4, %v4251_v38  ;;  %v4254_v22 = vpop.f32.mrb[82].mxu0 }
 0x1c2   : > { %v4255_v58 = vpop.f32.mrb[83].mxu0 }
 0x1c3   : > { %v1829_v51 = vadd.f32 %v4253_v3, %v5759_v63 }
 0x1c5   : > { %v4395_v27 = vpop.f32.mrb[88].mxu1  ;;  %v5798_v55 = vadd.f32 %v4311_v47, %v1829_v51 }
 0x1c6   : > { %v4396_v8 = vpop.f32.mrb[89].mxu1 }
 0x1c7   : > { %v4397_v23 = vadd.f32 %v4396_v8, %v4395_v27  ;;  %v4398_v17 = vpop.f32.mrb[90].mxu1  ;;  %v4331_v15 = vpop.f32.mrb[84].mxu0 }
 0x1c8   : > { %v4399_v60 = vpop.f32.mrb[91].mxu1  ;;  %v4332_v31 = vpop.f32.mrb[85].mxu0 }
 0x1c9   : > { %v4400_v5 = vadd.f32 %v4399_v60, %v4398_v17  ;;  %v4333_v52 = vadd.f32 %v4332_v31, %v4331_v15  ;;  %v4334_v29 = vpop.f32.mrb[86].mxu0 }
 0x1ca   : > { %v4335_v53 = vpop.f32.mrb[87].mxu0 }
 0x1cb   : > { %v2506_v10 = vadd.f32 %v4333_v52, %v5763_v25  ;;  %v4336_v62 = vadd.f32 %v4335_v53, %v4334_v29 }
 0x1cd   : > { %v4401_v34 = vpop.f32.mrb[92].mxu1  ;;  %v2507_v63 = vadd.f32 %v4336_v62, %v5765_v6  ;;  %v5802_v41 = vadd.f32 %v4391_v46, %v2506_v10 }
 0x1ce   : > { %v4402_v16 = vpop.f32.mrb[93].mxu1 }
 0x1cf   : > { %v4403_v9 = vadd.f32 %v4402_v16, %v4401_v34  ;;  %v4404_v35 = vpop.f32.mrb[94].mxu1  ;;  %v5804_v42 = vadd.f32 %v4394_v56, %v2507_v63  ;;  %v4337_v40 = vpop.f32.mrb[88].mxu0 }
 0x1d0   : > { %v4405_v11 = vpop.f32.mrb[95].mxu1  ;;  %v4338_v30 = vpop.f32.mrb[89].mxu0 }
 0x1d1   : > { %v4406_v61 = vadd.f32 %v4405_v11, %v4404_v35  ;;  %v4339_v45 = vadd.f32 %v4338_v30, %v4337_v40  ;;  %v4340_v50 = vpop.f32.mrb[90].mxu0 }
 0x1d2   : > { %v4341_v33 = vpop.f32.mrb[91].mxu0 }
 0x1d3   : > { %v2508_v25 = vadd.f32 %v4339_v45, %v5769_v20  ;;  %v4342_v32 = vadd.f32 %v4341_v33, %v4340_v50 }
 0x1d5   : > { %v4407_v47 = vpop.f32.mrb[96].mxu1  ;;  %v2509_v6 = vadd.f32 %v4342_v32, %v5771_v24  ;;  %v5808_v43 = vadd.f32 %v4397_v23, %v2508_v25 }
 0x1d6   : > { %v4408_v57 = vpop.f32.mrb[97].mxu1 }
 0x1d7   : > { %v4409_v54 = vadd.f32 %v4408_v57, %v4407_v47  ;;  %v4410_v39 = vpop.f32.mrb[98].mxu1  ;;  %v5810_v19 = vadd.f32 %v4400_v5, %v2509_v6  ;;  %v4343_v48 = vpop.f32.mrb[92].mxu0 }
 0x1d8   : > { %v4411_v37 = vpop.f32.mrb[99].mxu1  ;;  %v4344_v59 = vpop.f32.mrb[93].mxu0 }
 0x1d9   : > { %v4412_v14 = vadd.f32 %v4411_v37, %v4410_v39  ;;  %v4345_v13 = vadd.f32 %v4344_v59, %v4343_v48  ;;  %v4346_v46 = vpop.f32.mrb[94].mxu0 }
 0x1da   : > { %v4347_v0 = vpop.f32.mrb[95].mxu0 }
 0x1db   : > { %v2510_v20 = vadd.f32 %v4345_v13, %v5775_v1  ;;  %v4348_v56 = vadd.f32 %v4347_v0, %v4346_v46 }
 0x1dd   : > { %v4413_v12 = vpop.f32.mrb[100].mxu1  ;;  %v2511_v24 = vadd.f32 %v4348_v56, %v5777_v21  ;;  %v5814_v22 = vadd.f32 %v4403_v9, %v2510_v20 }
 0x1de   : > { %v4414_v2 = vpop.f32.mrb[101].mxu1 }
 0x1df   : > { %v4415_v38 = vadd.f32 %v4414_v2, %v4413_v12  ;;  %v4416_v4 = vpop.f32.mrb[102].mxu1  ;;  %v5816_v58 = vadd.f32 %v4406_v61, %v2511_v24  ;;  %v4349_v8 = vpop.f32.mrb[96].mxu0 }
 0x1e0   : > { %v4417_v3 = vpop.f32.mrb[103].mxu1  ;;  %v4350_v51 = vpop.f32.mrb[97].mxu0 }
 0x1e1   : > { %v4418_v27 = vadd.f32 %v4417_v3, %v4416_v4  ;;  %v4351_v23 = vadd.f32 %v4350_v51, %v4349_v8  ;;  %v4352_v17 = vpop.f32.mrb[98].mxu0 }
 0x1e2   : > { %v4353_v5 = vpop.f32.mrb[99].mxu0 }
 0x1e3   : > { %v2512_v1 = vadd.f32 %v4351_v23, %v5781_v18  ;;  %v4354_v31 = vadd.f32 %v4353_v5, %v4352_v17 }
 0x1e5   : > { %v4419_v60 = vpop.f32.mrb[104].mxu1  ;;  %v2513_v21 = vadd.f32 %v4354_v31, %v5783_v7  ;;  %v5820_v53 = vadd.f32 %v4409_v54, %v2512_v1 }
 0x1e6   : > { %v4420_v15 = vpop.f32.mrb[105].mxu1 }
 0x1e7   : > { %v4421_v52 = vadd.f32 %v4420_v15, %v4419_v60  ;;  %v4422_v29 = vpop.f32.mrb[106].mxu1  ;;  %v5822_v10 = vadd.f32 %v4412_v14, %v2513_v21  ;;  %v4355_v62 = vpop.f32.mrb[100].mxu0 }
 0x1e8   : > { %v4423_v34 = vpop.f32.mrb[107].mxu1  ;;  %v4356_v9 = vpop.f32.mrb[101].mxu0 }
 0x1e9   : > { %v4424_v16 = vadd.f32 %v4423_v34, %v4422_v29  ;;  %v4357_v35 = vadd.f32 %v4356_v9, %v4355_v62  ;;  %v4358_v11 = vpop.f32.mrb[102].mxu0 }
 0x1ea   : > { %v4359_v61 = vpop.f32.mrb[103].mxu0 }
 0x1eb   : > { %v2514_v18 = vadd.f32 %v4357_v35, %v5787_v26  ;;  %v4360_v30 = vadd.f32 %v4359_v61, %v4358_v11 }
 0x1ed   : > { %v4425_v63 = vpop.f32.mrb[108].mxu1  ;;  %v2515_v7 = vadd.f32 %v4360_v30, %v5789_v28  ;;  %v5826_v33 = vadd.f32 %v4415_v38, %v2514_v18 }
 0x1ee   : > { %v4426_v40 = vpop.f32.mrb[109].mxu1 }
 0x1ef   : > { %v4427_v45 = vadd.f32 %v4426_v40, %v4425_v63  ;;  %v4428_v50 = vpop.f32.mrb[110].mxu1  ;;  %v5828_v57 = vadd.f32 %v4418_v27, %v2515_v7  ;;  %v4361_v25 = vpop.f32.mrb[104].mxu0 }
 0x1f0   : > { %v4429_v47 = vpop.f32.mrb[111].mxu1  ;;  %v4362_v32 = vpop.f32.mrb[105].mxu0 }
 0x1f1   : > { %v4363_v54 = vadd.f32 %v4362_v32, %v4361_v25  ;;  %v4364_v39 = vpop.f32.mrb[106].mxu0 }
 0x1f2   : > { %v4365_v37 = vpop.f32.mrb[107].mxu0 }
 0x1f3   : > { %v2516_v6 = vadd.f32 %v4363_v54, %v5793_v49  ;;  %v4366_v14 = vadd.f32 %v4365_v37, %v4364_v39 }
 0x1f5   : > { %v2517_v26 = vadd.f32 %v4366_v14, %v5795_v44  ;;  %v5832_v48 = vadd.f32 %v4421_v52, %v2516_v6 }
 0x1f7   : > { %v5834_v59 = vadd.f32 %v4424_v16, %v2517_v26  ;;  %v4367_v13 = vpop.f32.mrb[108].mxu0 }
 0x1f8   : > { %v4368_v28 = vpop.f32.mrb[109].mxu0 }
 0x1f9   : > { %v4369_v46 = vadd.f32 %v4368_v28, %v4367_v13  ;;  %v4370_v12 = vpop.f32.mrb[110].mxu0 }
 0x1fa   : > { %v4371_v0 = vpop.f32.mrb[111].mxu0 }
 0x1fb   : > { %v2518_v2 = vadd.f32 %v4369_v46, %v5798_v55 }
 0x1fd   : > { %v5837_v20 = vadd.f32 %v4427_v45, %v2518_v2 }
 0x1ff   : > { %v4447_v56 = vpop.f32.mrb[112].mxu0 }
 0x200   : > { %v4448_v38 = vpop.f32.mrb[113].mxu0 }
 0x201   : > { %v4449_v4 = vadd.f32 %v4448_v38, %v4447_v56  ;;  %v4450_v49 = vpop.f32.mrb[114].mxu0 }
 0x202   : > { %v4451_v3 = vpop.f32.mrb[115].mxu0 }
 0x203   : > { %v3078_v44 = vadd.f32 %v4449_v4, %v5802_v41  ;;  %v4452_v24 = vadd.f32 %v4451_v3, %v4450_v49 }
 0x205   : > { %v3079_v27 = vadd.f32 %v4452_v24, %v5804_v42  ;;  %v3091_v8 = vmax.f32 %v3078_v44, 0.0 }
 0x207   : > { %v3092_v51 = vmax.f32 %v3079_v27, 0.0  ;;  %v4453_v23 = vpop.f32.mrb[116].mxu0 }
 0x208   : > { %v4454_v17 = vpop.f32.mrb[117].mxu0 }
 0x209   : > { %v3104_v60 = vpack.c.bf16 %v3092_v51, %v3091_v8  ;;  %v4455_v5 = vadd.f32 %v4454_v17, %v4453_v23  ;;  %v4456_v15 = vpop.f32.mrb[118].mxu0 }
 0x20a   : > { %v4457_v55 = vpop.f32.mrb[119].mxu0 }
 0x20b   : > { %v3080_v1 = vadd.f32 %v4455_v5, %v5808_v43  ;;  %v4458_v31 = vadd.f32 %v4457_v55, %v4456_v15  ;;  %3240 = vmatmul.mubr.bf16.vlgmr.msra.gmra.mrb[112].mxu1 %v3104_v60  ;;  %v3308_v5 = vld [vmem:[#allocation2 + $0x10] sm:$0xff]  ;;  %v3309_v15 = vld [vmem:[#allocation2 + $0x18] sm:$0xff] }
 0x20c   : > { %3249 = vmatprep.mubr.bf16.mxu1 %v4682_v36 }
 0x20d   : > { %v3081_v52 = vadd.f32 %v4458_v31, %v5810_v19  ;;  %v3093_v41 = vmax.f32 %v3080_v1, 0.0 }
 0x20f   : > { %v3094_v29 = vmax.f32 %v3081_v52, 0.0  ;;  %v4459_v34 = vpop.f32.mrb[120].mxu0  ;;  %v3311_v52 = vld [vmem:[#allocation2 + $0x28] sm:$0xff] }
 0x210   : > { %v4460_v42 = vpop.f32.mrb[121].mxu0 }
 0x211   : > { %v4461_v21 = vadd.f32 %v4460_v42, %v4459_v34  ;;  %v4462_v16 = vpop.f32.mrb[122].mxu0  ;;  %v3105_v62 = vpack.c.bf16 %v3094_v29, %v3093_v41 }
 0x212   : > { %v4463_v9 = vpop.f32.mrb[123].mxu0 }
 0x213   : > { %v3082_v35 = vadd.f32 %v4461_v21, %v5814_v22  ;;  %v4464_v11 = vadd.f32 %v4463_v9, %v4462_v16  ;;  %3250 = vmatmul.mubr.bf16.gmra.mrb[116].mxu1 %v3105_v62  ;;  %v3312_v9 = vld [vmem:[#allocation2 + $0x30] sm:$0xff] }
 0x214   : > { %3259 = vmatprep.mubr.bf16.mxu1 %v4682_v36 }
 0x215   : > { %v3083_v43 = vadd.f32 %v4464_v11, %v5816_v58  ;;  %v3095_v63 = vmax.f32 %v3082_v35, 0.0  ;;  %v3313_v35 = vld [vmem:[#allocation2 + $0x38] sm:$0xff] }
 0x217   : > { %v3096_v61 = vmax.f32 %v3083_v43, 0.0  ;;  %v4465_v40 = vpop.f32.mrb[124].mxu0  ;;  %v3314_v43 = vld [vmem:[#allocation2 + $0x40] sm:$0xff] }
 0x218   : > { %v4466_v19 = vpop.f32.mrb[125].mxu0 }
 0x219   : > { %v4467_v18 = vadd.f32 %v4466_v19, %v4465_v40  ;;  %v4468_v30 = vpop.f32.mrb[126].mxu0  ;;  %v3106_v45 = vpack.c.bf16 %v3096_v61, %v3095_v63  ;;  %v3315_v40 = vld [vmem:[#allocation2 + $0x48] sm:$0xff] }
 0x21a   : > { %v4469_v50 = vpop.f32.mrb[127].mxu0 }
 0x21b   : > { %v3084_v47 = vadd.f32 %v4467_v18, %v5820_v53  ;;  %v4470_v7 = vadd.f32 %v4469_v50, %v4468_v30  ;;  %3260 = vmatmul.mubr.bf16.gmra.mrb[120].mxu1 %v3106_v45 }
 0x21c   : > { %3269 = vmatprep.mubr.bf16.mxu1 %v4682_v36 }
 0x21d   : > { %v3085_v22 = vadd.f32 %v4470_v7, %v5822_v10  ;;  %v3097_v25 = vmax.f32 %v3084_v47, 0.0 }
 0x21f   : > { %v3098_v32 = vmax.f32 %v3085_v22, 0.0  ;;  %v4471_v54 = vpop.f32.mrb[128].mxu0 }
 0x220   : > { %v4472_v58 = vpop.f32.mrb[129].mxu0 }
 0x221   : > { %v4473_v39 = vadd.f32 %v4472_v58, %v4471_v54  ;;  %v4474_v37 = vpop.f32.mrb[130].mxu0  ;;  %v3107_v6 = vpack.c.bf16 %v3098_v32, %v3097_v25  ;;  %v3316_v32 = vld [vmem:[#allocation2 + $0x50] sm:$0xff]  ;;  %v3317_v54 = vld [vmem:[#allocation2 + $0x58] sm:$0xff] }
 0x222   : > { %v4475_v14 = vpop.f32.mrb[131].mxu0 }
 0x223   : > { %v3086_v26 = vadd.f32 %v4473_v39, %v5826_v33  ;;  %v4476_v13 = vadd.f32 %v4475_v14, %v4474_v37  ;;  %3270 = vmatmul.mubr.bf16.gmra.mrb[124].mxu1 %v3107_v6  ;;  %v3318_v39 = vld [vmem:[#allocation2 + $0x60] sm:$0xff]  ;;  %v3319_v14 = vld [vmem:[#allocation2 + $0x68] sm:$0xff] }
 0x224   : > { %3279 = vmatprep.mubr.bf16.mxu1 %v4682_v36 }
 0x225   : > { %v3087_v53 = vadd.f32 %v4476_v13, %v5828_v57  ;;  %v3099_v28 = vmax.f32 %v3086_v26, 0.0 }
 0x227   : > { %v3100_v46 = vmax.f32 %v3087_v53, 0.0  ;;  %v4477_v12 = vpop.f32.mrb[132].mxu0 }
 0x228   : > { %v4478_v10 = vpop.f32.mrb[133].mxu0 }
 0x229   : > { %v4479_v0 = vadd.f32 %v4478_v10, %v4477_v12  ;;  %v4480_v2 = vpop.f32.mrb[134].mxu0  ;;  %v3108_v56 = vpack.c.bf16 %v3100_v46, %v3099_v28 }
 0x22a   : > { %v4481_v38 = vpop.f32.mrb[135].mxu0 }
 0x22b   : > { %v3088_v4 = vadd.f32 %v4479_v0, %v5832_v48  ;;  %v4482_v49 = vadd.f32 %v4481_v38, %v4480_v2  ;;  %3280 = vmatmul.mubr.bf16.gmra.mrb[128].mxu1 %v3108_v56  ;;  %v3320_v56 = vld [vmem:[#allocation2 + $0x70] sm:$0xff]  ;;  %v3321_v38 = vld [vmem:[#allocation2 + $0x78] sm:$0xff] }
 0x22c   : > { %3289 = vmatprep.mubr.bf16.mxu1 %v4682_v36 }
 0x22d   : > { %v3089_v33 = vadd.f32 %v4482_v49, %v5834_v59  ;;  %v3101_v3 = vmax.f32 %v3088_v4, 0.0  ;;  %v3310_v59 = vld [vmem:[#allocation2 + $0x20] sm:$0xff] }
 0x22e   : > { %v3322_v49 = vld [vmem:[#allocation2 + $0x80] sm:$0xff] }
 0x22f   : > { %v3102_v44 = vmax.f32 %v3089_v33, 0.0  ;;  %v4483_v24 = vpop.f32.mrb[136].mxu0 }
 0x230   : > { %v4484_v57 = vpop.f32.mrb[137].mxu0 }
 0x231   : > { %v4485_v27 = vadd.f32 %v4484_v57, %v4483_v24  ;;  %v4486_v8 = vpop.f32.mrb[138].mxu0  ;;  %v3109_v51 = vpack.c.bf16 %v3102_v44, %v3101_v3  ;;  %v3323_v44 = vld [vmem:[#allocation2 + $0x88] sm:$0xff] }
 0x232   : > { %v4487_v23 = vpop.f32.mrb[139].mxu0 }
 0x233   : > { %v3090_v17 = vadd.f32 %v4485_v27, %v5837_v20  ;;  %3290 = vmatmul.mubr.bf16.gmra.mrb[132].mxu1 %v3109_v51 }
 0x234   : > { %3299 = vmatprep.mubr.bf16.mxu1 %v4682_v36 }
 0x235   : > { %v3103_v48 = vmax.f32 %v3090_v17, 0.0 }
 0x237   : > { %v3110_v60 = vpack.c.bf16 %v3103_v48, %v3103_v48 }
 0x23b   : > { %3300 = vmatmul.mubr.bf16.gmra.mrb[136].mxu1 %v3110_v60 }
 0x2de   : > { %v3241_v55 = vpop.f32.mrb[112].mxu1 }
 0x2df   : > { %v5858_v1 = vadd.f32 %v3308_v5, %v3241_v55  ;;  %v3243_v31 = vpop.f32.mrb[113].mxu1  ;;  %v3324_v5 = vld [vmem:[#allocation2 + $0x90] sm:$0xff] }
 0x2e0   : > { %v5860_v41 = vadd.f32 %v3309_v15, %v3243_v31  ;;  %v3245_v29 = vpop.f32.mrb[114].mxu1  ;;  %v3325_v15 = vld [vmem:[#allocation2 + $0x98] sm:$0xff] }
 0x2e1   : > { %v3360_v34 = vmax.f32 %v5858_v1, 0.0  ;;  %v5863_v20 = vadd.f32 %v3310_v59, %v3245_v29  ;;  %v3247_v42 = vpop.f32.mrb[115].mxu1  ;;  %v3326_v59 = vld [vmem:[#allocation2 + $0xa0] sm:$0xff]  ;;  %v3327_v29 = vld [vmem:[#allocation2 + $0xa8] sm:$0xff] }
 0x2e2   : > { %v3361_v36 = vmax.f32 %v5860_v41, 0.0  ;;  %v5866_v21 = vadd.f32 %v3311_v52, %v3247_v42 }
 0x2e3   : > { %v3362_v16 = vmax.f32 %v5863_v20, 0.0  ;;  %3390 = vst [vmem:[%s6205_s4] sm:$0xff] (!%p3962_p5), %v3360_v34 }
 0x2e4   : > { %v3363_v62 = vmax.f32 %v5866_v21, 0.0  ;;  %3391 = vst [vmem:[%s6205_s4 + $0x8] sm:$0xff] (!%p3962_p5), %v3361_v36 }
 0x2e5   : > { %3392 = vst [vmem:[%s6205_s4 + $0x10] sm:$0xff] (!%p3962_p5), %v3362_v16 }
 0x2e6   : > { %v3251_v11 = vpop.f32.mrb[116].mxu1  ;;  %3393 = vst [vmem:[%s6205_s4 + $0x18] sm:$0xff] (!%p3962_p5), %v3363_v62 }
 0x2e7   : > { %v5870_v63 = vadd.f32 %v3312_v9, %v3251_v11  ;;  %v3253_v61 = vpop.f32.mrb[117].mxu1 }
 0x2e8   : > { %v5872_v19 = vadd.f32 %v3313_v35, %v3253_v61  ;;  %v3255_v18 = vpop.f32.mrb[118].mxu1 }
 0x2e9   : > { %v3364_v30 = vmax.f32 %v5870_v63, 0.0  ;;  %v5875_v45 = vadd.f32 %v3314_v43, %v3255_v18  ;;  %v3257_v50 = vpop.f32.mrb[119].mxu1 }
 0x2ea   : > { %v3365_v47 = vmax.f32 %v5872_v19, 0.0  ;;  %v5878_v7 = vadd.f32 %v3315_v40, %v3257_v50 }
 0x2eb   : > { %v3366_v22 = vmax.f32 %v5875_v45, 0.0  ;;  %3394 = vst [vmem:[%s6205_s4 + $0x20] sm:$0xff] (!%p3962_p5), %v3364_v30 }
 0x2ec   : > { %v3367_v25 = vmax.f32 %v5878_v7, 0.0  ;;  %3395 = vst [vmem:[%s6205_s4 + $0x28] sm:$0xff] (!%p3962_p5), %v3365_v47 }
 0x2ed   : > { %3396 = vst [vmem:[%s6205_s4 + $0x30] sm:$0xff] (!%p3962_p5), %v3366_v22 }
 0x2ee   : > { %v3261_v58 = vpop.f32.mrb[120].mxu1  ;;  %3397 = vst [vmem:[%s6205_s4 + $0x38] sm:$0xff] (!%p3962_p5), %v3367_v25 }
 0x2ef   : > { %v5882_v37 = vadd.f32 %v3316_v32, %v3261_v58  ;;  %v3263_v6 = vpop.f32.mrb[121].mxu1  ;;  %v3328_v32 = vld [vmem:[#allocation2 + $0xb0] sm:$0xff] }
 0x2f0   : > { %v5884_v26 = vadd.f32 %v3317_v54, %v3263_v6  ;;  %v3265_v13 = vpop.f32.mrb[122].mxu1  ;;  %v3329_v54 = vld [vmem:[#allocation2 + $0xb8] sm:$0xff] }
 0x2f1   : > { %v3368_v53 = vmax.f32 %v5882_v37, 0.0  ;;  %v5887_v28 = vadd.f32 %v3318_v39, %v3265_v13  ;;  %v3267_v46 = vpop.f32.mrb[123].mxu1  ;;  %v3330_v39 = vld [vmem:[#allocation2 + $0xc0] sm:$0xff]  ;;  %v3331_v13 = vld [vmem:[#allocation2 + $0xc8] sm:$0xff] }
 0x2f2   : > { %v3369_v12 = vmax.f32 %v5884_v26, 0.0  ;;  %v5890_v10 = vadd.f32 %v3319_v14, %v3267_v46 }
 0x2f3   : > { %v3370_v0 = vmax.f32 %v5887_v28, 0.0  ;;  %3398 = vst [vmem:[%s6205_s4 + $0x40] sm:$0xff] (!%p3962_p5), %v3368_v53 }
 0x2f4   : > { %v3371_v2 = vmax.f32 %v5890_v10, 0.0  ;;  %3399 = vst [vmem:[%s6205_s4 + $0x48] sm:$0xff] (!%p3962_p5), %v3369_v12 }
 0x2f5   : > { %3400 = vst [vmem:[%s6205_s4 + $0x50] sm:$0xff] (!%p3962_p5), %v3370_v0 }
 0x2f6   : > { %v3271_v4 = vpop.f32.mrb[124].mxu1  ;;  %3401 = vst [vmem:[%s6205_s4 + $0x58] sm:$0xff] (!%p3962_p5), %v3371_v2 }
 0x2f7   : > { %v5894_v33 = vadd.f32 %v3320_v56, %v3271_v4  ;;  %v3273_v3 = vpop.f32.mrb[125].mxu1 }
 0x2f8   : > { %v5896_v24 = vadd.f32 %v3321_v38, %v3273_v3  ;;  %v3275_v57 = vpop.f32.mrb[126].mxu1 }
 0x2f9   : > { %v3372_v27 = vmax.f32 %v5894_v33, 0.0  ;;  %v5899_v8 = vadd.f32 %v3322_v49, %v3275_v57  ;;  %v3277_v51 = vpop.f32.mrb[127].mxu1 }
 0x2fa   : > { %v3373_v23 = vmax.f32 %v5896_v24, 0.0  ;;  %v5902_v17 = vadd.f32 %v3323_v44, %v3277_v51 }
 0x2fb   : > { %v3374_v48 = vmax.f32 %v5899_v8, 0.0  ;;  %3402 = vst [vmem:[%s6205_s4 + $0x60] sm:$0xff] (!%p3962_p5), %v3372_v27 }
 0x2fc   : > { %v3375_v60 = vmax.f32 %v5902_v17, 0.0  ;;  %3403 = vst [vmem:[%s6205_s4 + $0x68] sm:$0xff] (!%p3962_p5), %v3373_v23 }
 0x2fd   : > { %3404 = vst [vmem:[%s6205_s4 + $0x70] sm:$0xff] (!%p3962_p5), %v3374_v48 }
 0x2fe   : > { %v3281_v55 = vpop.f32.mrb[128].mxu1  ;;  %3405 = vst [vmem:[%s6205_s4 + $0x78] sm:$0xff] (!%p3962_p5), %v3375_v60 }
 0x2ff   : > { %v5906_v31 = vadd.f32 %v3324_v5, %v3281_v55  ;;  %v3283_v52 = vpop.f32.mrb[129].mxu1  ;;  %v3332_v5 = vld [vmem:[#allocation2 + $0xd0] sm:$0xff] }
 0x300   : > { %v5908_v42 = vadd.f32 %v3325_v15, %v3283_v52  ;;  %v3285_v9 = vpop.f32.mrb[130].mxu1  ;;  %v3333_v15 = vld [vmem:[#allocation2 + $0xd8] sm:$0xff] }
 0x301   : > { %v3376_v35 = vmax.f32 %v5906_v31, 0.0  ;;  %v5911_v11 = vadd.f32 %v3326_v59, %v3285_v9  ;;  %v3287_v43 = vpop.f32.mrb[131].mxu1 }
 0x302   : > { %v3377_v61 = vmax.f32 %v5908_v42, 0.0  ;;  %v5914_v40 = vadd.f32 %v3327_v29, %v3287_v43 }
 0x303   : > { %v3378_v18 = vmax.f32 %v5911_v11, 0.0  ;;  %3406 = vst [vmem:[%s6205_s4 + $0x80] sm:$0xff] (!%p3962_p5), %v3376_v35 }
 0x304   : > { %v3379_v50 = vmax.f32 %v5914_v40, 0.0  ;;  %3407 = vst [vmem:[%s6205_s4 + $0x88] sm:$0xff] (!%p3962_p5), %v3377_v61 }
 0x305   : > { %3408 = vst [vmem:[%s6205_s4 + $0x90] sm:$0xff] (!%p3962_p5), %v3378_v18 }
 0x306   : > { %v3291_v58 = vpop.f32.mrb[132].mxu1  ;;  %3409 = vst [vmem:[%s6205_s4 + $0x98] sm:$0xff] (!%p3962_p5), %v3379_v50 }
 0x307   : > { %v5918_v6 = vadd.f32 %v3328_v32, %v3291_v58  ;;  %v3293_v14 = vpop.f32.mrb[133].mxu1 }
 0x308   : > { %v5920_v46 = vadd.f32 %v3329_v54, %v3293_v14  ;;  %v3295_v56 = vpop.f32.mrb[134].mxu1 }
 0x309   : > { %v3380_v38 = vmax.f32 %v5918_v6, 0.0  ;;  %v5923_v4 = vadd.f32 %v3330_v39, %v3295_v56  ;;  %v3297_v49 = vpop.f32.mrb[135].mxu1 }
 0x30a   : > { %v3381_v3 = vmax.f32 %v5920_v46, 0.0  ;;  %v5926_v44 = vadd.f32 %v3331_v13, %v3297_v49 }
 0x30b   : > { %v3382_v57 = vmax.f32 %v5923_v4, 0.0  ;;  %3410 = vst [vmem:[%s6205_s4 + $0xa0] sm:$0xff] (!%p3962_p5), %v3380_v38 }
 0x30c   : > { %v3383_v51 = vmax.f32 %v5926_v44, 0.0  ;;  %3389 = sbr.rel (%p3962_p5) target bundleno = 789 (0x315), region = 44  ;;  %3411 = vst [vmem:[%s6205_s4 + $0xa8] sm:$0xff] (!%p3962_p5), %v3381_v3 }
 0x30d   : > { %3412 = vst [vmem:[%s6205_s4 + $0xb0] sm:$0xff] (!%p3962_p5), %v3382_v57 }
 0x30e   : > { %v3301_v55 = vpop.f32.mrb[136].mxu1  ;;  %3413 = vst [vmem:[%s6205_s4 + $0xb8] sm:$0xff] (!%p3962_p5), %v3383_v51 }
 0x30f   : > { %v5930_v59 = vadd.f32 %v3332_v5, %v3301_v55  ;;  %v3303_v52 = vpop.f32.mrb[137].mxu1 }
 0x310   : > { %v5932_v29 = vadd.f32 %v3333_v15, %v3303_v52  ;;  %v3305_v9 = vpop.f32.mrb[138].mxu1 }
 0x311   : > { %v3384_v43 = vmax.f32 %v5930_v59, 0.0  ;;  %v3306_v32 = vpop.f32.mrb[139].mxu1 }
 0x312   : > { %v3385_v54 = vmax.f32 %v5932_v29, 0.0 }
 0x313   : > { %3414 = vst [vmem:[%s6205_s4 + $0xc0] sm:$0xff] %v3384_v43 }
 0x314   : > { %3415 = vst [vmem:[%s6205_s4 + $0xc8] sm:$0xff] %v3385_v54 }
 0x315 PF: > { %p3963_p6 = scmp.ge.s32.totalorder %s4714_s16, 2 }
 0x316   : > { %v3420_v58 = vld [vmem:[%s6202_s1] sm:$0xff] (!%p3963_p6)  ;;  %v3421_v39 = vld [vmem:[%s6202_s1 + $0x8] sm:$0xff] (!%p3963_p6)  ;;  %v3422_v14 = vld [vmem:[%s6202_s1 + $0x10] sm:$0xff] (!%p3963_p6) }
 0x317   : > { %3419 = sbr.rel (%p3963_p6) target bundleno = 806 (0x326), region = 48  ;;  %v3446_v13 = vmul.f32 (!%p3963_p6), %v3420_v58, %v3360_v34  ;;  %v3447_v56 = vmul.f32 (!%p3963_p6), %v3421_v39, %v3361_v36  ;;  %v3448_v49 = vmul.f32 (!%p3963_p6), %v3422_v14, %v3362_v16  ;;  %v3423_v5 = vld [vmem:[%s6202_s1 + $0x18] sm:$0xff] (!%p3963_p6)  ;;  %v3424_v15 = vld [vmem:[%s6202_s1 + $0x20] sm:$0xff] (!%p3963_p6)  ;;  %v3425_v55 = vld [vmem:[%s6202_s1 + $0x28] sm:$0xff] (!%p3963_p6) }
 0x318   : > { %v3449_v1 = vmul.f32 (!%p3963_p6), %v3423_v5, %v3363_v62  ;;  %v3450_v41 = vmul.f32 (!%p3963_p6), %v3424_v15, %v3364_v30  ;;  %v3451_v34 = vmul.f32 (!%p3963_p6), %v3425_v55, %v3365_v47  ;;  %v3426_v20 = vld [vmem:[%s6202_s1 + $0x30] sm:$0xff] (!%p3963_p6)  ;;  %v3427_v36 = vld [vmem:[%s6202_s1 + $0x38] sm:$0xff] (!%p3963_p6)  ;;  %v3428_v16 = vld [vmem:[%s6202_s1 + $0x40] sm:$0xff] (!%p3963_p6) }
 0x319   : > { %3472 = vst [vmem:[#allocation2 + $0x10] sm:$0xff] (!%p3963_p6), %v3446_v13  ;;  %3473 = vst [vmem:[#allocation2 + $0x18] sm:$0xff] (!%p3963_p6), %v3447_v56  ;;  %v3452_v21 = vmul.f32 (!%p3963_p6), %v3426_v20, %v3366_v22  ;;  %v3453_v62 = vmul.f32 (!%p3963_p6), %v3427_v36, %v3367_v25  ;;  %v3454_v63 = vmul.f32 (!%p3963_p6), %v3428_v16, %v3368_v53  ;;  %v3429_v19 = vld [vmem:[%s6202_s1 + $0x48] sm:$0xff] (!%p3963_p6)  ;;  %v3430_v30 = vld [vmem:[%s6202_s1 + $0x50] sm:$0xff] (!%p3963_p6) }
 0x31a   : > { %3474 = vst [vmem:[#allocation2 + $0x20] sm:$0xff] (!%p3963_p6), %v3448_v49  ;;  %v3431_v47 = vld [vmem:[%s6202_s1 + $0x58] sm:$0xff] (!%p3963_p6)  ;;  %3475 = vst [vmem:[#allocation2 + $0x28] sm:$0xff] (!%p3963_p6), %v3449_v1  ;;  %v3455_v45 = vmul.f32 (!%p3963_p6), %v3429_v19, %v3369_v12  ;;  %v3456_v7 = vmul.f32 (!%p3963_p6), %v3430_v30, %v3370_v0  ;;  %v3432_v25 = vld [vmem:[%s6202_s1 + $0x60] sm:$0xff] (!%p3963_p6) }
 0x31b   : > { %3476 = vst [vmem:[#allocation2 + $0x30] sm:$0xff] (!%p3963_p6), %v3450_v41  ;;  %3477 = vst [vmem:[#allocation2 + $0x38] sm:$0xff] (!%p3963_p6), %v3451_v34  ;;  %v3457_v22 = vmul.f32 (!%p3963_p6), %v3431_v47, %v3371_v2  ;;  %v3433_v37 = vld [vmem:[%s6202_s1 + $0x68] sm:$0xff] (!%p3963_p6)  ;;  %v3434_v53 = vld [vmem:[%s6202_s1 + $0x70] sm:$0xff] (!%p3963_p6)  ;;  %v3458_v26 = vmul.f32 (!%p3963_p6), %v3432_v25, %v3372_v27 }
 0x31c   : > { %3478 = vst [vmem:[#allocation2 + $0x40] sm:$0xff] (!%p3963_p6), %v3452_v21  ;;  %3479 = vst [vmem:[#allocation2 + $0x48] sm:$0xff] (!%p3963_p6), %v3453_v62  ;;  %v3459_v28 = vmul.f32 (!%p3963_p6), %v3433_v37, %v3373_v23  ;;  %v3460_v12 = vmul.f32 (!%p3963_p6), %v3434_v53, %v3374_v48  ;;  %v3435_v10 = vld [vmem:[%s6202_s1 + $0x78] sm:$0xff] (!%p3963_p6)  ;;  %v3436_v0 = vld [vmem:[%s6202_s1 + $0x80] sm:$0xff] (!%p3963_p6) }
 0x31d   : > { %3480 = vst [vmem:[#allocation2 + $0x50] sm:$0xff] (!%p3963_p6), %v3454_v63  ;;  %v3437_v2 = vld [vmem:[%s6202_s1 + $0x88] sm:$0xff] (!%p3963_p6)  ;;  %3481 = vst [vmem:[#allocation2 + $0x58] sm:$0xff] (!%p3963_p6), %v3455_v45  ;;  %v3461_v33 = vmul.f32 (!%p3963_p6), %v3435_v10, %v3375_v60  ;;  %v3462_v24 = vmul.f32 (!%p3963_p6), %v3436_v0, %v3376_v35  ;;  %v3438_v8 = vld [vmem:[%s6202_s1 + $0x90] sm:$0xff] (!%p3963_p6) }
 0x31e   : > { %3482 = vst [vmem:[#allocation2 + $0x60] sm:$0xff] %v3456_v7  ;;  %3483 = vst [vmem:[#allocation2 + $0x68] sm:$0xff] %v3457_v22  ;;  %v3463_v27 = vmul.f32 %v3437_v2, %v3377_v61  ;;  %v3439_v23 = vld [vmem:[%s6202_s1 + $0x98] sm:$0xff]  ;;  %v3440_v48 = vld [vmem:[%s6202_s1 + $0xa0] sm:$0xff]  ;;  %v3464_v17 = vmul.f32 %v3438_v8, %v3378_v18 }
 0x31f   : > { %3484 = vst [vmem:[#allocation2 + $0x70] sm:$0xff] %v3458_v26  ;;  %3485 = vst [vmem:[#allocation2 + $0x78] sm:$0xff] %v3459_v28  ;;  %v3465_v60 = vmul.f32 %v3439_v23, %v3379_v50  ;;  %v3466_v31 = vmul.f32 %v3440_v48, %v3380_v38  ;;  %v3441_v42 = vld [vmem:[%s6202_s1 + $0xa8] sm:$0xff]  ;;  %v3442_v35 = vld [vmem:[%s6202_s1 + $0xb0] sm:$0xff] }
 0x320   : > { %3486 = vst [vmem:[#allocation2 + $0x80] sm:$0xff] %v3460_v12  ;;  %v3443_v61 = vld [vmem:[%s6202_s1 + $0xb8] sm:$0xff]  ;;  %3487 = vst [vmem:[#allocation2 + $0x88] sm:$0xff] %v3461_v33  ;;  %v3467_v11 = vmul.f32 %v3441_v42, %v3381_v3  ;;  %v3468_v40 = vmul.f32 %v3442_v35, %v3382_v57  ;;  %v3444_v50 = vld [vmem:[%s6202_s1 + $0xc0] sm:$0xff] }
 0x321   : > { %3488 = vst [vmem:[#allocation2 + $0x90] sm:$0xff] %v3462_v24  ;;  %3489 = vst [vmem:[#allocation2 + $0x98] sm:$0xff] %v3463_v27  ;;  %v3469_v18 = vmul.f32 %v3443_v61, %v3383_v51  ;;  %v3445_v6 = vld [vmem:[%s6202_s1 + $0xc8] sm:$0xff]  ;;  %v3470_v46 = vmul.f32 %v3444_v50, %v3384_v43 }
 0x322   : > { %3490 = vst [vmem:[#allocation2 + $0xa0] sm:$0xff] %v3464_v17  ;;  %3491 = vst [vmem:[#allocation2 + $0xa8] sm:$0xff] %v3465_v60  ;;  %v3471_v38 = vmul.f32 %v3445_v6, %v3385_v54 }
 0x323   : > { %3492 = vst [vmem:[#allocation2 + $0xb0] sm:$0xff] %v3466_v31  ;;  %3493 = vst [vmem:[#allocation2 + $0xb8] sm:$0xff] %v3467_v11 }
 0x324   : > { %3494 = vst [vmem:[#allocation2 + $0xc0] sm:$0xff] %v3468_v40  ;;  %3495 = vst [vmem:[#allocation2 + $0xc8] sm:$0xff] %v3469_v18 }
 0x325   : > { %3496 = vst [vmem:[#allocation2 + $0xd0] sm:$0xff] %v3470_v46  ;;  %3497 = vst [vmem:[#allocation2 + $0xd8] sm:$0xff] %v3471_v38 }
 0x326 PF: > { %s14_s15 = sadd.s32 1, %s4680_s15  }
 0x327   : > { %p11_p7 = scmp.ge.s32.totalorder %s14_s15, 5  }
 0x329   :  { %13 = sbr.rel (!%p11_p7) target bundleno = 1 (0x1), region = 85 }

</bundles_post_ra>
